<compile_context>
chip_gen: v6e
topology: v6e:2x2x1
jax: 0.10.0
libtpu: 0.0.40
codegen_flags: <defaults>
</compile_context>

<pallas_src>
import functools

import jax
import jax.numpy as jnp
import numpy as np
from jax import lax
from jax.experimental import pallas as pl
from jax.experimental.pallas import tpu as pltpu


def _lstm1d_kernel(xcat_ref,   # (T*TB, 2E) bf16 : row t*TB+b = [x[b,t] | x[b,T-1-t]] (this tile)
                   wx_ref,     # (2E, 8H)  bf16 : fused, gate-interleaved input weights
                   b_ref,      # (1, 8H)   f32  : fused combined biases (b_ih + b_hh)
                   wh_ref,     # (2H, 8H)  bf16 : fused block-diagonal recurrent weights
                   wtag_ref,   # (2H, CP)  bf16 : hidden2tag weights, zero-padded to CP
                   btag_ref,   # (1, CP)   f32  : hidden2tag bias, pad classes at -1e9
                   out_ref,    # (TB, CP)  f32  : log-probs for this batch tile
                   gx_ref):    # ((T-1)*TB, 8H) f32 scratch: input gates for steps 1..T-1
    TBT = xcat_ref.shape[0]
    G = wx_ref.shape[1]            # 8H
    H2 = G // 4                    # 2H
    TB = out_ref.shape[0]          # batch-tile rows
    T = TBT // TB

    # (1) Hoisted input GEMM: one big MXU matmul + one bias add for all
    #     timesteps and both directions.
    gx_all = (
        jnp.dot(xcat_ref[...], wx_ref[...], preferred_element_type=jnp.float32)
        + b_ref[...])                                     # (T*TB, 8H) f32

    # Steps 1..T-1 are cached in VMEM (too big for the vreg file at TB>=8);
    # step 0 is consumed straight from the value (no store->load stall).
    if T > 1:
        gx_ref[...] = gx_all[TB:, :]                      # 8-row aligned f32 slice

    # (2) Peeled t = 0: h = c = 0, so the recurrent dot and f*c terms vanish
    #     (and the forget-gate sigmoid is not needed at all).
    g0 = gx_all[:TB, :]
    i0 = jax.nn.sigmoid(g0[:, 0 * H2:1 * H2])
    c0 = i0 * jnp.tanh(g0[:, 2 * H2:3 * H2])
    o0 = jax.nn.sigmoid(g0[:, 3 * H2:4 * H2])
    h0 = o0 * jnp.tanh(c0)

    # (3) Fused bidirectional recurrence for t = 1..T-1, fully unrolled.
    #     One (TB, 2H) @ (2H, 8H) dot per step, wh streamed from the VMEM ref.
    def step(t, carry):
        h_cat, c_cat, s_cat = carry                       # (TB, 2H) f32 each
        gx = gx_ref[pl.ds((t - 1) * TB, TB), :]           # (TB, 8H): fwd@t, bwd@T-1-t
        gh = jnp.dot(h_cat.astype(jnp.bfloat16), wh_ref[...],
                     preferred_element_type=jnp.float32)  # (TB, 8H) f32
        gates = gx + gh
        # gate-interleaved layout -> contiguous (TB, 2H) slabs per nonlinearity
        i = jax.nn.sigmoid(gates[:, 0 * H2:1 * H2])
        f = jax.nn.sigmoid(gates[:, 1 * H2:2 * H2])
        g = jnp.tanh(gates[:, 2 * H2:3 * H2])
        o = jax.nn.sigmoid(gates[:, 3 * H2:4 * H2])
        c_new = f * c_cat + i * g
        h_new = o * jnp.tanh(c_new)
        # mean over time only needs running sums (backward order is irrelevant).
        return h_new, c_new, s_cat + h_new

    _, _, s_cat = lax.fori_loop(1, T, step, (h0, c0, h0), unroll=True)

    # (4) Epilogue: mean -> hidden2tag -> log_softmax on a lane-dense CP slab.
    mean = s_cat * (1.0 / T)                              # (TB, 2H) = [mean_f | mean_b]
    tag = (jnp.dot(mean.astype(jnp.bfloat16), wtag_ref[...],
                   preferred_element_type=jnp.float32)
           + btag_ref[...])                               # (TB, CP); pads ~ -1e9
    m = jnp.max(tag, axis=-1, keepdims=True)
    lse = jnp.log(jnp.sum(jnp.exp(tag - m), axis=-1, keepdims=True)) + m
    out_ref[...] = tag - lse


def _round_up(n, m):
    return ((n + m - 1) // m) * m


@functools.partial(jax.jit, static_argnames=("num_classes",))
def lstm1d_forward(x, fused, *, num_classes):
    """x: (B, T, vocab) f32, fused: prepare_params(...) -> (B, num_classes) log-probs."""
    B, T, E = x.shape
    G = fused["wh"].shape[1]                  # 8H
    CP = fused["btag"].shape[1]               # padded class count (multiple of 128)

    # Batch padding / tiling: at least 8 rows (sublane width), tiles of up to
    # 128 rows; the tile axis is a "parallel" grid (v7x: sharded across 2 TCs).
    TB = min(_round_up(max(B, 8), 8), 128)
    B_pad = _round_up(max(B, TB), TB)
    n_tiles = B_pad // TB

    xp = jnp.zeros((B_pad, T, E), jnp.float32).at[:B].set(x.astype(jnp.float32))
    x_t = jnp.transpose(xp, (1, 0, 2))                         # (T, B_pad, E) time-major
    x_cat = jnp.concatenate([x_t, x_t[::-1]], axis=-1)         # (T, B_pad, 2E): [fwd | rev]
    # split batch into contiguous tiles; each tile is a time-major flat slab
    x_cat = (x_cat.reshape(T, n_tiles, TB, 2 * E)
             .transpose(1, 0, 2, 3)
             .reshape(n_tiles, T * TB, 2 * E)
             .astype(jnp.bfloat16))                            # (n_tiles, T*TB, 2E)

    out_pad = pl.pallas_call(
        _lstm1d_kernel,
        out_shape=jax.ShapeDtypeStruct((B_pad, CP), jnp.float32),
        grid_spec=pltpu.PrefetchScalarGridSpec(
            num_scalar_prefetch=0,
            grid=(n_tiles,),
            in_specs=[
                pl.BlockSpec((None, T * TB, 2 * E), lambda i: (i, 0, 0)),
                pl.BlockSpec(fused["wx"].shape, lambda i: (0, 0)),
                pl.BlockSpec(fused["b"].shape, lambda i: (0, 0)),
                pl.BlockSpec(fused["wh"].shape, lambda i: (0, 0)),
                pl.BlockSpec(fused["wtag"].shape, lambda i: (0, 0)),
                pl.BlockSpec(fused["btag"].shape, lambda i: (0, 0)),
            ],
            out_specs=pl.BlockSpec((TB, CP), lambda i: (i, 0)),
            scratch_shapes=[pltpu.VMEM((max(T - 1, 1) * TB, G), jnp.float32)],
        ),
        compiler_params=pltpu.CompilerParams(
            dimension_semantics=("parallel",)),
    )(x_cat, fused["wx"], fused["b"], fused["wh"], fused["wtag"], fused["btag"])
    return out_pad[:B, :num_classes]


def make_params(key, vocab_size, hidden_dim, tagset_size):
    """Deterministic synthetic weights in PyTorch nn.LSTM / nn.Linear layouts."""
    E, H, C = vocab_size, hidden_dim, tagset_size
    k = 1.0 / np.sqrt(H)
    kt = 1.0 / np.sqrt(2 * H)
    keys = jax.random.split(key, 10)

    def u(kk, shape, s):
        return jax.random.uniform(kk, shape, jnp.float32, -s, s)

    # PyTorch layouts: weight_ih (4H,E), weight_hh (4H,H), biases (4H,), gate order [i,f,g,o]
    return {
        "w_ih_f": u(keys[0], (4 * H, E), k), "w_hh_f": u(keys[1], (4 * H, H), k),
        "b_ih_f": u(keys[2], (4 * H,), k),   "b_hh_f": u(keys[3], (4 * H,), k),
        "w_ih_b": u(keys[4], (4 * H, E), k), "w_hh_b": u(keys[5], (4 * H, H), k),
        "b_ih_b": u(keys[6], (4 * H,), k),   "b_hh_b": u(keys[7], (4 * H,), k),
        "w_tag":  u(keys[8], (C, 2 * H), kt), "b_tag": u(keys[9], (C,), kt),
    }


def prepare_params(p):
    """One-time host-side fusion of PyTorch-layout weights into kernel layouts.

    Fused gate-column layout (width 8H): [i_f, i_b, f_f, f_b, g_f, g_b, o_f, o_b].
    All fusions are assembled in f32 and cast to bf16 once (single rounding).
    """
    H = p["w_hh_f"].shape[1]
    E = p["w_ih_f"].shape[1]
    C = p["b_tag"].shape[0]
    G = 8 * H
    CP = ((C + 127) // 128) * 128          # lane-dense padded class count

    wx = jnp.zeros((2 * E, G), jnp.float32)   # rows [0:E)=x_t,  [E:2E)=x_{T-1-t}
    wh = jnp.zeros((2 * H, G), jnp.float32)   # rows [0:H)=h_f,  [H:2H)=h_b (block-diag)
    b = jnp.zeros((1, G), jnp.float32)
    for k in range(4):                         # PyTorch gate order [i, f, g, o]
        cf = slice(2 * k * H, (2 * k + 1) * H)        # fused cols: fwd block of gate k
        cb = slice((2 * k + 1) * H, (2 * k + 2) * H)  # fused cols: bwd block of gate k
        gk = slice(k * H, (k + 1) * H)                # rows in the PyTorch (4H, .) weight
        wx = wx.at[:E, cf].set(p["w_ih_f"][gk].T)
        wx = wx.at[E:, cb].set(p["w_ih_b"][gk].T)
        wh = wh.at[:H, cf].set(p["w_hh_f"][gk].T)
        wh = wh.at[H:, cb].set(p["w_hh_b"][gk].T)
        b = b.at[0, cf].set(p["b_ih_f"][gk] + p["b_hh_f"][gk])
        b = b.at[0, cb].set(p["b_ih_b"][gk] + p["b_hh_b"][gk])

    wtag = jnp.zeros((2 * H, CP), jnp.float32).at[:, :C].set(p["w_tag"].T)
    btag = jnp.full((1, CP), -1e9, jnp.float32).at[0, :C].set(p["b_tag"])

    return {
        "wx": wx.astype(jnp.bfloat16),
        "wh": wh.astype(jnp.bfloat16),
        "b": b,                              # biases stay f32
        "wtag": wtag.astype(jnp.bfloat16),   # NOTE: pad cols must stay exactly zero
        "btag": btag,
    }


def _reference_forward(x, p, matmul_dtype=jnp.float32):
    """Pure-JAX reference. matmul_dtype=bf16 mirrors the kernel's MXU precision."""
    B, T, E = x.shape
    H = p["w_hh_f"].shape[1]

    def dot(a, w):
        return jnp.dot(a.astype(matmul_dtype), w.astype(matmul_dtype),
                       preferred_element_type=jnp.float32)

    def run(xs, w_ih, w_hh, b_ih, b_hh):
        wi, wh = w_ih.T, w_hh.T
        b = (b_ih + b_hh)[None, :]

        def step(carry, x_t):
            h, c = carry
            g = dot(x_t, wi) + dot(h, wh) + b
            i = jax.nn.sigmoid(g[:, :H])
            f = jax.nn.sigmoid(g[:, H:2 * H])
            gg = jnp.tanh(g[:, 2 * H:3 * H])
            o = jax.nn.sigmoid(g[:, 3 * H:])
            c = f * c + i * gg
            h = o * jnp.tanh(c)
            return (h, c), h

        z = jnp.zeros((B, H), jnp.float32)
        _, hs = lax.scan(step, (z, z), xs)
        return hs                                        # (T, B, H)

    xs = jnp.transpose(x, (1, 0, 2)).astype(jnp.float32)
    hf = run(xs, p["w_ih_f"], p["w_hh_f"], p["b_ih_f"], p["b_hh_f"])
    hb = run(xs[::-1], p["w_ih_b"], p["w_hh_b"], p["b_ih_b"], p["b_hh_b"])[::-1]
    avg = jnp.mean(jnp.concatenate([hf, hb], axis=-1), axis=0)   # (B, 2H)
    tag = dot(avg, p["w_tag"].T) + p["b_tag"][None, :]
    return jax.nn.log_softmax(tag, axis=-1)


if __name__ == "__main__":
    # Small shapes consistent with the module: batch=2, seq=8, vocab=128,
    # hidden=128, tagset=16.
    B, T, VOCAB, HIDDEN, TAGSET = 2, 8, 128, 128, 16

    key = jax.random.PRNGKey(0)
    k_x, k_p = jax.random.split(key)
    x = jax.random.normal(k_x, (B, T, VOCAB), jnp.float32)
    params = make_params(k_p, VOCAB, HIDDEN, TAGSET)
    fused = prepare_params(params)

    out = jax.block_until_ready(lstm1d_forward(x, fused, num_classes=TAGSET))
    out = np.asarray(out)
    assert out.shape == (B, TAGSET)

    # Tight check against a reference mirroring the kernel's bf16-operand matmuls.
    ref_bf16 = np.asarray(jax.block_until_ready(
        _reference_forward(x, params, jnp.bfloat16)))
    np.testing.assert_allclose(out, ref_bf16, atol=1e-2, rtol=1e-2)

    # Looser check against the full-f32 faithful reference.
    ref_f32 = np.asarray(jax.block_until_ready(
        _reference_forward(x, params, jnp.float32)))
    np.testing.assert_allclose(out, ref_f32, atol=3e-2, rtol=3e-2)

    # log-softmax rows must sum to 1 in prob space
    np.testing.assert_allclose(np.exp(out).sum(-1), np.ones(B), atol=1e-5)

    print("KERNEL_OK")
</pallas_src>

<mosaic_0001>
module attributes {stable_mosaic.version = 11 : i64} {
  func.func @_lstm1d_kernel(%arg0: i32, %arg1: memref<1x64x256xbf16, #tpu.memory_space<vmem>>, %arg2: memref<256x1024xbf16, #tpu.memory_space<vmem>>, %arg3: memref<1x1024xf32, #tpu.memory_space<vmem>>, %arg4: memref<256x1024xbf16, #tpu.memory_space<vmem>>, %arg5: memref<256x128xbf16, #tpu.memory_space<vmem>>, %arg6: memref<1x128xf32, #tpu.memory_space<vmem>>, %arg7: memref<8x128xf32, #tpu.memory_space<vmem>>, %arg8: memref<56x1024xf32, #tpu.memory_space<vmem>>) attributes {dimension_semantics = [#tpu.dimension_semantics<parallel>], iteration_bounds = array<i64: 1>, scalar_prefetch = 0 : i64, scratch_operands = 1 : i64, tpu.core_type = #tpu.core_type<tc>, window_params = [{transform_indices = @transform_0, window_bounds = array<i64: 1, 64, 256>}, {pipeline_mode = #tpu.pipeline_mode<synchronous>, transform_indices = @transform_1, window_bounds = array<i64: 256, 1024>}, {pipeline_mode = #tpu.pipeline_mode<synchronous>, transform_indices = @transform_2, window_bounds = array<i64: 1, 1024>}, {pipeline_mode = #tpu.pipeline_mode<synchronous>, transform_indices = @transform_3, window_bounds = array<i64: 256, 1024>}, {pipeline_mode = #tpu.pipeline_mode<synchronous>, transform_indices = @transform_4, window_bounds = array<i64: 256, 128>}, {pipeline_mode = #tpu.pipeline_mode<synchronous>, transform_indices = @transform_5, window_bounds = array<i64: 1, 128>}, {transform_indices = @transform_6, window_bounds = array<i64: 8, 128>}]} {
    %c0 = arith.constant 0 : index
    %c0_0 = arith.constant 0 : index
    %c0_1 = arith.constant 0 : index
    %0 = vector.load %arg1[%c0, %c0_0, %c0_1] : memref<1x64x256xbf16, #tpu.memory_space<vmem>>, vector<1x64x256xbf16>
    %1 = vector.shape_cast %0 : vector<1x64x256xbf16> to vector<64x256xbf16>
    %c0_2 = arith.constant 0 : index
    %c0_3 = arith.constant 0 : index
    %2 = vector.load %arg2[%c0_2, %c0_3] : memref<256x1024xbf16, #tpu.memory_space<vmem>>, vector<256x1024xbf16>
    %cst = arith.constant dense<0.000000e+00> : vector<64x1024xf32>
    %3 = tpu.matmul %1, %2, %cst {dimension_numbers = #tpu.dot_dimension_numbers<[1], [0], [0], [1], [0, 0, 1, 1], [], []>} : vector<64x256xbf16>, vector<256x1024xbf16>, vector<64x1024xf32> -> vector<64x1024xf32>
    %c0_4 = arith.constant 0 : index
    %c0_5 = arith.constant 0 : index
    %4 = vector.load %arg3[%c0_4, %c0_5] : memref<1x1024xf32, #tpu.memory_space<vmem>>, vector<1x1024xf32>
    %5 = vector.broadcast %4 : vector<1x1024xf32> to vector<64x1024xf32>
    %6 = arith.addf %3, %5 : vector<64x1024xf32>
    %7 = vector.extract_strided_slice %6 {offsets = [8, 0], sizes = [56, 1024], strides = [1, 1]} : vector<64x1024xf32> to vector<56x1024xf32>
    %c0_6 = arith.constant 0 : index
    %c0_7 = arith.constant 0 : index
    %8 = vector.load %arg8[%c0_6, %c0_7] : memref<56x1024xf32, #tpu.memory_space<vmem>>, vector<56x1024xf32>
    tpu.vector_store %arg8[%c0_6, %c0_7], %7 {strides = array<i32>} : memref<56x1024xf32, #tpu.memory_space<vmem>>, vector<56x1024xf32>,
    %9 = vector.extract_strided_slice %6 {offsets = [0, 0], sizes = [8, 1024], strides = [1, 1]} : vector<64x1024xf32> to vector<8x1024xf32>
    %10 = vector.extract_strided_slice %9 {offsets = [0, 0], sizes = [8, 256], strides = [1, 1]} : vector<8x1024xf32> to vector<8x256xf32>
    %11 = arith.negf %10 : vector<8x256xf32>
    %12 = math.exp %11 : vector<8x256xf32>
    %cst_8 = arith.constant 1.000000e+00 : f32
    %13 = vector.broadcast %cst_8 : f32 to vector<8x256xf32>
    %14 = arith.addf %13, %12 : vector<8x256xf32>
    %15 = arith.divf %13, %14 : vector<8x256xf32>
    %16 = vector.extract_strided_slice %9 {offsets = [0, 512], sizes = [8, 256], strides = [1, 1]} : vector<8x1024xf32> to vector<8x256xf32>
    %17 = math.tanh %16 : vector<8x256xf32>
    %18 = arith.mulf %15, %17 : vector<8x256xf32>
    %19 = vector.extract_strided_slice %9 {offsets = [0, 768], sizes = [8, 256], strides = [1, 1]} : vector<8x1024xf32> to vector<8x256xf32>
    %20 = arith.negf %19 : vector<8x256xf32>
    %21 = math.exp %20 : vector<8x256xf32>
    %cst_9 = arith.constant 1.000000e+00 : f32
    %22 = vector.broadcast %cst_9 : f32 to vector<8x256xf32>
    %23 = arith.addf %22, %21 : vector<8x256xf32>
    %24 = arith.divf %22, %23 : vector<8x256xf32>
    %25 = math.tanh %18 : vector<8x256xf32>
    %26 = arith.mulf %24, %25 : vector<8x256xf32>
    %c1_i32 = arith.constant 1 : i32
    %c1_i32_10 = arith.constant 1 : i32
    %27 = arith.subi %c1_i32, %c1_i32_10 : i32
    %c8_i32 = arith.constant 8 : i32
    %28 = arith.muli %27, %c8_i32 : i32
    %29 = arith.index_cast %28 : i32 to index
    %c0_11 = arith.constant 0 : index
    %30 = vector.load %arg8[%29, %c0_11] : memref<56x1024xf32, #tpu.memory_space<vmem>>, vector<8x1024xf32>
    %31 = arith.truncf %26 : vector<8x256xf32> to vector<8x256xbf16>
    %c0_12 = arith.constant 0 : index
    %c0_13 = arith.constant 0 : index
    %32 = vector.load %arg4[%c0_12, %c0_13] : memref<256x1024xbf16, #tpu.memory_space<vmem>>, vector<256x1024xbf16>
    %cst_14 = arith.constant dense<0.000000e+00> : vector<8x1024xf32>
    %33 = tpu.matmul %31, %32, %cst_14 {dimension_numbers = #tpu.dot_dimension_numbers<[1], [0], [0], [1], [0, 0, 1, 1], [], []>} : vector<8x256xbf16>, vector<256x1024xbf16>, vector<8x1024xf32> -> vector<8x1024xf32>
    %34 = arith.addf %30, %33 : vector<8x1024xf32>
    %35 = vector.extract_strided_slice %34 {offsets = [0, 0], sizes = [8, 256], strides = [1, 1]} : vector<8x1024xf32> to vector<8x256xf32>
    %36 = arith.negf %35 : vector<8x256xf32>
    %37 = math.exp %36 : vector<8x256xf32>
    %cst_15 = arith.constant 1.000000e+00 : f32
    %38 = vector.broadcast %cst_15 : f32 to vector<8x256xf32>
    %39 = arith.addf %38, %37 : vector<8x256xf32>
    %40 = arith.divf %38, %39 : vector<8x256xf32>
    %41 = vector.extract_strided_slice %34 {offsets = [0, 256], sizes = [8, 256], strides = [1, 1]} : vector<8x1024xf32> to vector<8x256xf32>
    %42 = arith.negf %41 : vector<8x256xf32>
    %43 = math.exp %42 : vector<8x256xf32>
    %cst_16 = arith.constant 1.000000e+00 : f32
    %44 = vector.broadcast %cst_16 : f32 to vector<8x256xf32>
    %45 = arith.addf %44, %43 : vector<8x256xf32>
    %46 = arith.divf %44, %45 : vector<8x256xf32>
    %47 = vector.extract_strided_slice %34 {offsets = [0, 512], sizes = [8, 256], strides = [1, 1]} : vector<8x1024xf32> to vector<8x256xf32>
    %48 = math.tanh %47 : vector<8x256xf32>
    %49 = vector.extract_strided_slice %34 {offsets = [0, 768], sizes = [8, 256], strides = [1, 1]} : vector<8x1024xf32> to vector<8x256xf32>
    %50 = arith.negf %49 : vector<8x256xf32>
    %51 = math.exp %50 : vector<8x256xf32>
    %cst_17 = arith.constant 1.000000e+00 : f32
    %52 = vector.broadcast %cst_17 : f32 to vector<8x256xf32>
    %53 = arith.addf %52, %51 : vector<8x256xf32>
    %54 = arith.divf %52, %53 : vector<8x256xf32>
    %55 = arith.mulf %46, %18 : vector<8x256xf32>
    %56 = arith.mulf %40, %48 : vector<8x256xf32>
    %57 = arith.addf %55, %56 : vector<8x256xf32>
    %58 = math.tanh %57 : vector<8x256xf32>
    %59 = arith.mulf %54, %58 : vector<8x256xf32>
    %60 = arith.addf %26, %59 : vector<8x256xf32>
    %c2_i32 = arith.constant 2 : i32
    %c1_i32_18 = arith.constant 1 : i32
    %61 = arith.subi %c2_i32, %c1_i32_18 : i32
    %c8_i32_19 = arith.constant 8 : i32
    %62 = arith.muli %61, %c8_i32_19 : i32
    %63 = arith.index_cast %62 : i32 to index
    %c0_20 = arith.constant 0 : index
    %64 = vector.load %arg8[%63, %c0_20] : memref<56x1024xf32, #tpu.memory_space<vmem>>, vector<8x1024xf32>
    %65 = arith.truncf %59 : vector<8x256xf32> to vector<8x256xbf16>
    %c0_21 = arith.constant 0 : index
    %c0_22 = arith.constant 0 : index
    %66 = vector.load %arg4[%c0_21, %c0_22] : memref<256x1024xbf16, #tpu.memory_space<vmem>>, vector<256x1024xbf16>
    %cst_23 = arith.constant dense<0.000000e+00> : vector<8x1024xf32>
    %67 = tpu.matmul %65, %66, %cst_23 {dimension_numbers = #tpu.dot_dimension_numbers<[1], [0], [0], [1], [0, 0, 1, 1], [], []>} : vector<8x256xbf16>, vector<256x1024xbf16>, vector<8x1024xf32> -> vector<8x1024xf32>
    %68 = arith.addf %64, %67 : vector<8x1024xf32>
    %69 = vector.extract_strided_slice %68 {offsets = [0, 0], sizes = [8, 256], strides = [1, 1]} : vector<8x1024xf32> to vector<8x256xf32>
    %70 = arith.negf %69 : vector<8x256xf32>
    %71 = math.exp %70 : vector<8x256xf32>
    %cst_24 = arith.constant 1.000000e+00 : f32
    %72 = vector.broadcast %cst_24 : f32 to vector<8x256xf32>
    %73 = arith.addf %72, %71 : vector<8x256xf32>
    %74 = arith.divf %72, %73 : vector<8x256xf32>
    %75 = vector.extract_strided_slice %68 {offsets = [0, 256], sizes = [8, 256], strides = [1, 1]} : vector<8x1024xf32> to vector<8x256xf32>
    %76 = arith.negf %75 : vector<8x256xf32>
    %77 = math.exp %76 : vector<8x256xf32>
    %cst_25 = arith.constant 1.000000e+00 : f32
    %78 = vector.broadcast %cst_25 : f32 to vector<8x256xf32>
    %79 = arith.addf %78, %77 : vector<8x256xf32>
    %80 = arith.divf %78, %79 : vector<8x256xf32>
    %81 = vector.extract_strided_slice %68 {offsets = [0, 512], sizes = [8, 256], strides = [1, 1]} : vector<8x1024xf32> to vector<8x256xf32>
    %82 = math.tanh %81 : vector<8x256xf32>
    %83 = vector.extract_strided_slice %68 {offsets = [0, 768], sizes = [8, 256], strides = [1, 1]} : vector<8x1024xf32> to vector<8x256xf32>
    %84 = arith.negf %83 : vector<8x256xf32>
    %85 = math.exp %84 : vector<8x256xf32>
    %cst_26 = arith.constant 1.000000e+00 : f32
    %86 = vector.broadcast %cst_26 : f32 to vector<8x256xf32>
    %87 = arith.addf %86, %85 : vector<8x256xf32>
    %88 = arith.divf %86, %87 : vector<8x256xf32>
    %89 = arith.mulf %80, %57 : vector<8x256xf32>
    %90 = arith.mulf %74, %82 : vector<8x256xf32>
    %91 = arith.addf %89, %90 : vector<8x256xf32>
    %92 = math.tanh %91 : vector<8x256xf32>
    %93 = arith.mulf %88, %92 : vector<8x256xf32>
    %94 = arith.addf %60, %93 : vector<8x256xf32>
    %c3_i32 = arith.constant 3 : i32
    %c1_i32_27 = arith.constant 1 : i32
    %95 = arith.subi %c3_i32, %c1_i32_27 : i32
    %c8_i32_28 = arith.constant 8 : i32
    %96 = arith.muli %95, %c8_i32_28 : i32
    %97 = arith.index_cast %96 : i32 to index
    %c0_29 = arith.constant 0 : index
    %98 = vector.load %arg8[%97, %c0_29] : memref<56x1024xf32, #tpu.memory_space<vmem>>, vector<8x1024xf32>
    %99 = arith.truncf %93 : vector<8x256xf32> to vector<8x256xbf16>
    %c0_30 = arith.constant 0 : index
    %c0_31 = arith.constant 0 : index
    %100 = vector.load %arg4[%c0_30, %c0_31] : memref<256x1024xbf16, #tpu.memory_space<vmem>>, vector<256x1024xbf16>
    %cst_32 = arith.constant dense<0.000000e+00> : vector<8x1024xf32>
    %101 = tpu.matmul %99, %100, %cst_32 {dimension_numbers = #tpu.dot_dimension_numbers<[1], [0], [0], [1], [0, 0, 1, 1], [], []>} : vector<8x256xbf16>, vector<256x1024xbf16>, vector<8x1024xf32> -> vector<8x1024xf32>
    %102 = arith.addf %98, %101 : vector<8x1024xf32>
    %103 = vector.extract_strided_slice %102 {offsets = [0, 0], sizes = [8, 256], strides = [1, 1]} : vector<8x1024xf32> to vector<8x256xf32>
    %104 = arith.negf %103 : vector<8x256xf32>
    %105 = math.exp %104 : vector<8x256xf32>
    %cst_33 = arith.constant 1.000000e+00 : f32
    %106 = vector.broadcast %cst_33 : f32 to vector<8x256xf32>
    %107 = arith.addf %106, %105 : vector<8x256xf32>
    %108 = arith.divf %106, %107 : vector<8x256xf32>
    %109 = vector.extract_strided_slice %102 {offsets = [0, 256], sizes = [8, 256], strides = [1, 1]} : vector<8x1024xf32> to vector<8x256xf32>
    %110 = arith.negf %109 : vector<8x256xf32>
    %111 = math.exp %110 : vector<8x256xf32>
    %cst_34 = arith.constant 1.000000e+00 : f32
    %112 = vector.broadcast %cst_34 : f32 to vector<8x256xf32>
    %113 = arith.addf %112, %111 : vector<8x256xf32>
    %114 = arith.divf %112, %113 : vector<8x256xf32>
    %115 = vector.extract_strided_slice %102 {offsets = [0, 512], sizes = [8, 256], strides = [1, 1]} : vector<8x1024xf32> to vector<8x256xf32>
    %116 = math.tanh %115 : vector<8x256xf32>
    %117 = vector.extract_strided_slice %102 {offsets = [0, 768], sizes = [8, 256], strides = [1, 1]} : vector<8x1024xf32> to vector<8x256xf32>
    %118 = arith.negf %117 : vector<8x256xf32>
    %119 = math.exp %118 : vector<8x256xf32>
    %cst_35 = arith.constant 1.000000e+00 : f32
    %120 = vector.broadcast %cst_35 : f32 to vector<8x256xf32>
    %121 = arith.addf %120, %119 : vector<8x256xf32>
    %122 = arith.divf %120, %121 : vector<8x256xf32>
    %123 = arith.mulf %114, %91 : vector<8x256xf32>
    %124 = arith.mulf %108, %116 : vector<8x256xf32>
    %125 = arith.addf %123, %124 : vector<8x256xf32>
    %126 = math.tanh %125 : vector<8x256xf32>
    %127 = arith.mulf %122, %126 : vector<8x256xf32>
    %128 = arith.addf %94, %127 : vector<8x256xf32>
    %c4_i32 = arith.constant 4 : i32
    %c1_i32_36 = arith.constant 1 : i32
    %129 = arith.subi %c4_i32, %c1_i32_36 : i32
    %c8_i32_37 = arith.constant 8 : i32
    %130 = arith.muli %129, %c8_i32_37 : i32
    %131 = arith.index_cast %130 : i32 to index
    %c0_38 = arith.constant 0 : index
    %132 = vector.load %arg8[%131, %c0_38] : memref<56x1024xf32, #tpu.memory_space<vmem>>, vector<8x1024xf32>
    %133 = arith.truncf %127 : vector<8x256xf32> to vector<8x256xbf16>
    %c0_39 = arith.constant 0 : index
    %c0_40 = arith.constant 0 : index
    %134 = vector.load %arg4[%c0_39, %c0_40] : memref<256x1024xbf16, #tpu.memory_space<vmem>>, vector<256x1024xbf16>
    %cst_41 = arith.constant dense<0.000000e+00> : vector<8x1024xf32>
    %135 = tpu.matmul %133, %134, %cst_41 {dimension_numbers = #tpu.dot_dimension_numbers<[1], [0], [0], [1], [0, 0, 1, 1], [], []>} : vector<8x256xbf16>, vector<256x1024xbf16>, vector<8x1024xf32> -> vector<8x1024xf32>
    %136 = arith.addf %132, %135 : vector<8x1024xf32>
    %137 = vector.extract_strided_slice %136 {offsets = [0, 0], sizes = [8, 256], strides = [1, 1]} : vector<8x1024xf32> to vector<8x256xf32>
    %138 = arith.negf %137 : vector<8x256xf32>
    %139 = math.exp %138 : vector<8x256xf32>
    %cst_42 = arith.constant 1.000000e+00 : f32
    %140 = vector.broadcast %cst_42 : f32 to vector<8x256xf32>
    %141 = arith.addf %140, %139 : vector<8x256xf32>
    %142 = arith.divf %140, %141 : vector<8x256xf32>
    %143 = vector.extract_strided_slice %136 {offsets = [0, 256], sizes = [8, 256], strides = [1, 1]} : vector<8x1024xf32> to vector<8x256xf32>
    %144 = arith.negf %143 : vector<8x256xf32>
    %145 = math.exp %144 : vector<8x256xf32>
    %cst_43 = arith.constant 1.000000e+00 : f32
    %146 = vector.broadcast %cst_43 : f32 to vector<8x256xf32>
    %147 = arith.addf %146, %145 : vector<8x256xf32>
    %148 = arith.divf %146, %147 : vector<8x256xf32>
    %149 = vector.extract_strided_slice %136 {offsets = [0, 512], sizes = [8, 256], strides = [1, 1]} : vector<8x1024xf32> to vector<8x256xf32>
    %150 = math.tanh %149 : vector<8x256xf32>
    %151 = vector.extract_strided_slice %136 {offsets = [0, 768], sizes = [8, 256], strides = [1, 1]} : vector<8x1024xf32> to vector<8x256xf32>
    %152 = arith.negf %151 : vector<8x256xf32>
    %153 = math.exp %152 : vector<8x256xf32>
    %cst_44 = arith.constant 1.000000e+00 : f32
    %154 = vector.broadcast %cst_44 : f32 to vector<8x256xf32>
    %155 = arith.addf %154, %153 : vector<8x256xf32>
    %156 = arith.divf %154, %155 : vector<8x256xf32>
    %157 = arith.mulf %148, %125 : vector<8x256xf32>
    %158 = arith.mulf %142, %150 : vector<8x256xf32>
    %159 = arith.addf %157, %158 : vector<8x256xf32>
    %160 = math.tanh %159 : vector<8x256xf32>
    %161 = arith.mulf %156, %160 : vector<8x256xf32>
    %162 = arith.addf %128, %161 : vector<8x256xf32>
    %c5_i32 = arith.constant 5 : i32
    %c1_i32_45 = arith.constant 1 : i32
    %163 = arith.subi %c5_i32, %c1_i32_45 : i32
    %c8_i32_46 = arith.constant 8 : i32
    %164 = arith.muli %163, %c8_i32_46 : i32
    %165 = arith.index_cast %164 : i32 to index
    %c0_47 = arith.constant 0 : index
    %166 = vector.load %arg8[%165, %c0_47] : memref<56x1024xf32, #tpu.memory_space<vmem>>, vector<8x1024xf32>
    %167 = arith.truncf %161 : vector<8x256xf32> to vector<8x256xbf16>
    %c0_48 = arith.constant 0 : index
    %c0_49 = arith.constant 0 : index
    %168 = vector.load %arg4[%c0_48, %c0_49] : memref<256x1024xbf16, #tpu.memory_space<vmem>>, vector<256x1024xbf16>
    %cst_50 = arith.constant dense<0.000000e+00> : vector<8x1024xf32>
    %169 = tpu.matmul %167, %168, %cst_50 {dimension_numbers = #tpu.dot_dimension_numbers<[1], [0], [0], [1], [0, 0, 1, 1], [], []>} : vector<8x256xbf16>, vector<256x1024xbf16>, vector<8x1024xf32> -> vector<8x1024xf32>
    %170 = arith.addf %166, %169 : vector<8x1024xf32>
    %171 = vector.extract_strided_slice %170 {offsets = [0, 0], sizes = [8, 256], strides = [1, 1]} : vector<8x1024xf32> to vector<8x256xf32>
    %172 = arith.negf %171 : vector<8x256xf32>
    %173 = math.exp %172 : vector<8x256xf32>
    %cst_51 = arith.constant 1.000000e+00 : f32
    %174 = vector.broadcast %cst_51 : f32 to vector<8x256xf32>
    %175 = arith.addf %174, %173 : vector<8x256xf32>
    %176 = arith.divf %174, %175 : vector<8x256xf32>
    %177 = vector.extract_strided_slice %170 {offsets = [0, 256], sizes = [8, 256], strides = [1, 1]} : vector<8x1024xf32> to vector<8x256xf32>
    %178 = arith.negf %177 : vector<8x256xf32>
    %179 = math.exp %178 : vector<8x256xf32>
    %cst_52 = arith.constant 1.000000e+00 : f32
    %180 = vector.broadcast %cst_52 : f32 to vector<8x256xf32>
    %181 = arith.addf %180, %179 : vector<8x256xf32>
    %182 = arith.divf %180, %181 : vector<8x256xf32>
    %183 = vector.extract_strided_slice %170 {offsets = [0, 512], sizes = [8, 256], strides = [1, 1]} : vector<8x1024xf32> to vector<8x256xf32>
    %184 = math.tanh %183 : vector<8x256xf32>
    %185 = vector.extract_strided_slice %170 {offsets = [0, 768], sizes = [8, 256], strides = [1, 1]} : vector<8x1024xf32> to vector<8x256xf32>
    %186 = arith.negf %185 : vector<8x256xf32>
    %187 = math.exp %186 : vector<8x256xf32>
    %cst_53 = arith.constant 1.000000e+00 : f32
    %188 = vector.broadcast %cst_53 : f32 to vector<8x256xf32>
    %189 = arith.addf %188, %187 : vector<8x256xf32>
    %190 = arith.divf %188, %189 : vector<8x256xf32>
    %191 = arith.mulf %182, %159 : vector<8x256xf32>
    %192 = arith.mulf %176, %184 : vector<8x256xf32>
    %193 = arith.addf %191, %192 : vector<8x256xf32>
    %194 = math.tanh %193 : vector<8x256xf32>
    %195 = arith.mulf %190, %194 : vector<8x256xf32>
    %196 = arith.addf %162, %195 : vector<8x256xf32>
    %c6_i32 = arith.constant 6 : i32
    %c1_i32_54 = arith.constant 1 : i32
    %197 = arith.subi %c6_i32, %c1_i32_54 : i32
    %c8_i32_55 = arith.constant 8 : i32
    %198 = arith.muli %197, %c8_i32_55 : i32
    %199 = arith.index_cast %198 : i32 to index
    %c0_56 = arith.constant 0 : index
    %200 = vector.load %arg8[%199, %c0_56] : memref<56x1024xf32, #tpu.memory_space<vmem>>, vector<8x1024xf32>
    %201 = arith.truncf %195 : vector<8x256xf32> to vector<8x256xbf16>
    %c0_57 = arith.constant 0 : index
    %c0_58 = arith.constant 0 : index
    %202 = vector.load %arg4[%c0_57, %c0_58] : memref<256x1024xbf16, #tpu.memory_space<vmem>>, vector<256x1024xbf16>
    %cst_59 = arith.constant dense<0.000000e+00> : vector<8x1024xf32>
    %203 = tpu.matmul %201, %202, %cst_59 {dimension_numbers = #tpu.dot_dimension_numbers<[1], [0], [0], [1], [0, 0, 1, 1], [], []>} : vector<8x256xbf16>, vector<256x1024xbf16>, vector<8x1024xf32> -> vector<8x1024xf32>
    %204 = arith.addf %200, %203 : vector<8x1024xf32>
    %205 = vector.extract_strided_slice %204 {offsets = [0, 0], sizes = [8, 256], strides = [1, 1]} : vector<8x1024xf32> to vector<8x256xf32>
    %206 = arith.negf %205 : vector<8x256xf32>
    %207 = math.exp %206 : vector<8x256xf32>
    %cst_60 = arith.constant 1.000000e+00 : f32
    %208 = vector.broadcast %cst_60 : f32 to vector<8x256xf32>
    %209 = arith.addf %208, %207 : vector<8x256xf32>
    %210 = arith.divf %208, %209 : vector<8x256xf32>
    %211 = vector.extract_strided_slice %204 {offsets = [0, 256], sizes = [8, 256], strides = [1, 1]} : vector<8x1024xf32> to vector<8x256xf32>
    %212 = arith.negf %211 : vector<8x256xf32>
    %213 = math.exp %212 : vector<8x256xf32>
    %cst_61 = arith.constant 1.000000e+00 : f32
    %214 = vector.broadcast %cst_61 : f32 to vector<8x256xf32>
    %215 = arith.addf %214, %213 : vector<8x256xf32>
    %216 = arith.divf %214, %215 : vector<8x256xf32>
    %217 = vector.extract_strided_slice %204 {offsets = [0, 512], sizes = [8, 256], strides = [1, 1]} : vector<8x1024xf32> to vector<8x256xf32>
    %218 = math.tanh %217 : vector<8x256xf32>
    %219 = vector.extract_strided_slice %204 {offsets = [0, 768], sizes = [8, 256], strides = [1, 1]} : vector<8x1024xf32> to vector<8x256xf32>
    %220 = arith.negf %219 : vector<8x256xf32>
    %221 = math.exp %220 : vector<8x256xf32>
    %cst_62 = arith.constant 1.000000e+00 : f32
    %222 = vector.broadcast %cst_62 : f32 to vector<8x256xf32>
    %223 = arith.addf %222, %221 : vector<8x256xf32>
    %224 = arith.divf %222, %223 : vector<8x256xf32>
    %225 = arith.mulf %216, %193 : vector<8x256xf32>
    %226 = arith.mulf %210, %218 : vector<8x256xf32>
    %227 = arith.addf %225, %226 : vector<8x256xf32>
    %228 = math.tanh %227 : vector<8x256xf32>
    %229 = arith.mulf %224, %228 : vector<8x256xf32>
    %230 = arith.addf %196, %229 : vector<8x256xf32>
    %c7_i32 = arith.constant 7 : i32
    %c1_i32_63 = arith.constant 1 : i32
    %231 = arith.subi %c7_i32, %c1_i32_63 : i32
    %c8_i32_64 = arith.constant 8 : i32
    %232 = arith.muli %231, %c8_i32_64 : i32
    %233 = arith.index_cast %232 : i32 to index
    %c0_65 = arith.constant 0 : index
    %234 = vector.load %arg8[%233, %c0_65] : memref<56x1024xf32, #tpu.memory_space<vmem>>, vector<8x1024xf32>
    %235 = arith.truncf %229 : vector<8x256xf32> to vector<8x256xbf16>
    %c0_66 = arith.constant 0 : index
    %c0_67 = arith.constant 0 : index
    %236 = vector.load %arg4[%c0_66, %c0_67] : memref<256x1024xbf16, #tpu.memory_space<vmem>>, vector<256x1024xbf16>
    %cst_68 = arith.constant dense<0.000000e+00> : vector<8x1024xf32>
    %237 = tpu.matmul %235, %236, %cst_68 {dimension_numbers = #tpu.dot_dimension_numbers<[1], [0], [0], [1], [0, 0, 1, 1], [], []>} : vector<8x256xbf16>, vector<256x1024xbf16>, vector<8x1024xf32> -> vector<8x1024xf32>
    %238 = arith.addf %234, %237 : vector<8x1024xf32>
    %239 = vector.extract_strided_slice %238 {offsets = [0, 0], sizes = [8, 256], strides = [1, 1]} : vector<8x1024xf32> to vector<8x256xf32>
    %240 = arith.negf %239 : vector<8x256xf32>
    %241 = math.exp %240 : vector<8x256xf32>
    %cst_69 = arith.constant 1.000000e+00 : f32
    %242 = vector.broadcast %cst_69 : f32 to vector<8x256xf32>
    %243 = arith.addf %242, %241 : vector<8x256xf32>
    %244 = arith.divf %242, %243 : vector<8x256xf32>
    %245 = vector.extract_strided_slice %238 {offsets = [0, 256], sizes = [8, 256], strides = [1, 1]} : vector<8x1024xf32> to vector<8x256xf32>
    %246 = arith.negf %245 : vector<8x256xf32>
    %247 = math.exp %246 : vector<8x256xf32>
    %cst_70 = arith.constant 1.000000e+00 : f32
    %248 = vector.broadcast %cst_70 : f32 to vector<8x256xf32>
    %249 = arith.addf %248, %247 : vector<8x256xf32>
    %250 = arith.divf %248, %249 : vector<8x256xf32>
    %251 = vector.extract_strided_slice %238 {offsets = [0, 512], sizes = [8, 256], strides = [1, 1]} : vector<8x1024xf32> to vector<8x256xf32>
    %252 = math.tanh %251 : vector<8x256xf32>
    %253 = vector.extract_strided_slice %238 {offsets = [0, 768], sizes = [8, 256], strides = [1, 1]} : vector<8x1024xf32> to vector<8x256xf32>
    %254 = arith.negf %253 : vector<8x256xf32>
    %255 = math.exp %254 : vector<8x256xf32>
    %cst_71 = arith.constant 1.000000e+00 : f32
    %256 = vector.broadcast %cst_71 : f32 to vector<8x256xf32>
    %257 = arith.addf %256, %255 : vector<8x256xf32>
    %258 = arith.divf %256, %257 : vector<8x256xf32>
    %259 = arith.mulf %250, %227 : vector<8x256xf32>
    %260 = arith.mulf %244, %252 : vector<8x256xf32>
    %261 = arith.addf %259, %260 : vector<8x256xf32>
    %262 = math.tanh %261 : vector<8x256xf32>
    %263 = arith.mulf %258, %262 : vector<8x256xf32>
    %264 = arith.addf %230, %263 : vector<8x256xf32>
    %c7_i32_72 = arith.constant 7 : i32
    %cst_73 = arith.constant 1.250000e-01 : f32
    %265 = vector.broadcast %cst_73 : f32 to vector<8x256xf32>
    %266 = arith.mulf %264, %265 : vector<8x256xf32>
    %267 = arith.truncf %266 : vector<8x256xf32> to vector<8x256xbf16>
    %c0_74 = arith.constant 0 : index
    %c0_75 = arith.constant 0 : index
    %268 = vector.load %arg5[%c0_74, %c0_75] : memref<256x128xbf16, #tpu.memory_space<vmem>>, vector<256x128xbf16>
    %cst_76 = arith.constant dense<0.000000e+00> : vector<8x128xf32>
    %269 = tpu.matmul %267, %268, %cst_76 {dimension_numbers = #tpu.dot_dimension_numbers<[1], [0], [0], [1], [0, 0, 1, 1], [], []>} : vector<8x256xbf16>, vector<256x128xbf16>, vector<8x128xf32> -> vector<8x128xf32>
    %c0_77 = arith.constant 0 : index
    %c0_78 = arith.constant 0 : index
    %270 = vector.load %arg6[%c0_77, %c0_78] : memref<1x128xf32, #tpu.memory_space<vmem>>, vector<1x128xf32>
    %271 = vector.broadcast %270 : vector<1x128xf32> to vector<8x128xf32>
    %272 = arith.addf %269, %271 : vector<8x128xf32>
    %cst_79 = arith.constant dense<0xFF800000> : vector<8xf32>
    %273 = vector.multi_reduction <maximumf>, %272, %cst_79 [1] : vector<8x128xf32> to vector<8xf32>
    %274 = vector.shape_cast %273 : vector<8xf32> to vector<8x1xf32>
    %275 = vector.broadcast %274 : vector<8x1xf32> to vector<8x128xf32>
    %276 = arith.subf %272, %275 : vector<8x128xf32>
    %277 = math.exp %276 : vector<8x128xf32>
    %cst_80 = arith.constant dense<0.000000e+00> : vector<8xf32>
    %278 = vector.multi_reduction <add>, %277, %cst_80 [1] : vector<8x128xf32> to vector<8xf32>
    %279 = vector.shape_cast %278 : vector<8xf32> to vector<8x1xf32>
    %280 = math.log %279 : vector<8x1xf32>
    %281 = arith.addf %280, %274 : vector<8x1xf32>
    %282 = vector.broadcast %281 : vector<8x1xf32> to vector<8x128xf32>
    %283 = arith.subf %272, %282 : vector<8x128xf32>
    %c0_81 = arith.constant 0 : index
    %c0_82 = arith.constant 0 : index
    %284 = vector.load %arg7[%c0_81, %c0_82] : memref<8x128xf32, #tpu.memory_space<vmem>>, vector<8x128xf32>
    tpu.vector_store %arg7[%c0_81, %c0_82], %283 {strides = array<i32>} : memref<8x128xf32, #tpu.memory_space<vmem>>, vector<8x128xf32>,
    return
  }
  func.func @transform_0(%arg0: i32) -> (i32, i32, i32) {
    %c0_i32 = arith.constant 0 : i32
    %c0_i32_0 = arith.constant 0 : i32
    %c0_i32_1 = arith.constant 0 : i32
    return %arg0, %c0_i32, %c0_i32_0 : i32, i32, i32
  }
  func.func @transform_1(%arg0: i32) -> (i32, i32) {
    %c0_i32 = arith.constant 0 : i32
    %c0_i32_0 = arith.constant 0 : i32
    %c0_i32_1 = arith.constant 0 : i32
    return %c0_i32, %c0_i32_0 : i32, i32
  }
  func.func @transform_2(%arg0: i32) -> (i32, i32) {
    %c0_i32 = arith.constant 0 : i32
    %c0_i32_0 = arith.constant 0 : i32
    %c0_i32_1 = arith.constant 0 : i32
    return %c0_i32, %c0_i32_0 : i32, i32
  }
  func.func @transform_3(%arg0: i32) -> (i32, i32) {
    %c0_i32 = arith.constant 0 : i32
    %c0_i32_0 = arith.constant 0 : i32
    %c0_i32_1 = arith.constant 0 : i32
    return %c0_i32, %c0_i32_0 : i32, i32
  }
  func.func @transform_4(%arg0: i32) -> (i32, i32) {
    %c0_i32 = arith.constant 0 : i32
    %c0_i32_0 = arith.constant 0 : i32
    %c0_i32_1 = arith.constant 0 : i32
    return %c0_i32, %c0_i32_0 : i32, i32
  }
  func.func @transform_5(%arg0: i32) -> (i32, i32) {
    %c0_i32 = arith.constant 0 : i32
    %c0_i32_0 = arith.constant 0 : i32
    %c0_i32_1 = arith.constant 0 : i32
    return %c0_i32, %c0_i32_0 : i32, i32
  }
  func.func @transform_6(%arg0: i32) -> (i32, i32) {
    %c0_i32 = arith.constant 0 : i32
    %c0_i32_0 = arith.constant 0 : i32
    return %arg0, %c0_i32 : i32, i32
  }
}

</mosaic_0001>

<bundles_post_ra>
// kernel: lstm1d_forward.1
= control target key start
LH: loop header
LB: loop body
LE: loop exit
PB: predicated region body
PF: predicated region fallthrough
CT: control target
= control target key end

     0   :  { %11 = vsyncpa [#allocation4], 0  ;;  %s6287_s0 = inlined_call_operand.vmem [shape: bf16[1,64,256], index: 0, kind: input, shape index: {}]   ;;  %s6288_s1 = inlined_call_operand.hbm [shape: bf16[256,1024], index: 1, kind: input, shape index: {}]   ;;  %s6289_s2 = inlined_call_operand.vmem [shape: f32[1,1024], index: 2, kind: input, shape index: {}]   ;;  %s6290_s3 = inlined_call_operand.hbm [shape: bf16[256,1024], index: 3, kind: input, shape index: {}]   ;;  %s6291_s4 = inlined_call_operand.vmem [shape: bf16[256,128], index: 4, kind: input, shape index: {}]   ;;  %s6292_s5 = inlined_call_operand.vmem [shape: f32[1,128], index: 5, kind: input, shape index: {}]   ;;  %s6293_s6 = inlined_call_operand.vmem [shape: f32[8,128], index: 6, kind: output, shape index: {}]  }
   0x1   :  { %12 = vsyncpa [#allocation6], 0  ;;  %s4554_s21 = smov [#allocation3]  }
   0x2   :  { %s20_s22 = sshll.u32 %s4554_s21, 4  ;;  %s21_s22 = int_to_ptr.vmem [resolvable:$true] %s20_s22 }
   0x3   :  { %s4518_s23 = scalar_lea.vmem %s21_s22, 16384  ;;  %p4523_p1 = scmp.lt.s32.totalorder %s21_s22, %s21_s22 }
   0x4   :  { %p4519_p0 = scmp.ne.s32.totalorder %s21_s22, %s4518_s23  ;;  %p4524_p2 = scmp.lt.s32.totalorder %s4518_s23, %s4518_s23 }
   0x6   :  { %p4525_p3 = por %p4524_p2, %p4523_p1 }
   0x8   :  { %p4526_p4 = pnand %p4525_p3, %p4519_p0 }
   0xa   :  { %4529 = shalt.err (!%p4526_p4)
}
   0xb   :  { %s4555_s24 = smov 512   ;;  %s4556_s25 = smov 32  }
   0xc   :  { %26 = dma.hbm_to_vmem [thread:$0]  %s6288_s1, 16384, %s21_s22, [#allocation4], %s4555_s24, %s4555_s24, %s4556_s25  }
   0xd   :  { %s4557_s28 = smov [#allocation5]  }
   0xe   :  { %s34_s29 = sshll.u32 %s4557_s28, 4  ;;  %s35_s29 = int_to_ptr.vmem [resolvable:$true] %s34_s29 }
   0xf   :  { %s4538_s30 = scalar_lea.vmem %s35_s29, 16384  ;;  %p4543_p6 = scmp.lt.s32.totalorder %s35_s29, %s35_s29 }
  0x10   :  { %p4539_p5 = scmp.ne.s32.totalorder %s35_s29, %s4538_s30  ;;  %p4544_p7 = scmp.lt.s32.totalorder %s4538_s30, %s4538_s30 }
  0x12   :  { %p4545_p8 = por %p4544_p7, %p4543_p6 }
  0x14   :  { %p4546_p9 = pnand %p4545_p8, %p4539_p5 }
  0x16   :  { %4549 = shalt.err (!%p4546_p9)
}
  0x17   :  { %40 = dma.hbm_to_vmem [thread:$0]  %s6290_s3, 16384, %s35_s29, [#allocation6], %s4555_s24, %s4555_s24, %s4556_s25  }
  0x18   :  { %4550 = dma.done.wait [#allocation4], 16384  }
  0x19   :  { %4551 = vsyncadd [#allocation4], 4294950912 }
  0x1a   :  { %4552 = dma.done.wait [#allocation6], 16384  }
  0x1b   :  { %4553 = vsyncadd [#allocation6], 4294950912  ;;  %v116_v0 = vld [vmem:[#allocation3 + $0x1c0] sm:$0xff]  ;;  %v117_v2 = vld [vmem:[#allocation3 + $0x1c8] sm:$0xff] }
  0x1c   :  { %v120_v1 = vld [vmem:[#allocation3 + $0x1e0] sm:$0xff]  ;;  %v121_v4 = vld [vmem:[#allocation3 + $0x1e8] sm:$0xff] }
  0x1d   :  { %v3942_v3 = vcombine.high %v116_v0, %v120_v1  ;;  %v3941_v5 = vcombine.low %v116_v0, %v120_v1  ;;  %v108_v6 = vld [vmem:[#allocation3 + $0x180] sm:$0xff]  ;;  %v3944_v8 = vcombine.high %v117_v2, %v121_v4  ;;  %v3943_v9 = vcombine.low %v117_v2, %v121_v4  ;;  %v109_v11 = vld [vmem:[#allocation3 + $0x188] sm:$0xff] }
  0x1e   :  { %v112_v7 = vld [vmem:[#allocation3 + $0x1a0] sm:$0xff]  ;;  %v113_v12 = vld [vmem:[#allocation3 + $0x1a8] sm:$0xff] }
  0x1f   :  { %v3934_v10 = vcombine.high %v108_v6, %v112_v7  ;;  %v100_v13 = vld [vmem:[#allocation3 + $0x140] sm:$0xff]  ;;  %910 = vmatprep.subr.bf16.mxu0 %v3942_v3  ;;  %v3936_v14 = vcombine.high %v109_v11, %v113_v12  ;;  %v101_v16 = vld [vmem:[#allocation3 + $0x148] sm:$0xff]  ;;  %983 = vmatprep.subr.bf16.mxu1 %v3944_v8  ;;  %v3933_v18 = vcombine.low %v108_v6, %v112_v7 }
  0x20   :  { %v104_v15 = vld [vmem:[#allocation3 + $0x160] sm:$0xff]  ;;  %v105_v17 = vld [vmem:[#allocation3 + $0x168] sm:$0xff]  ;;  %911 = vmatpush1.bf16.msra.mxu0 %v3941_v5  ;;  %984 = vmatpush1.bf16.msra.mxu1 %v3943_v9  ;;  %v3935_v19 = vcombine.low %v109_v11, %v113_v12 }
  0x21   :  { %912 = vmatprep.subr.bf16.mxu0 %v3934_v10  ;;  %v3926_v20 = vcombine.high %v100_v13, %v104_v15  ;;  %985 = vmatprep.subr.bf16.mxu1 %v3936_v14  ;;  %v3928_v21 = vcombine.high %v101_v16, %v105_v17  ;;  %v92_v22 = vld [vmem:[#allocation3 + $0x100] sm:$0xff]  ;;  %v93_v24 = vld [vmem:[#allocation3 + $0x108] sm:$0xff]  ;;  %v3925_v26 = vcombine.low %v100_v13, %v104_v15 }
  0x22   :  { %v96_v23 = vld [vmem:[#allocation3 + $0x120] sm:$0xff]  ;;  %v97_v25 = vld [vmem:[#allocation3 + $0x128] sm:$0xff]  ;;  %v3927_v27 = vcombine.low %v101_v16, %v105_v17 }
  0x23   :  { %v3918_v28 = vcombine.high %v92_v22, %v96_v23  ;;  %v3920_v29 = vcombine.high %v93_v24, %v97_v25  ;;  %v84_v30 = vld [vmem:[#allocation3 + $0xc0] sm:$0xff]  ;;  %v85_v32 = vld [vmem:[#allocation3 + $0xc8] sm:$0xff]  ;;  %v3917_v34 = vcombine.low %v92_v22, %v96_v23  ;;  %v3919_v35 = vcombine.low %v93_v24, %v97_v25 }
  0x24   :  { %913 = vmatpush1.bf16.msra.mxu0 %v3933_v18  ;;  %986 = vmatpush1.bf16.msra.mxu1 %v3935_v19  ;;  %v88_v31 = vld [vmem:[#allocation3 + $0xe0] sm:$0xff]  ;;  %v89_v33 = vld [vmem:[#allocation3 + $0xe8] sm:$0xff] }
  0x25   :  { %914 = vmatprep.subr.bf16.mxu0 %v3926_v20  ;;  %987 = vmatprep.subr.bf16.mxu1 %v3928_v21  ;;  %v3910_v36 = vcombine.high %v84_v30, %v88_v31  ;;  %v3912_v37 = vcombine.high %v85_v32, %v89_v33  ;;  %v76_v38 = vld [vmem:[#allocation3 + $0x80] sm:$0xff]  ;;  %v77_v40 = vld [vmem:[#allocation3 + $0x88] sm:$0xff]  ;;  %v3909_v42 = vcombine.low %v84_v30, %v88_v31 }
  0x26   :  { %v80_v39 = vld [vmem:[#allocation3 + $0xa0] sm:$0xff]  ;;  %v81_v41 = vld [vmem:[#allocation3 + $0xa8] sm:$0xff]  ;;  %v3911_v43 = vcombine.low %v85_v32, %v89_v33 }
  0x27   :  { %v3902_v44 = vcombine.high %v76_v38, %v80_v39  ;;  %v3904_v45 = vcombine.high %v77_v40, %v81_v41  ;;  %v68_v46 = vld [vmem:[#allocation3 + $0x40] sm:$0xff]  ;;  %v69_v48 = vld [vmem:[#allocation3 + $0x48] sm:$0xff]  ;;  %v3901_v50 = vcombine.low %v76_v38, %v80_v39  ;;  %v3903_v51 = vcombine.low %v77_v40, %v81_v41 }
  0x28   :  { %915 = vmatpush1.bf16.msra.mxu0 %v3925_v26  ;;  %988 = vmatpush1.bf16.msra.mxu1 %v3927_v27  ;;  %v72_v47 = vld [vmem:[#allocation3 + $0x60] sm:$0xff]  ;;  %v73_v49 = vld [vmem:[#allocation3 + $0x68] sm:$0xff] }
  0x29   :  { %916 = vmatprep.subr.bf16.mxu0 %v3918_v28  ;;  %989 = vmatprep.subr.bf16.mxu1 %v3920_v29  ;;  %v3894_v52 = vcombine.high %v68_v46, %v72_v47  ;;  %v3896_v53 = vcombine.high %v69_v48, %v73_v49  ;;  %v60_v54 = vld [vmem:[#allocation3] sm:$0xff]  ;;  %v61_v57 = vld [vmem:[#allocation3 + $0x8] sm:$0xff]  ;;  %v3893_v59 = vcombine.low %v68_v46, %v72_v47 }
  0x2a   :  { %v64_v55 = vld [vmem:[#allocation3 + $0x20] sm:$0xff]  ;;  %v65_v58 = vld [vmem:[#allocation3 + $0x28] sm:$0xff]  ;;  %v3895_v60 = vcombine.low %v69_v48, %v73_v49 }
  0x2b   :  { %v4602_v56 = vld [vmem:[%s6287_s0 + $0x4] ss:$8 sps:$4 sm:$0xff]   ;;  %v3886_v61 = vcombine.high %v60_v54, %v64_v55  ;;  %v3888_v62 = vcombine.high %v61_v57, %v65_v58  ;;  %v3885_v3 = vcombine.low %v60_v54, %v64_v55  ;;  %v3887_v4 = vcombine.low %v61_v57, %v65_v58 }
  0x2c   :  { %917 = vmatpush1.bf16.msra.mxu0 %v3917_v34  ;;  %990 = vmatpush1.bf16.msra.mxu1 %v3919_v35  ;;  %v180_v63 = vld [vmem:[#allocation3 + $0x3c0] sm:$0xff]  ;;  %v181_v1 = vld [vmem:[#allocation3 + $0x3c8] sm:$0xff] }
  0x2d   :  { %918 = vmatprep.subr.bf16.mxu0 %v3910_v36  ;;  %991 = vmatprep.subr.bf16.mxu1 %v3912_v37  ;;  %v184_v0 = vld [vmem:[#allocation3 + $0x3e0] sm:$0xff]  ;;  %v185_v2 = vld [vmem:[#allocation3 + $0x3e8] sm:$0xff] }
  0x2e   :  { %942 = vmatprep.mubr.bf16.mxu0 %v4602_v56  ;;  %1015 = vmatprep.mubr.bf16.mxu1 %v4602_v56  ;;  %v4006_v5 = vcombine.high %v180_v63, %v184_v0  ;;  %v4008_v6 = vcombine.high %v181_v1, %v185_v2  ;;  %v172_v7 = vld [vmem:[#allocation3 + $0x380] sm:$0xff]  ;;  %v173_v9 = vld [vmem:[#allocation3 + $0x388] sm:$0xff]  ;;  %v4005_v11 = vcombine.low %v180_v63, %v184_v0 }
  0x2f   :  { %v176_v8 = vld [vmem:[#allocation3 + $0x3a0] sm:$0xff]  ;;  %v177_v10 = vld [vmem:[#allocation3 + $0x3a8] sm:$0xff]  ;;  %v4007_v12 = vcombine.low %v181_v1, %v185_v2  ;;  %v119_v2 = vld [vmem:[#allocation3 + $0x1d8] sm:$0xff] }
  0x30   :  { %919 = vmatpush1.bf16.msra.mxu0 %v3909_v42  ;;  %992 = vmatpush1.bf16.msra.mxu1 %v3911_v43  ;;  %v3998_v13 = vcombine.high %v172_v7, %v176_v8  ;;  %v4000_v14 = vcombine.high %v173_v9, %v177_v10  ;;  %v164_v15 = vld [vmem:[#allocation3 + $0x340] sm:$0xff]  ;;  %v165_v17 = vld [vmem:[#allocation3 + $0x348] sm:$0xff]  ;;  %v3997_v19 = vcombine.low %v172_v7, %v176_v8  ;;  %v110_v8 = vld [vmem:[#allocation3 + $0x190] sm:$0xff] }
  0x31   :  { %920 = vmatprep.subr.bf16.mxu0 %v3902_v44  ;;  %993 = vmatprep.subr.bf16.mxu1 %v3904_v45  ;;  %v168_v16 = vld [vmem:[#allocation3 + $0x360] sm:$0xff]  ;;  %v169_v18 = vld [vmem:[#allocation3 + $0x368] sm:$0xff]  ;;  %v3999_v20 = vcombine.low %v173_v9, %v177_v10  ;;  %v114_v9 = vld [vmem:[#allocation3 + $0x1b0] sm:$0xff] }
  0x32   :  { %v3990_v21 = vcombine.high %v164_v15, %v168_v16  ;;  %v3992_v22 = vcombine.high %v165_v17, %v169_v18  ;;  %v156_v23 = vld [vmem:[#allocation3 + $0x300] sm:$0xff]  ;;  %v157_v25 = vld [vmem:[#allocation3 + $0x308] sm:$0xff]  ;;  %v3989_v27 = vcombine.low %v164_v15, %v168_v16  ;;  %v3991_v28 = vcombine.low %v165_v17, %v169_v18  ;;  %v102_v17 = vld [vmem:[#allocation3 + $0x150] sm:$0xff] }
  0x33   :  { %v160_v24 = vld [vmem:[#allocation3 + $0x320] sm:$0xff]  ;;  %v161_v26 = vld [vmem:[#allocation3 + $0x328] sm:$0xff]  ;;  %v3938_v15 = vcombine.high %v110_v8, %v114_v9  ;;  %v106_v18 = vld [vmem:[#allocation3 + $0x170] sm:$0xff] }
  0x34   :  { %921 = vmatpush1.bf16.msra.mxu0 %v3901_v50  ;;  %994 = vmatpush1.bf16.msra.mxu1 %v3903_v51  ;;  %v3982_v29 = vcombine.high %v156_v23, %v160_v24  ;;  %v3984_v30 = vcombine.high %v157_v25, %v161_v26  ;;  %v148_v31 = vld [vmem:[#allocation3 + $0x2c0] sm:$0xff]  ;;  %v149_v33 = vld [vmem:[#allocation3 + $0x2c8] sm:$0xff]  ;;  %v3981_v35 = vcombine.low %v156_v23, %v160_v24 }
  0x35   :  { %922 = vmatprep.subr.bf16.mxu0 %v3894_v52  ;;  %995 = vmatprep.subr.bf16.mxu1 %v3896_v53  ;;  %v152_v32 = vld [vmem:[#allocation3 + $0x2e0] sm:$0xff]  ;;  %v153_v34 = vld [vmem:[#allocation3 + $0x2e8] sm:$0xff]  ;;  %v3983_v36 = vcombine.low %v157_v25, %v161_v26  ;;  %v3930_v24 = vcombine.high %v102_v17, %v106_v18  ;;  %v94_v26 = vld [vmem:[#allocation3 + $0x110] sm:$0xff] }
  0x36   :  { %v3974_v37 = vcombine.high %v148_v31, %v152_v32  ;;  %v3976_v38 = vcombine.high %v149_v33, %v153_v34  ;;  %v140_v39 = vld [vmem:[#allocation3 + $0x280] sm:$0xff]  ;;  %v141_v41 = vld [vmem:[#allocation3 + $0x288] sm:$0xff]  ;;  %v3973_v43 = vcombine.low %v148_v31, %v152_v32  ;;  %v3975_v46 = vcombine.low %v149_v33, %v153_v34  ;;  %v4623_v31 = vld [vmem:[%s6287_s0 + $0x10] ss:$8 sps:$4 sm:$0xff]  }
  0x37   :  { %v144_v40 = vld [vmem:[#allocation3 + $0x2a0] sm:$0xff]  ;;  %v145_v42 = vld [vmem:[#allocation3 + $0x2a8] sm:$0xff] }
  0x38   :  { %923 = vmatpush1.bf16.msra.mxu0 %v3893_v59  ;;  %996 = vmatpush1.bf16.msra.mxu1 %v3895_v60  ;;  %v132_v44 = vld [vmem:[#allocation3 + $0x240] sm:$0xff]  ;;  %v3966_v47 = vcombine.high %v140_v39, %v144_v40  ;;  %v133_v48 = vld [vmem:[#allocation3 + $0x248] sm:$0xff]  ;;  %v3968_v50 = vcombine.high %v141_v41, %v145_v42  ;;  %v3965_v51 = vcombine.low %v140_v39, %v144_v40  ;;  %v91_v39 = vld [vmem:[#allocation3 + $0xf8] sm:$0xff] }
  0x39   :  { %924 = vmatprep.subr.bf16.mxu0 %v3886_v61  ;;  %997 = vmatprep.subr.bf16.mxu1 %v3888_v62  ;;  %v136_v45 = vld [vmem:[#allocation3 + $0x260] sm:$0xff]  ;;  %v137_v49 = vld [vmem:[#allocation3 + $0x268] sm:$0xff]  ;;  %v3967_v54 = vcombine.low %v141_v41, %v145_v42  ;;  %v118_v61 = vld [vmem:[#allocation3 + $0x1d0] sm:$0xff] }
  0x3a   :  { %v124_v52 = vld [vmem:[#allocation3 + $0x200] sm:$0xff]  ;;  %v3958_v55 = vcombine.high %v132_v44, %v136_v45  ;;  %v125_v57 = vld [vmem:[#allocation3 + $0x208] sm:$0xff]  ;;  %v3960_v59 = vcombine.high %v133_v48, %v137_v49  ;;  %v3957_v60 = vcombine.low %v132_v44, %v136_v45  ;;  %v122_v62 = vld [vmem:[#allocation3 + $0x1f0] sm:$0xff]  ;;  %v3959_v63 = vcombine.low %v133_v48, %v137_v49 }
  0x3b   :  { %v128_v53 = vld [vmem:[#allocation3 + $0x220] sm:$0xff]  ;;  %v129_v58 = vld [vmem:[#allocation3 + $0x228] sm:$0xff]  ;;  %v78_v44 = vld [vmem:[#allocation3 + $0x90] sm:$0xff] }
  0x3c   :  { %925 = vmatpush1.bf16.msra.mxu0 %v3885_v3  ;;  %998 = vmatpush1.bf16.msra.mxu1 %v3887_v4  ;;  %v3950_v0 = vcombine.high %v124_v52, %v128_v53  ;;  %v3952_v1 = vcombine.high %v125_v57, %v129_v58  ;;  %v123_v3 = vld [vmem:[#allocation3 + $0x1f8] sm:$0xff]  ;;  %v3949_v4 = vcombine.low %v124_v52, %v128_v53  ;;  %v4609_v10 = vld [vmem:[%s6287_s0] ss:$8 sps:$4 sm:$0xff]   ;;  %v82_v45 = vld [vmem:[#allocation3 + $0xb0] sm:$0xff] }
  0x3d   :  { %926 = vmatprep.subr.bf16.mxu0 %v4006_v5  ;;  %999 = vmatprep.subr.bf16.mxu1 %v4008_v6  ;;  %v3951_v5 = vcombine.low %v125_v57, %v129_v58  ;;  %v3946_v6 = vcombine.high %v118_v61, %v122_v62  ;;  %v3948_v7 = vcombine.high %v119_v2, %v123_v3  ;;  %v4637_v49 = vld [vmem:[%s6287_s0 + $0x20] ss:$8 sps:$4 sm:$0xff]   ;;  %v70_v53 = vld [vmem:[#allocation3 + $0x50] sm:$0xff]  ;;  %v71_v57 = vld [vmem:[#allocation3 + $0x58] sm:$0xff] }
  0x3e   :  { %v75_v58 = vld [vmem:[#allocation3 + $0x78] sm:$0xff] }
  0x40   :  { %927 = vmatpush2.bf16.msra.mxu0 %v4005_v11  ;;  %1000 = vmatpush2.bf16.msra.mxu1 %v4007_v12  ;;  %v111_v11 = vld [vmem:[#allocation3 + $0x198] sm:$0xff] }
  0x41   :  { %928 = vmatprep.subr.bf16.mxu0 %v3998_v13  ;;  %1001 = vmatprep.subr.bf16.mxu1 %v4000_v14  ;;  %v115_v12 = vld [vmem:[#allocation3 + $0x1b8] sm:$0xff]  ;;  %v3945_v13 = vcombine.low %v118_v61, %v122_v62  ;;  %v3947_v14 = vcombine.low %v119_v2, %v123_v3  ;;  %v3900_v62 = vcombine.high %v71_v57, %v75_v58 }
  0x42   :  { %v3940_v16 = vcombine.high %v111_v11, %v115_v12  ;;  %v3939_v23 = vcombine.low %v111_v11, %v115_v12  ;;  %v67_v2 = vld [vmem:[#allocation3 + $0x38] sm:$0xff] }
  0x43   :  { %v183_v11 = vld [vmem:[#allocation3 + $0x3d8] sm:$0xff] }
  0x44   :  { %929 = vmatpush2.bf16.msra.mxu0 %v3997_v19  ;;  %1002 = vmatpush2.bf16.msra.mxu1 %v3999_v20  ;;  %v4614_v19 = vld [vmem:[%s6287_s0 + $0x14] ss:$8 sps:$4 sm:$0xff]  }
  0x45   :  { %930 = vmatprep.subr.bf16.mxu0 %v3990_v21  ;;  %1003 = vmatprep.subr.bf16.mxu1 %v3992_v22  ;;  %v103_v20 = vld [vmem:[#allocation3 + $0x158] sm:$0xff]  ;;  %v3937_v22 = vcombine.low %v110_v8, %v114_v9  ;;  %v182_v8 = vld [vmem:[#allocation3 + $0x3d0] sm:$0xff] }
  0x46   :  { %v107_v21 = vld [vmem:[#allocation3 + $0x178] sm:$0xff]  ;;  %v186_v9 = vld [vmem:[#allocation3 + $0x3f0] sm:$0xff] }
  0x47   :  { %v3932_v25 = vcombine.high %v103_v20, %v107_v21  ;;  %v3931_v32 = vcombine.low %v103_v20, %v107_v21  ;;  %v187_v12 = vld [vmem:[#allocation3 + $0x3f8] sm:$0xff] }
  0x48   :  { %931 = vmatpush2.bf16.msra.mxu0 %v3989_v27  ;;  %1004 = vmatpush2.bf16.msra.mxu1 %v3991_v28  ;;  %v98_v27 = vld [vmem:[#allocation3 + $0x130] sm:$0xff]  ;;  %v95_v28 = vld [vmem:[#allocation3 + $0x118] sm:$0xff] }
  0x49   :  { %932 = vmatprep.subr.bf16.mxu0 %v3982_v29  ;;  %1005 = vmatprep.subr.bf16.mxu1 %v3984_v30  ;;  %v99_v29 = vld [vmem:[#allocation3 + $0x138] sm:$0xff]  ;;  %v3929_v30 = vcombine.low %v102_v17, %v106_v18  ;;  %v3922_v33 = vcombine.high %v94_v26, %v98_v27  ;;  %v3921_v40 = vcombine.low %v94_v26, %v98_v27  ;;  %v174_v17 = vld [vmem:[#allocation3 + $0x390] sm:$0xff] }
  0x4a   :  { %v3924_v34 = vcombine.high %v95_v28, %v99_v29  ;;  %v3923_v41 = vcombine.low %v95_v28, %v99_v29  ;;  %v178_v18 = vld [vmem:[#allocation3 + $0x3b0] sm:$0xff]  ;;  %v175_v20 = vld [vmem:[#allocation3 + $0x398] sm:$0xff] }
  0x4b   :  { %v179_v21 = vld [vmem:[#allocation3 + $0x3b8] sm:$0xff]  ;;  %v166_v26 = vld [vmem:[#allocation3 + $0x350] sm:$0xff] }
  0x4c   :  { %933 = vmatpush2.bf16.msra.mxu0 %v3981_v35  ;;  %1006 = vmatpush2.bf16.msra.mxu1 %v3983_v36  ;;  %v86_v35 = vld [vmem:[#allocation3 + $0xd0] sm:$0xff]  ;;  %v167_v28 = vld [vmem:[#allocation3 + $0x358] sm:$0xff] }
  0x4d   :  { %934 = vmatprep.subr.bf16.mxu0 %v3974_v37  ;;  %1007 = vmatprep.subr.bf16.mxu1 %v3976_v38  ;;  %v90_v36 = vld [vmem:[#allocation3 + $0xf0] sm:$0xff]  ;;  %v4628_v37 = vld [vmem:[%s6287_s0 + $0x24] ss:$8 sps:$4 sm:$0xff]   ;;  %v87_v38 = vld [vmem:[#allocation3 + $0xd8] sm:$0xff] }
  0x4e   :  { %v3914_v42 = vcombine.high %v86_v35, %v90_v36  ;;  %v3913_v48 = vcombine.low %v86_v35, %v90_v36  ;;  %v170_v27 = vld [vmem:[#allocation3 + $0x370] sm:$0xff]  ;;  %v171_v29 = vld [vmem:[#allocation3 + $0x378] sm:$0xff] }
  0x4f   :  { %v162_v35 = vld [vmem:[#allocation3 + $0x330] sm:$0xff]  ;;  %v159_v36 = vld [vmem:[#allocation3 + $0x318] sm:$0xff] }
  0x50   :  { %935 = vmatpush2.bf16.msra.mxu0 %v3973_v43  ;;  %1008 = vmatpush2.bf16.msra.mxu1 %v3975_v46  ;;  %v3916_v43 = vcombine.high %v87_v38, %v91_v39  ;;  %v79_v46 = vld [vmem:[#allocation3 + $0x98] sm:$0xff] }
  0x51   :  { %936 = vmatprep.subr.bf16.mxu0 %v3966_v47  ;;  %1009 = vmatprep.subr.bf16.mxu1 %v3968_v50  ;;  %v83_v47 = vld [vmem:[#allocation3 + $0xb8] sm:$0xff]  ;;  %v3915_v50 = vcombine.low %v87_v38, %v91_v39  ;;  %v3993_v39 = vcombine.low %v166_v26, %v170_v27 }
  0x52   :  { %v3908_v52 = vcombine.high %v79_v46, %v83_v47  ;;  %v163_v38 = vld [vmem:[#allocation3 + $0x338] sm:$0xff] }
  0x54   :  { %937 = vmatpush2.bf16.msra.mxu0 %v3965_v51  ;;  %1010 = vmatpush2.bf16.msra.mxu1 %v3967_v54  ;;  %v3906_v51 = vcombine.high %v78_v44, %v82_v45  ;;  %v74_v54 = vld [vmem:[#allocation3 + $0x70] sm:$0xff] }
  0x55   :  { %938 = vmatprep.subr.bf16.mxu0 %v3958_v55  ;;  %1011 = vmatprep.subr.bf16.mxu1 %v3960_v59  ;;  %v4642_v55 = vld [vmem:[%s6287_s0 + $0x34] ss:$8 sps:$4 sm:$0xff]   ;;  %v3905_v59 = vcombine.low %v78_v44, %v82_v45  ;;  %v3898_v61 = vcombine.high %v70_v53, %v74_v54  ;;  %v3897_v3 = vcombine.low %v70_v53, %v74_v54 }
  0x56   :  { %v154_v44 = vld [vmem:[#allocation3 + $0x2f0] sm:$0xff]  ;;  %v151_v45 = vld [vmem:[#allocation3 + $0x2d8] sm:$0xff] }
  0x57   :  { %v146_v53 = vld [vmem:[#allocation3 + $0x2b0] sm:$0xff]  ;;  %v143_v54 = vld [vmem:[#allocation3 + $0x298] sm:$0xff] }
  0x58   :  { %939 = vmatpush2.bf16.msra.mxu0 %v3957_v60  ;;  %1012 = vmatpush2.bf16.msra.mxu1 %v3959_v63  ;;  %v3907_v60 = vcombine.low %v79_v46, %v83_v47  ;;  %v62_v63 = vld [vmem:[#allocation3 + $0x10] sm:$0xff]  ;;  %v155_v46 = vld [vmem:[#allocation3 + $0x2f8] sm:$0xff] }
  0x59   :  { %940 = vmatprep.subr.bf16.mxu0 %v3950_v0  ;;  %1013 = vmatprep.subr.bf16.mxu1 %v3952_v1  ;;  %v66_v0 = vld [vmem:[#allocation3 + $0x30] sm:$0xff]  ;;  %v63_v1 = vld [vmem:[#allocation3 + $0x18] sm:$0xff] }
  0x5c   :  { %941 = vmatpush2.bf16.msra.mxu0 %v3949_v4  ;;  %1014 = vmatpush2.bf16.msra.mxu1 %v3951_v5  ;;  %v4651_v4 = vld [vmem:[%s6287_s0 + $0x30] ss:$8 sps:$4 sm:$0xff]   ;;  %v3899_v5 = vcombine.low %v71_v57, %v75_v58 }
  0x5d   :  { %1054 = vmatprep.subr.bf16.mxu0 %v3946_v6  ;;  %1127 = vmatprep.subr.bf16.mxu1 %v3948_v7  ;;  %v3890_v6 = vcombine.high %v62_v63, %v66_v0  ;;  %v3892_v7 = vcombine.high %v63_v1, %v67_v2  ;;  %v147_v57 = vld [vmem:[#allocation3 + $0x2b8] sm:$0xff] }
  0x5f   :  { %943 = vmatmul.mubr.bf16.vlgmr.msra.gmra.mxu0 %v4609_v10  ;;  %1016 = vmatmul.mubr.bf16.vlgmr.msra.gmra.mxu1 %v4609_v10 }
  0x60   :  { %1055 = vmatpush1.bf16.msra.mxu0 %v3945_v13  ;;  %1128 = vmatpush1.bf16.msra.mxu1 %v3947_v14  ;;  %v3889_v13 = vcombine.low %v62_v63, %v66_v0  ;;  %v3891_v14 = vcombine.low %v63_v1, %v67_v2  ;;  %v138_v63 = vld [vmem:[#allocation3 + $0x270] sm:$0xff]  ;;  %v135_v0 = vld [vmem:[#allocation3 + $0x258] sm:$0xff] }
  0x61   :  { %1056 = vmatprep.subr.bf16.mxu0 %v3938_v15  ;;  %1129 = vmatprep.subr.bf16.mxu1 %v3940_v16  ;;  %v4010_v15 = vcombine.high %v182_v8, %v186_v9  ;;  %v4012_v16 = vcombine.high %v183_v11, %v187_v12  ;;  %v139_v1 = vld [vmem:[#allocation3 + $0x278] sm:$0xff] }
  0x62   :  { %1023 = vmatprep.mubr.bf16.mxu1 %v4614_v19  ;;  %952 = vmatprep.mubr.bf16.mxu0 %v4614_v19 }
  0x64   :  { %1057 = vmatpush1.bf16.msra.mxu0 %v3937_v22  ;;  %1130 = vmatpush1.bf16.msra.mxu1 %v3939_v23  ;;  %v4009_v22 = vcombine.low %v182_v8, %v186_v9  ;;  %v4011_v23 = vcombine.low %v183_v11, %v187_v12  ;;  %v130_v8 = vld [vmem:[#allocation3 + $0x230] sm:$0xff]  ;;  %v127_v9 = vld [vmem:[#allocation3 + $0x218] sm:$0xff] }
  0x65   :  { %1058 = vmatprep.subr.bf16.mxu0 %v3930_v24  ;;  %1131 = vmatprep.subr.bf16.mxu1 %v3932_v25  ;;  %v4002_v24 = vcombine.high %v174_v17, %v178_v18  ;;  %v4004_v25 = vcombine.high %v175_v20, %v179_v21  ;;  %v131_v11 = vld [vmem:[#allocation3 + $0x238] sm:$0xff] }
  0x67   :  { %953 = vmatmul.mubr.bf16.gmra.mxu0 %v4623_v31  ;;  %1024 = vmatmul.mubr.bf16.gmra.mxu1 %v4623_v31 }
  0x68   :  { %1059 = vmatpush1.bf16.msra.mxu0 %v3929_v30  ;;  %1132 = vmatpush1.bf16.msra.mxu1 %v3931_v32  ;;  %v4001_v30 = vcombine.low %v174_v17, %v178_v18  ;;  %v4003_v32 = vcombine.low %v175_v20, %v179_v21  ;;  %v3955_v17 = vcombine.low %v127_v9, %v131_v11  ;;  %v1358_v18 = vld [vmem:[#allocation5 + $0x1e0] sm:$0xff]  ;;  %v1355_v20 = vld [vmem:[#allocation5 + $0x1c8] sm:$0xff] }
  0x69   :  { %1060 = vmatprep.subr.bf16.mxu0 %v3922_v33  ;;  %1133 = vmatprep.subr.bf16.mxu1 %v3924_v34  ;;  %v3994_v33 = vcombine.high %v166_v26, %v170_v27  ;;  %v158_v34 = vld [vmem:[#allocation3 + $0x310] sm:$0xff]  ;;  %v1359_v21 = vld [vmem:[#allocation5 + $0x1e8] sm:$0xff]  ;;  %v1338_v26 = vld [vmem:[#allocation5 + $0x140] sm:$0xff] }
  0x6a   :  { %1033 = vmatprep.mubr.bf16.mxu1 %v4628_v37  ;;  %962 = vmatprep.mubr.bf16.mxu0 %v4628_v37  ;;  %v3985_v47 = vcombine.low %v158_v34, %v162_v35 }
  0x6c   :  { %1061 = vmatpush1.bf16.msra.mxu0 %v3921_v40  ;;  %1134 = vmatpush1.bf16.msra.mxu1 %v3923_v41  ;;  %v3995_v40 = vcombine.low %v167_v28, %v171_v29  ;;  %v3986_v41 = vcombine.high %v158_v34, %v162_v35  ;;  %v1330_v34 = vld [vmem:[#allocation5 + $0x100] sm:$0xff] }
  0x6d   :  { %1062 = vmatprep.subr.bf16.mxu0 %v3914_v42  ;;  %1135 = vmatprep.subr.bf16.mxu1 %v3916_v43  ;;  %v3988_v42 = vcombine.high %v159_v36, %v163_v38  ;;  %v150_v43 = vld [vmem:[#allocation3 + $0x2d0] sm:$0xff]  ;;  %v1334_v35 = vld [vmem:[#allocation5 + $0x120] sm:$0xff] }
  0x6e   :  { %v3977_v58 = vcombine.low %v150_v43, %v154_v44 }
  0x6f   :  { %963 = vmatmul.mubr.bf16.gmra.mxu0 %v4637_v49  ;;  %1034 = vmatmul.mubr.bf16.gmra.mxu1 %v4637_v49 }
  0x70   :  { %1063 = vmatpush1.bf16.msra.mxu0 %v3913_v48  ;;  %1136 = vmatpush1.bf16.msra.mxu1 %v3915_v50  ;;  %v3987_v48 = vcombine.low %v159_v36, %v163_v38  ;;  %v3978_v50 = vcombine.high %v150_v43, %v154_v44  ;;  %v1331_v36 = vld [vmem:[#allocation5 + $0x108] sm:$0xff]  ;;  %v1322_v43 = vld [vmem:[#allocation5 + $0xc0] sm:$0xff] }
  0x71   :  { %1064 = vmatprep.subr.bf16.mxu0 %v3906_v51  ;;  %1137 = vmatprep.subr.bf16.mxu1 %v3908_v52  ;;  %v3980_v51 = vcombine.high %v151_v45, %v155_v46  ;;  %v142_v52 = vld [vmem:[#allocation3 + $0x290] sm:$0xff]  ;;  %v1335_v38 = vld [vmem:[#allocation5 + $0x128] sm:$0xff]  ;;  %v1326_v44 = vld [vmem:[#allocation5 + $0xe0] sm:$0xff] }
  0x72   :  { %1043 = vmatprep.mubr.bf16.mxu1 %v4642_v55  ;;  %972 = vmatprep.mubr.bf16.mxu0 %v4642_v55  ;;  %v3969_v2 = vcombine.low %v142_v52, %v146_v53 }
  0x74   :  { %1065 = vmatpush1.bf16.msra.mxu0 %v3905_v59  ;;  %1138 = vmatpush1.bf16.msra.mxu1 %v3907_v60  ;;  %v3979_v59 = vcombine.low %v151_v45, %v155_v46  ;;  %v3970_v60 = vcombine.high %v142_v52, %v146_v53  ;;  %v1323_v45 = vld [vmem:[#allocation5 + $0xc8] sm:$0xff]  ;;  %v1314_v52 = vld [vmem:[#allocation5 + $0x80] sm:$0xff] }
  0x75   :  { %1066 = vmatprep.subr.bf16.mxu0 %v3898_v61  ;;  %1139 = vmatprep.subr.bf16.mxu1 %v3900_v62  ;;  %v3972_v61 = vcombine.high %v143_v54, %v147_v57  ;;  %v134_v62 = vld [vmem:[#allocation3 + $0x250] sm:$0xff]  ;;  %v1327_v46 = vld [vmem:[#allocation5 + $0xe8] sm:$0xff]  ;;  %v1318_v53 = vld [vmem:[#allocation5 + $0xa0] sm:$0xff] }
  0x76   :  { %v3961_v12 = vcombine.low %v134_v62, %v138_v63 }
  0x77   :  { %973 = vmatmul.mubr.bf16.gmra.mxu0 %v4651_v4  ;;  %1044 = vmatmul.mubr.bf16.gmra.mxu1 %v4651_v4 }
  0x78   :  { %1067 = vmatpush1.bf16.msra.mxu0 %v3897_v3  ;;  %1140 = vmatpush1.bf16.msra.mxu1 %v3899_v5  ;;  %v3971_v3 = vcombine.low %v143_v54, %v147_v57  ;;  %v3962_v5 = vcombine.high %v134_v62, %v138_v63  ;;  %v1315_v54 = vld [vmem:[#allocation5 + $0x88] sm:$0xff]  ;;  %v4734_v62 = vcombine.low %v1314_v52, %v1318_v53 }
  0x79   :  { %1068 = vmatprep.subr.bf16.mxu0 %v3890_v6  ;;  %1141 = vmatprep.subr.bf16.mxu1 %v3892_v7  ;;  %v3964_v6 = vcombine.high %v135_v0, %v139_v1  ;;  %v126_v7 = vld [vmem:[#allocation3 + $0x210] sm:$0xff]  ;;  %v1319_v57 = vld [vmem:[#allocation5 + $0xa8] sm:$0xff] }
  0x7a   :  { %1086 = vmatprep.mubr.bf16.mxu0 %v4602_v56  ;;  %1159 = vmatprep.mubr.bf16.mxu1 %v4602_v56  ;;  %v3996_v56 = vcombine.high %v167_v28, %v171_v29  ;;  %v1342_v28 = vld [vmem:[#allocation5 + $0x160] sm:$0xff]  ;;  %v1339_v29 = vld [vmem:[#allocation5 + $0x148] sm:$0xff]  ;;  %6589 = vst [vmem:[#allocation31_spill] sm:$0xff] %v4734_v62  ;;  %v4738_v63 = vcombine.low %v1315_v54, %v1319_v57 }
  0x7c   :  { %1069 = vmatpush1.bf16.msra.mxu0 %v3889_v13  ;;  %1142 = vmatpush1.bf16.msra.mxu1 %v3891_v14  ;;  %v3963_v13 = vcombine.low %v135_v0, %v139_v1  ;;  %v3954_v14 = vcombine.high %v126_v7, %v130_v8  ;;  %6590 = vst [vmem:[#allocation32_spill] sm:$0xff] %v4738_v63  ;;  %v1306_v0 = vld [vmem:[#allocation5 + $0x40] sm:$0xff] }
  0x7d   :  { %1070 = vmatprep.subr.bf16.mxu0 %v4010_v15  ;;  %1143 = vmatprep.subr.bf16.mxu1 %v4012_v16  ;;  %v3956_v15 = vcombine.high %v127_v9, %v131_v11  ;;  %v3953_v16 = vcombine.low %v126_v7, %v130_v8  ;;  %v1310_v1 = vld [vmem:[#allocation5 + $0x60] sm:$0xff] }
  0x7e   :  { %v4747_v7 = vcombine.low %v1306_v0, %v1310_v1  ;;  %v1298_v9 = vld [vmem:[#allocation5] sm:$0xff] }
  0x7f   :  { %v1302_v11 = vld [vmem:[#allocation5 + $0x20] sm:$0xff] }
  0x80   :  { %1071 = vmatpush2.bf16.msra.mxu0 %v4009_v22  ;;  %1144 = vmatpush2.bf16.msra.mxu1 %v4011_v23  ;;  %v1350_v23 = vld [vmem:[#allocation5 + $0x1a0] sm:$0xff]  ;;  %6593 = vst [vmem:[#allocation35_spill] sm:$0xff] %v4747_v7 }
  0x81   :  { %1072 = vmatprep.subr.bf16.mxu0 %v4002_v24  ;;  %1145 = vmatprep.subr.bf16.mxu1 %v4004_v25  ;;  %v4676_v24 = vcombine.low %v1355_v20, %v1359_v21  ;;  %v1347_v25 = vld [vmem:[#allocation5 + $0x188] sm:$0xff] }
  0x83   :  { %6570 = vst [vmem:[#allocation12_spill] sm:$0xff] %v4676_v24 }
  0x84   :  { %1073 = vmatpush2.bf16.msra.mxu0 %v4001_v30  ;;  %1146 = vmatpush2.bf16.msra.mxu1 %v4003_v32  ;;  %v1343_v30 = vld [vmem:[#allocation5 + $0x168] sm:$0xff] }
  0x85   :  { %1074 = vmatprep.subr.bf16.mxu0 %v3994_v33  ;;  %1147 = vmatprep.subr.bf16.mxu1 %v3996_v56  ;;  %v4695_v56 = vcombine.high %v1339_v29, %v1343_v30 }
  0x87   :  { %6576 = vst [vmem:[#allocation18_spill] sm:$0xff] %v4695_v56 }
  0x88   :  { %1075 = vmatpush2.bf16.msra.mxu0 %v3993_v39  ;;  %1148 = vmatpush2.bf16.msra.mxu1 %v3995_v40  ;;  %v4698_v39 = vcombine.low %v1338_v26, %v1342_v28  ;;  %v4702_v40 = vcombine.low %v1339_v29, %v1343_v30  ;;  %v1411_v29 = vld [vmem:[#allocation5 + $0x388] sm:$0xff] }
  0x89   :  { %1076 = vmatprep.subr.bf16.mxu0 %v3986_v41  ;;  %1149 = vmatprep.subr.bf16.mxu1 %v3988_v42  ;;  %v4704_v41 = vcombine.high %v1330_v34, %v1334_v35  ;;  %v4707_v42 = vcombine.high %v1331_v36, %v1335_v38 }
  0x8a   :  { %6577 = vst [vmem:[#allocation19_spill] sm:$0xff] %v4698_v39  ;;  %6578 = vst [vmem:[#allocation20_spill] sm:$0xff] %v4702_v40 }
  0x8b   :  { %6579 = vst [vmem:[#allocation21_spill] sm:$0xff] %v4704_v41  ;;  %6580 = vst [vmem:[#allocation22_spill] sm:$0xff] %v4707_v42 }
  0x8c   :  { %1077 = vmatpush2.bf16.msra.mxu0 %v3985_v47  ;;  %1150 = vmatpush2.bf16.msra.mxu1 %v3987_v48  ;;  %v4710_v47 = vcombine.low %v1330_v34, %v1334_v35  ;;  %v4714_v48 = vcombine.low %v1331_v36, %v1335_v38  ;;  %v1415_v34 = vld [vmem:[#allocation5 + $0x3a8] sm:$0xff] }
  0x8d   :  { %1078 = vmatprep.subr.bf16.mxu0 %v3978_v50  ;;  %1151 = vmatprep.subr.bf16.mxu1 %v3980_v51  ;;  %v4716_v50 = vcombine.high %v1322_v43, %v1326_v44  ;;  %v4719_v51 = vcombine.high %v1323_v45, %v1327_v46  ;;  %v4781_v35 = vcombine.high %v1411_v29, %v1415_v34 }
  0x8e   :  { %6581 = vst [vmem:[#allocation23_spill] sm:$0xff] %v4710_v47  ;;  %6582 = vst [vmem:[#allocation24_spill] sm:$0xff] %v4714_v48  ;;  %v4785_v38 = vcombine.low %v1411_v29, %v1415_v34  ;;  %v1378_v29 = vld [vmem:[#allocation5 + $0x280] sm:$0xff] }
  0x8f   :  { %6583 = vst [vmem:[#allocation25_spill] sm:$0xff] %v4716_v50  ;;  %6584 = vst [vmem:[#allocation26_spill] sm:$0xff] %v4719_v51  ;;  %v1382_v34 = vld [vmem:[#allocation5 + $0x2a0] sm:$0xff] }
  0x90   :  { %1079 = vmatpush2.bf16.msra.mxu0 %v3977_v58  ;;  %1152 = vmatpush2.bf16.msra.mxu1 %v3979_v59  ;;  %v4722_v58 = vcombine.low %v1322_v43, %v1326_v44  ;;  %v4726_v59 = vcombine.low %v1323_v45, %v1327_v46  ;;  %6604 = vst [vmem:[#allocation46_spill] sm:$0xff] %v4781_v35  ;;  %6606 = vst [vmem:[#allocation48_spill] sm:$0xff] %v4785_v38  ;;  %v1402_v43 = vld [vmem:[#allocation5 + $0x340] sm:$0xff]  ;;  %v1403_v45 = vld [vmem:[#allocation5 + $0x348] sm:$0xff] }
  0x91   :  { %1080 = vmatprep.subr.bf16.mxu0 %v3970_v60  ;;  %1153 = vmatprep.subr.bf16.mxu1 %v3972_v61  ;;  %v4728_v60 = vcombine.high %v1314_v52, %v1318_v53  ;;  %v4731_v61 = vcombine.high %v1315_v54, %v1319_v57  ;;  %v1406_v44 = vld [vmem:[#allocation5 + $0x360] sm:$0xff]  ;;  %v1407_v52 = vld [vmem:[#allocation5 + $0x368] sm:$0xff] }
  0x92   :  { %6585 = vst [vmem:[#allocation27_spill] sm:$0xff] %v4722_v58  ;;  %6586 = vst [vmem:[#allocation28_spill] sm:$0xff] %v4726_v59  ;;  %v4791_v46 = vcombine.high %v1402_v43, %v1406_v44  ;;  %v4793_v53 = vcombine.high %v1403_v45, %v1407_v52  ;;  %v4795_v54 = vcombine.low %v1402_v43, %v1406_v44 }
  0x93   :  { %6587 = vst [vmem:[#allocation29_spill] sm:$0xff] %v4728_v60  ;;  %6588 = vst [vmem:[#allocation30_spill] sm:$0xff] %v4731_v61  ;;  %v4797_v57 = vcombine.low %v1403_v45, %v1407_v52  ;;  %v4823_v45 = vcombine.high %v1378_v29, %v1382_v34  ;;  %v1379_v52 = vld [vmem:[#allocation5 + $0x288] sm:$0xff] }
  0x94   :  { %1081 = vmatpush2.bf16.msra.mxu0 %v3969_v2  ;;  %1154 = vmatpush2.bf16.msra.mxu1 %v3971_v3  ;;  %v1307_v2 = vld [vmem:[#allocation5 + $0x48] sm:$0xff]  ;;  %v4743_v3 = vcombine.high %v1306_v0, %v1310_v1  ;;  %6607 = vst [vmem:[#allocation49_spill] sm:$0xff] %v4791_v46  ;;  %6608 = vst [vmem:[#allocation50_spill] sm:$0xff] %v4793_v53  ;;  %v1394_v0 = vld [vmem:[#allocation5 + $0x300] sm:$0xff] }
  0x95   :  { %1082 = vmatprep.subr.bf16.mxu0 %v3962_v5  ;;  %1155 = vmatprep.subr.bf16.mxu1 %v3964_v6  ;;  %v1311_v5 = vld [vmem:[#allocation5 + $0x68] sm:$0xff]  ;;  %6609 = vst [vmem:[#allocation51_spill] sm:$0xff] %v4795_v54  ;;  %6610 = vst [vmem:[#allocation52_spill] sm:$0xff] %v4797_v57  ;;  %v1398_v1 = vld [vmem:[#allocation5 + $0x320] sm:$0xff] }
  0x96   :  { %6591 = vst [vmem:[#allocation33_spill] sm:$0xff] %v4743_v3  ;;  %v4745_v6 = vcombine.high %v1307_v2, %v1311_v5  ;;  %v4749_v8 = vcombine.low %v1307_v2, %v1311_v5  ;;  %v1395_v2 = vld [vmem:[#allocation5 + $0x308] sm:$0xff]  ;;  %v4803_v5 = vcombine.high %v1394_v0, %v1398_v1  ;;  %6619 = vst [vmem:[#allocation61_spill] sm:$0xff] %v4823_v45 }
  0x98   :  { %1083 = vmatpush2.bf16.msra.mxu0 %v3961_v12  ;;  %1156 = vmatpush2.bf16.msra.mxu1 %v3963_v13  ;;  %6592 = vst [vmem:[#allocation34_spill] sm:$0xff] %v4745_v6  ;;  %6594 = vst [vmem:[#allocation36_spill] sm:$0xff] %v4749_v8  ;;  %v1299_v12 = vld [vmem:[#allocation5 + $0x8] sm:$0xff]  ;;  %v4755_v13 = vcombine.high %v1298_v9, %v1302_v11 }
  0x99   :  { %1084 = vmatprep.subr.bf16.mxu0 %v3954_v14  ;;  %1157 = vmatprep.subr.bf16.mxu1 %v3956_v15  ;;  %v1303_v14 = vld [vmem:[#allocation5 + $0x28] sm:$0xff]  ;;  %6611 = vst [vmem:[#allocation53_spill] sm:$0xff] %v4803_v5 }
  0x9a   :  { %6595 = vst [vmem:[#allocation37_spill] sm:$0xff] %v4755_v13  ;;  %v4757_v15 = vcombine.high %v1299_v12, %v1303_v14 }
  0x9c   :  { %1085 = vmatpush2.bf16.msra.mxu0 %v3953_v16  ;;  %1158 = vmatpush2.bf16.msra.mxu1 %v3955_v17  ;;  %6596 = vst [vmem:[#allocation38_spill] sm:$0xff] %v4757_v15  ;;  %v4759_v16 = vcombine.low %v1298_v9, %v1302_v11  ;;  %v4761_v17 = vcombine.low %v1299_v12, %v1303_v14  ;;  %v1399_v9 = vld [vmem:[#allocation5 + $0x328] sm:$0xff] }
  0x9d   :  { %v4805_v11 = vcombine.high %v1395_v2, %v1399_v9  ;;  %v4807_v12 = vcombine.low %v1394_v0, %v1398_v1  ;;  %v4809_v14 = vcombine.low %v1395_v2, %v1399_v9  ;;  %v1383_v0 = vld [vmem:[#allocation5 + $0x2a8] sm:$0xff]  ;;  %v1370_v1 = vld [vmem:[#allocation5 + $0x240] sm:$0xff] }
  0x9e   :  { %6597 = vst [vmem:[#allocation39_spill] sm:$0xff] %v4759_v16  ;;  %6598 = vst [vmem:[#allocation40_spill] sm:$0xff] %v4761_v17  ;;  %v4826_v2 = vcombine.high %v1379_v52, %v1383_v0  ;;  %v1374_v9 = vld [vmem:[#allocation5 + $0x260] sm:$0xff] }
  0x9f   :  { %1087 = vmatmul.mubr.bf16.vlgmr.msra.gmra.mxu0 %v4609_v10  ;;  %1160 = vmatmul.mubr.bf16.vlgmr.msra.gmra.mxu1 %v4609_v10  ;;  %v1354_v10 = vld [vmem:[#allocation5 + $0x1c0] sm:$0xff]  ;;  %6612 = vst [vmem:[#allocation54_spill] sm:$0xff] %v4805_v11  ;;  %6613 = vst [vmem:[#allocation55_spill] sm:$0xff] %v4807_v12 }
  0xa0   :  { %1096 = vmatprep.mubr.bf16.mxu0 %v4614_v19  ;;  %1169 = vmatprep.mubr.bf16.mxu1 %v4614_v19  ;;  %v4669_v19 = vcombine.high %v1354_v10, %v1358_v18  ;;  %v4671_v22 = vcombine.low %v1354_v10, %v1358_v18  ;;  %v1418_v10 = vld [vmem:[#allocation5 + $0x3c0] sm:$0xff]  ;;  %6614 = vst [vmem:[#allocation56_spill] sm:$0xff] %v4809_v14  ;;  %6620 = vst [vmem:[#allocation62_spill] sm:$0xff] %v4826_v2 }
  0xa1   :  { %v1422_v18 = vld [vmem:[#allocation5 + $0x3e0] sm:$0xff] }
  0xa2   :  { %6567 = vst [vmem:[#allocation9_spill] sm:$0xff] %v4669_v19  ;;  %6568 = vst [vmem:[#allocation10_spill] sm:$0xff] %v4671_v22  ;;  %2066 = vmatprep.subr.bf16.mxu0 %v4669_v19 }
  0xa3   :  { %2067 = vmatpush1.bf16.msra.mxu0 %v4671_v22 }
  0xa7   :  { %1097 = vmatmul.mubr.bf16.gmra.mxu0 %v4623_v31  ;;  %1170 = vmatmul.mubr.bf16.gmra.mxu1 %v4623_v31  ;;  %v1346_v31 = vld [vmem:[#allocation5 + $0x180] sm:$0xff] }
  0xa8   :  { %1106 = vmatprep.mubr.bf16.mxu0 %v4628_v37  ;;  %1179 = vmatprep.mubr.bf16.mxu1 %v4628_v37  ;;  %v4674_v37 = vcombine.high %v1355_v20, %v1359_v21  ;;  %v4686_v32 = vcombine.low %v1346_v31, %v1350_v23  ;;  %v1419_v20 = vld [vmem:[#allocation5 + $0x3c8] sm:$0xff]  ;;  %v4767_v21 = vcombine.high %v1418_v10, %v1422_v18 }
  0xaa   :  { %6569 = vst [vmem:[#allocation11_spill] sm:$0xff] %v4674_v37  ;;  %2107 = vmatprep.subr.bf16.mxu1 %v4674_v37  ;;  %6573 = vst [vmem:[#allocation15_spill] sm:$0xff] %v4686_v32 }
  0xab   :  { %2108 = vmatpush1.bf16.msra.mxu1 %v4676_v24  ;;  %6599 = vst [vmem:[#allocation41_spill] sm:$0xff] %v4767_v21 }
  0xaf   :  { %1107 = vmatmul.mubr.bf16.gmra.mxu0 %v4637_v49  ;;  %1180 = vmatmul.mubr.bf16.gmra.mxu1 %v4637_v49  ;;  %v4678_v49 = vcombine.high %v1346_v31, %v1350_v23  ;;  %v1423_v31 = vld [vmem:[#allocation5 + $0x3e8] sm:$0xff] }
  0xb0   :  { %1116 = vmatprep.mubr.bf16.mxu0 %v4642_v55  ;;  %1189 = vmatprep.mubr.bf16.mxu1 %v4642_v55  ;;  %v1351_v55 = vld [vmem:[#allocation5 + $0x1a8] sm:$0xff]  ;;  %v4769_v23 = vcombine.high %v1419_v20, %v1423_v31 }
  0xb1   :  { %6571 = vst [vmem:[#allocation13_spill] sm:$0xff] %v4678_v49  ;;  %v4682_v27 = vcombine.high %v1347_v25, %v1351_v55  ;;  %2068 = vmatprep.subr.bf16.mxu0 %v4678_v49  ;;  %v4690_v33 = vcombine.low %v1347_v25, %v1351_v55  ;;  %v4771_v25 = vcombine.low %v1418_v10, %v1422_v18  ;;  %v1386_v10 = vld [vmem:[#allocation5 + $0x2c0] sm:$0xff] }
  0xb2   :  { %2069 = vmatpush1.bf16.msra.mxu0 %v4686_v32  ;;  %6600 = vst [vmem:[#allocation42_spill] sm:$0xff] %v4769_v23  ;;  %v4773_v55 = vcombine.low %v1419_v20, %v1423_v31  ;;  %v1390_v18 = vld [vmem:[#allocation5 + $0x2e0] sm:$0xff]  ;;  %v1387_v20 = vld [vmem:[#allocation5 + $0x2c8] sm:$0xff] }
  0xb3   :  { %6572 = vst [vmem:[#allocation14_spill] sm:$0xff] %v4682_v27  ;;  %6574 = vst [vmem:[#allocation16_spill] sm:$0xff] %v4690_v33  ;;  %2109 = vmatprep.subr.bf16.mxu1 %v4682_v27  ;;  %v4815_v31 = vcombine.high %v1386_v10, %v1390_v18 }
  0xb4   :  { %2110 = vmatpush1.bf16.msra.mxu1 %v4690_v33  ;;  %6601 = vst [vmem:[#allocation43_spill] sm:$0xff] %v4771_v25  ;;  %6602 = vst [vmem:[#allocation44_spill] sm:$0xff] %v4773_v55 }
  0xb5   :  { %2111 = vmatprep.subr.bf16.mxu1 %v4695_v56  ;;  %6615 = vst [vmem:[#allocation57_spill] sm:$0xff] %v4815_v31 }
  0xb7   :  { %1117 = vmatmul.mubr.bf16.gmra.mxu0 %v4651_v4  ;;  %1190 = vmatmul.mubr.bf16.gmra.mxu1 %v4651_v4  ;;  %v4692_v4 = vcombine.high %v1338_v26, %v1342_v28  ;;  %v1410_v26 = vld [vmem:[#allocation5 + $0x380] sm:$0xff] }
  0xb8   :  { %2112 = vmatpush1.bf16.msra.mxu1 %v4702_v40  ;;  %v1414_v28 = vld [vmem:[#allocation5 + $0x3a0] sm:$0xff] }
  0xb9   :  { %6575 = vst [vmem:[#allocation17_spill] sm:$0xff] %v4692_v4  ;;  %2070 = vmatprep.subr.bf16.mxu0 %v4692_v4  ;;  %2113 = vmatprep.subr.bf16.mxu1 %v4707_v42  ;;  %v4779_v30 = vcombine.high %v1410_v26, %v1414_v28  ;;  %v4783_v36 = vcombine.low %v1410_v26, %v1414_v28  ;;  %v1391_v26 = vld [vmem:[#allocation5 + $0x2e8] sm:$0xff] }
  0xba   :  { %2071 = vmatpush1.bf16.msra.mxu0 %v4698_v39  ;;  %v4817_v28 = vcombine.low %v1386_v10, %v1390_v18  ;;  %v4819_v43 = vcombine.high %v1387_v20, %v1391_v26  ;;  %v4821_v44 = vcombine.low %v1387_v20, %v1391_v26  ;;  %v4830_v10 = vcombine.low %v1378_v29, %v1382_v34 }
  0xbb   :  { %2072 = vmatprep.subr.bf16.mxu0 %v4704_v41  ;;  %6603 = vst [vmem:[#allocation45_spill] sm:$0xff] %v4779_v30  ;;  %6605 = vst [vmem:[#allocation47_spill] sm:$0xff] %v4783_v36  ;;  %v4834_v18 = vcombine.low %v1379_v52, %v1383_v0  ;;  %v4836_v20 = vcombine.high %v1370_v1, %v1374_v9  ;;  %v4842_v29 = vcombine.low %v1370_v1, %v1374_v9  ;;  %v1357_v9 = vld [vmem:[#allocation5 + $0x1d8] sm:$0xff] }
  0xbc   :  { %2114 = vmatpush1.bf16.msra.mxu1 %v4714_v48  ;;  %6616 = vst [vmem:[#allocation58_spill] sm:$0xff] %v4817_v28  ;;  %6617 = vst [vmem:[#allocation59_spill] sm:$0xff] %v4819_v43 }
  0xbd   :  { %2115 = vmatprep.subr.bf16.mxu1 %v4719_v51  ;;  %6618 = vst [vmem:[#allocation60_spill] sm:$0xff] %v4821_v44  ;;  %6621 = vst [vmem:[#allocation63_spill] sm:$0xff] %v4830_v10 }
  0xbe   :  { %2073 = vmatpush1.bf16.msra.mxu0 %v4710_v47  ;;  %6622 = vst [vmem:[#allocation64_spill] sm:$0xff] %v4834_v18  ;;  %6623 = vst [vmem:[#allocation65_spill] sm:$0xff] %v4836_v20 }
  0xbf   :  { %2074 = vmatprep.subr.bf16.mxu0 %v4716_v50  ;;  %6625 = vst [vmem:[#allocation67_spill] sm:$0xff] %v4842_v29 }
  0xc0   :  { %2116 = vmatpush1.bf16.msra.mxu1 %v4726_v59 }
  0xc1   :  { %2117 = vmatprep.subr.bf16.mxu1 %v4731_v61 }
  0xc2   :  { %2075 = vmatpush1.bf16.msra.mxu0 %v4722_v58 }
  0xc3   :  { %2076 = vmatprep.subr.bf16.mxu0 %v4728_v60 }
  0xc4   :  { %2118 = vmatpush1.bf16.msra.mxu1 %v4738_v63 }
  0xc5   :  { %2119 = vmatprep.subr.bf16.mxu1 %v4745_v6 }
  0xc6   :  { %2077 = vmatpush1.bf16.msra.mxu0 %v4734_v62 }
  0xc7   :  { %2078 = vmatprep.subr.bf16.mxu0 %v4743_v3 }
  0xc8   :  { %2120 = vmatpush1.bf16.msra.mxu1 %v4749_v8 }
  0xc9   :  { %2121 = vmatprep.subr.bf16.mxu1 %v4757_v15 }
  0xca   :  { %2079 = vmatpush1.bf16.msra.mxu0 %v4747_v7 }
  0xcb   :  { %2080 = vmatprep.subr.bf16.mxu0 %v4755_v13 }
  0xcc   :  { %2122 = vmatpush1.bf16.msra.mxu1 %v4761_v17 }
  0xcd   :  { %2123 = vmatprep.subr.bf16.mxu1 %v4769_v23 }
  0xce   :  { %2081 = vmatpush1.bf16.msra.mxu0 %v4759_v16 }
  0xcf   :  { %2082 = vmatprep.subr.bf16.mxu0 %v4767_v21 }
  0xd0   :  { %2124 = vmatpush2.bf16.msra.mxu1 %v4773_v55 }
  0xd1   :  { %2125 = vmatprep.subr.bf16.mxu1 %v4781_v35 }
  0xd2   :  { %2083 = vmatpush2.bf16.msra.mxu0 %v4771_v25 }
  0xd3   :  { %2084 = vmatprep.subr.bf16.mxu0 %v4779_v30 }
  0xd4   :  { %2126 = vmatpush2.bf16.msra.mxu1 %v4785_v38 }
  0xd5   :  { %2127 = vmatprep.subr.bf16.mxu1 %v4793_v53 }
  0xd6   :  { %2085 = vmatpush2.bf16.msra.mxu0 %v4783_v36 }
  0xd7   :  { %2086 = vmatprep.subr.bf16.mxu0 %v4791_v46 }
  0xd8   :  { %2128 = vmatpush2.bf16.msra.mxu1 %v4797_v57 }
  0xd9   :  { %2129 = vmatprep.subr.bf16.mxu1 %v4805_v11  ;;  %v1366_v11 = vld [vmem:[#allocation5 + $0x220] sm:$0xff] }
  0xda   :  { %2087 = vmatpush2.bf16.msra.mxu0 %v4795_v54 }
  0xdb   :  { %2088 = vmatprep.subr.bf16.mxu0 %v4803_v5  ;;  %v1363_v5 = vld [vmem:[#allocation5 + $0x208] sm:$0xff] }
  0xdc   :  { %2130 = vmatpush2.bf16.msra.mxu1 %v4809_v14  ;;  %v1371_v14 = vld [vmem:[#allocation5 + $0x248] sm:$0xff] }
  0xdd   :  { %2131 = vmatprep.subr.bf16.mxu1 %v4819_v43  ;;  %v1367_v43 = vld [vmem:[#allocation5 + $0x228] sm:$0xff] }
  0xde   :  { %2089 = vmatpush2.bf16.msra.mxu0 %v4807_v12  ;;  %v1375_v12 = vld [vmem:[#allocation5 + $0x268] sm:$0xff]  ;;  %v4851_v0 = vcombine.high %v1363_v5, %v1367_v43  ;;  %v4858_v1 = vcombine.low %v1363_v5, %v1367_v43  ;;  %v190_v43 = vlaneseq }
  0xdf   :  { %2090 = vmatprep.subr.bf16.mxu0 %v4815_v31  ;;  %v4839_v26 = vcombine.high %v1371_v14, %v1375_v12  ;;  %v1362_v31 = vld [vmem:[#allocation5 + $0x200] sm:$0xff]  ;;  %v4846_v34 = vcombine.low %v1371_v14, %v1375_v12  ;;  %v1356_v12 = vld [vmem:[#allocation5 + $0x1d0] sm:$0xff] }
  0xe0   :  { %2132 = vmatpush2.bf16.msra.mxu1 %v4821_v44  ;;  %v4848_v52 = vcombine.high %v1362_v31, %v1366_v11  ;;  %6628 = vst [vmem:[#allocation70_spill] sm:$0xff] %v4851_v0  ;;  %6630 = vst [vmem:[#allocation72_spill] sm:$0xff] %v4858_v1  ;;  %v1360_v14 = vld [vmem:[#allocation5 + $0x1f0] sm:$0xff] }
  0xe1   :  { %2133 = vmatprep.subr.bf16.mxu1 %v4826_v2  ;;  %6624 = vst [vmem:[#allocation66_spill] sm:$0xff] %v4839_v26  ;;  %6626 = vst [vmem:[#allocation68_spill] sm:$0xff] %v4846_v34  ;;  %v4854_v2 = vcombine.low %v1362_v31, %v1366_v11  ;;  %v4867_v31 = vcombine.low %v1356_v12, %v1360_v14 }
  0xe2   :  { %2091 = vmatpush2.bf16.msra.mxu0 %v4817_v28  ;;  %6627 = vst [vmem:[#allocation69_spill] sm:$0xff] %v4848_v52 }
  0xe3   :  { %2092 = vmatprep.subr.bf16.mxu0 %v4823_v45  ;;  %6629 = vst [vmem:[#allocation71_spill] sm:$0xff] %v4854_v2  ;;  %6633 = vst [vmem:[#allocation75_spill] sm:$0xff] %v4867_v31 }
  0xe4   :  { %2134 = vmatpush2.bf16.msra.mxu1 %v4834_v18 }
  0xe5   :  { %2135 = vmatprep.subr.bf16.mxu1 %v4839_v26  ;;  %v4863_v26 = vcombine.high %v1356_v12, %v1360_v14 }
  0xe6   :  { %2093 = vmatpush2.bf16.msra.mxu0 %v4830_v10 }
  0xe7   :  { %2094 = vmatprep.subr.bf16.mxu0 %v4836_v20  ;;  %6631 = vst [vmem:[#allocation73_spill] sm:$0xff] %v4863_v26 }
  0xe8   :  { %2136 = vmatpush2.bf16.msra.mxu1 %v4846_v34 }
  0xe9   :  { %2137 = vmatprep.subr.bf16.mxu1 %v4851_v0 }
  0xea   :  { %2095 = vmatpush2.bf16.msra.mxu0 %v4842_v29  ;;  %v1361_v29 = vld [vmem:[#allocation5 + $0x1f8] sm:$0xff] }
  0xeb   :  { %2096 = vmatprep.subr.bf16.mxu0 %v4848_v52  ;;  %v4865_v11 = vcombine.high %v1357_v9, %v1361_v29  ;;  %v4870_v5 = vcombine.low %v1357_v9, %v1361_v29 }
  0xec   :  { %2138 = vmatpush2.bf16.msra.mxu1 %v4858_v1  ;;  %v4879_v1 = vld [vmem:[%s6289_s2] sm:$0xff] }
  0xed   :  { %6632 = vst [vmem:[#allocation74_spill] sm:$0xff] %v4865_v11  ;;  %6634 = vst [vmem:[#allocation76_spill] sm:$0xff] %v4870_v5  ;;  %2189 = vmatprep.subr.bf16.mxu1 %v4865_v11 }
  0xee   :  { %2097 = vmatpush2.bf16.msra.mxu0 %v4854_v2  ;;  %v4873_v2 = vshrl.u32 %v190_v43, 7 }
  0xef   :  { %2148 = vmatprep.subr.bf16.mxu0 %v4863_v26 }
  0xf0   :  { %v192_v0 = vsub.s32 0, %v4873_v2  ;;  %v196_v29 = vsub.s32 1, %v4873_v2  ;;  %v200_v43 = vsub.s32 2, %v4873_v2  ;;  %v204_v45 = vsub.s32 3, %v4873_v2 }
  0xf2   :  { %v4884_v12 = vrot.slane %v4879_v1, %v192_v0  ;;  %v197_v34 = vrot.slane %v4879_v1, %v196_v29  ;;  %v4900_v44 = vrot.slane %v4879_v1, %v200_v43 }
 0x11f   :  { %v4881_v52 = vpop.f32.mrf.mxu0  ;;  %v1017_v14 = vpop.f32.mrf.mxu1 }
 0x121   :  { %v946_v9 = vpop.f32.mrf.mxu0  ;;  %v1018_v11 = vpop.f32.mrf.mxu1 }
 0x123   :  { %v948_v26 = vpop.f32.mrf.mxu0  ;;  %v4892_v18 = vpop.f32.mrf.mxu1 }
 0x124   :  { %v4890_v20 = vadd.f32 %v948_v26, %v4884_v12  ;;  %6636 = vst [vmem:[#allocation78_spill] sm:$0xff] %v4892_v18  ;;  %v4906_v26 = vrot.slane %v4879_v1, %v204_v45 }
 0x125   :  { %v950_v10 = vpop.f32.mrf.mxu0  ;;  %v4897_v14 = vpop.f32.mrf.mxu1 }
 0x126   :  { %6635 = vst [vmem:[#allocation77_spill] sm:$0xff] %v4890_v20  ;;  %v4895_v0 = vadd.f32 %v950_v10, %v197_v34  ;;  %6638 = vst [vmem:[#allocation80_spill] sm:$0xff] %v4897_v14 }
 0x127   :  { %v954_v11 = vpop.f32.mrf.mxu0  ;;  %v1025_v28 = vpop.f32.mrf.mxu1 }
 0x128   :  { %6637 = vst [vmem:[#allocation79_spill] sm:$0xff] %v4895_v0  ;;  %v4903_v57 = vadd.f32 %v954_v11, %v4884_v12  ;;  %v4909_v29 = vadd.f32 %v1025_v28, %v4900_v44 }
 0x129   :  { %v956_v20 = vpop.f32.mrf.mxu0  ;;  %v1027_v18 = vpop.f32.mrf.mxu1 }
 0x12a   :  { %6639 = vst [vmem:[#allocation81_spill] sm:$0xff] %v4903_v57  ;;  %6640 = vst [vmem:[#allocation82_spill] sm:$0xff] %v4909_v29  ;;  %v4911_v10 = vadd.f32 %v956_v20, %v197_v34  ;;  %v4914_v0 = vadd.f32 %v1027_v18, %v4906_v26 }
 0x12b   :  { %v958_v43 = vpop.f32.mrf.mxu0  ;;  %v1029_v14 = vpop.f32.mrf.mxu1 }
 0x12c   :  { %6641 = vst [vmem:[#allocation83_spill] sm:$0xff] %v4911_v10  ;;  %6642 = vst [vmem:[#allocation84_spill] sm:$0xff] %v4914_v0  ;;  %v4917_v54 = vadd.f32 %v958_v43, %v4884_v12  ;;  %v4920_v11 = vadd.f32 %v1029_v14, %v4900_v44 }
 0x12d   :  { %v960_v45 = vpop.f32.mrf.mxu0  ;;  %v1031_v57 = vpop.f32.mrf.mxu1 }
 0x12e   :  { %6643 = vst [vmem:[#allocation85_spill] sm:$0xff] %v4917_v54  ;;  %6644 = vst [vmem:[#allocation86_spill] sm:$0xff] %v4920_v11  ;;  %v4922_v53 = vadd.f32 %v960_v45, %v197_v34  ;;  %v4925_v28 = vadd.f32 %v1031_v57, %v4906_v26 }
 0x12f   :  { %v964_v20 = vpop.f32.mrf.mxu0  ;;  %v1035_v10 = vpop.f32.mrf.mxu1 }
 0x130   :  { %6645 = vst [vmem:[#allocation87_spill] sm:$0xff] %v4922_v53  ;;  %6646 = vst [vmem:[#allocation88_spill] sm:$0xff] %v4925_v28  ;;  %v4928_v18 = vadd.f32 %v964_v20, %v4884_v12  ;;  %v4931_v0 = vadd.f32 %v1035_v10, %v4900_v44 }
 0x131   :  { %v966_v43 = vpop.f32.mrf.mxu0  ;;  %v1037_v54 = vpop.f32.mrf.mxu1 }
 0x132   :  { %6647 = vst [vmem:[#allocation89_spill] sm:$0xff] %v4928_v18  ;;  %6648 = vst [vmem:[#allocation90_spill] sm:$0xff] %v4931_v0  ;;  %v4933_v29 = vadd.f32 %v966_v43, %v197_v34  ;;  %v4936_v14 = vadd.f32 %v1037_v54, %v4906_v26 }
 0x133   :  { %v968_v45 = vpop.f32.mrf.mxu0  ;;  %v1039_v53 = vpop.f32.mrf.mxu1 }
 0x134   :  { %6649 = vst [vmem:[#allocation91_spill] sm:$0xff] %v4933_v29  ;;  %6650 = vst [vmem:[#allocation92_spill] sm:$0xff] %v4936_v14  ;;  %v4939_v57 = vadd.f32 %v968_v45, %v4884_v12  ;;  %v4942_v28 = vadd.f32 %v1039_v53, %v4900_v44 }
 0x135   :  { %v970_v20 = vpop.f32.mrf.mxu0  ;;  %v1041_v18 = vpop.f32.mrf.mxu1 }
 0x136   :  { %6651 = vst [vmem:[#allocation93_spill] sm:$0xff] %v4939_v57  ;;  %6652 = vst [vmem:[#allocation94_spill] sm:$0xff] %v4942_v28  ;;  %v4944_v11 = vadd.f32 %v970_v20, %v197_v34  ;;  %v4947_v10 = vadd.f32 %v1041_v18, %v4906_v26 }
 0x137   :  { %v974_v43 = vpop.f32.mrf.mxu0  ;;  %v1045_v29 = vpop.f32.mrf.mxu1 }
 0x138   :  { %6653 = vst [vmem:[#allocation95_spill] sm:$0xff] %v4944_v11  ;;  %6654 = vst [vmem:[#allocation96_spill] sm:$0xff] %v4947_v10  ;;  %v4950_v54 = vadd.f32 %v974_v43, %v4884_v12  ;;  %v4953_v14 = vadd.f32 %v1045_v29, %v4900_v44 }
 0x139   :  { %v976_v45 = vpop.f32.mrf.mxu0  ;;  %v1047_v57 = vpop.f32.mrf.mxu1 }
 0x13a   :  { %6655 = vst [vmem:[#allocation97_spill] sm:$0xff] %v4950_v54  ;;  %6656 = vst [vmem:[#allocation98_spill] sm:$0xff] %v4953_v14  ;;  %v4955_v0 = vadd.f32 %v976_v45, %v197_v34  ;;  %v4958_v53 = vadd.f32 %v1047_v57, %v4906_v26  ;;  %v945_v45 = vadd.f32 %v4881_v52, %v4884_v12 }
 0x13b   :  { %v978_v20 = vpop.f32.mrf.mxu0  ;;  %v1049_v11 = vpop.f32.mrf.mxu1  ;;  %v947_v57 = vadd.f32 %v946_v9, %v197_v34 }
 0x13c   :  { %6657 = vst [vmem:[#allocation99_spill] sm:$0xff] %v4955_v0  ;;  %6658 = vst [vmem:[#allocation100_spill] sm:$0xff] %v4958_v53  ;;  %v4961_v18 = vadd.f32 %v978_v20, %v4884_v12  ;;  %v4964_v10 = vadd.f32 %v1049_v11, %v4900_v44  ;;  %v4013_v53 = vmul.f32 -1.442695, %v945_v45  ;;  %v208_v20 = vsub.s32 4, %v4873_v2 }
 0x13d   :  { %v980_v43 = vpop.f32.mrf.mxu0  ;;  %v1051_v54 = vpop.f32.mrf.mxu1  ;;  %v4014_v0 = vmul.f32 -1.442695, %v947_v57  ;;  %v216_v11 = vsub.s32 6, %v4873_v2 }
 0x13e   :  { %6659 = vst [vmem:[#allocation101_spill] sm:$0xff] %v4961_v18  ;;  %6660 = vst [vmem:[#allocation102_spill] sm:$0xff] %v4964_v10  ;;  %v4966_v28 = vadd.f32 %v980_v43, %v197_v34  ;;  %v4969_v29 = vadd.f32 %v1051_v54, %v4906_v26  ;;  %4258 = vpow2.f32 %v4013_v53  ;;  %v212_v18 = vsub.s32 5, %v4873_v2 }
 0x13f   :  { %4260 = vpow2.f32 %v4014_v0  ;;  %v220_v43 = vsub.s32 7, %v4873_v2  ;;  %v4978_v54 = vrot.slane %v4879_v1, %v208_v20  ;;  %v4981_v34 = vrot.slane %v4879_v1, %v216_v11 }
 0x140   :  { %6661 = vst [vmem:[#allocation103_spill] sm:$0xff] %v4966_v28  ;;  %6662 = vst [vmem:[#allocation104_spill] sm:$0xff] %v4969_v29  ;;  %v4984_v52 = vrot.slane %v4879_v1, %v212_v18 }
 0x141   :  { %v4987_v0 = vrot.slane %v4879_v1, %v220_v43 }
 0x142   :  { %6663 = vst [vmem:[#allocation105_spill] sm:$0xff] %v4984_v52 }
 0x143   :  { %6664 = vst [vmem:[#allocation106_spill] sm:$0xff] %v4987_v0 }
 0x14b   :  { %v4259_v10 = vpop.eup %4258 }
 0x14c   :  { %v4261_v28 = vpop.eup %4260  ;;  %v1262_v29 = vadd.f32 1.0, %v4259_v10 }
 0x14d   :  { %v1263_v12 = vadd.f32 1.0, %v4261_v28 }
 0x14e   :  { %4262 = vrcp.f32 %v1262_v29 }
 0x15f   :  { %v1088_v9 = vpop.f32.mrf.mxu0  ;;  %v1161_v45 = vpop.f32.mrf.mxu1 }
 0x160   :  { %v1089_v53 = vadd.f32 %v1088_v9, %v4978_v54  ;;  %v1162_v2 = vadd.f32 %v1161_v45, %v4981_v34 }
 0x161   :  { %v1090_v57 = vpop.f32.mrf.mxu0  ;;  %v1163_v20 = vpop.f32.mrf.mxu1 }
 0x162   :  { %4264 = vtanh.f32 %v1089_v53  ;;  %v1091_v10 = vadd.f32 %v1090_v57, %v4984_v52  ;;  %v4015_v11 = vmul.f32 -1.442695, %v1162_v2  ;;  %v1164_v18 = vadd.f32 %v1163_v20, %v4987_v0 }
 0x163   :  { %4266 = vrcp.f32 %v1263_v12  ;;  %v1092_v28 = vpop.f32.mrf.mxu0  ;;  %v1165_v43 = vpop.f32.mrf.mxu1 }
 0x164   :  { %4268 = vtanh.f32 %v1091_v10  ;;  %v4994_v1 = vadd.f32 %v1092_v28, %v4978_v54  ;;  %v4016_v9 = vmul.f32 -1.442695, %v1164_v18  ;;  %v4997_v29 = vadd.f32 %v1165_v43, %v4981_v34 }
 0x165   :  { %4270 = vpow2.f32 %v4015_v11  ;;  %v1094_v45 = vpop.f32.mrf.mxu0  ;;  %v1167_v57 = vpop.f32.mrf.mxu1 }
 0x166   :  { %6665 = vst [vmem:[#allocation107_spill] sm:$0xff] %v4994_v1  ;;  %6666 = vst [vmem:[#allocation108_spill] sm:$0xff] %v4997_v29  ;;  %v5000_v53 = vadd.f32 %v1094_v45, %v4984_v52  ;;  %4272 = vpow2.f32 %v4016_v9  ;;  %v5003_v12 = vadd.f32 %v1167_v57, %v4987_v0 }
 0x167   :  { %v1098_v2 = vpop.f32.mrf.mxu0  ;;  %v1171_v20 = vpop.f32.mrf.mxu1 }
 0x168   :  { %6667 = vst [vmem:[#allocation109_spill] sm:$0xff] %v5000_v53  ;;  %6668 = vst [vmem:[#allocation110_spill] sm:$0xff] %v5003_v12  ;;  %v5006_v10 = vadd.f32 %v1098_v2, %v4978_v54  ;;  %v5009_v11 = vadd.f32 %v1171_v20, %v4981_v34  ;;  %v4263_v12 = vpop.eup %4262 }
 0x169   :  { %v1100_v18 = vpop.f32.mrf.mxu0  ;;  %v1173_v43 = vpop.f32.mrf.mxu1 }
 0x16a   :  { %6669 = vst [vmem:[#allocation111_spill] sm:$0xff] %v5006_v10  ;;  %6670 = vst [vmem:[#allocation112_spill] sm:$0xff] %v5009_v11  ;;  %v5012_v28 = vadd.f32 %v1100_v18, %v4984_v52  ;;  %v5015_v45 = vadd.f32 %v1173_v43, %v4987_v0 }
 0x16b   :  { %v1102_v9 = vpop.f32.mrf.mxu0  ;;  %v1175_v14 = vpop.f32.mrf.mxu1 }
 0x16c   :  { %6671 = vst [vmem:[#allocation113_spill] sm:$0xff] %v5012_v28  ;;  %6672 = vst [vmem:[#allocation114_spill] sm:$0xff] %v5015_v45  ;;  %v5018_v57 = vadd.f32 %v1102_v9, %v4978_v54  ;;  %v5021_v2 = vadd.f32 %v1175_v14, %v4981_v34 }
 0x16d   :  { %v1104_v10 = vpop.f32.mrf.mxu0  ;;  %v1177_v11 = vpop.f32.mrf.mxu1 }
 0x16e   :  { %6673 = vst [vmem:[#allocation115_spill] sm:$0xff] %v5018_v57  ;;  %6674 = vst [vmem:[#allocation116_spill] sm:$0xff] %v5021_v2  ;;  %v5024_v20 = vadd.f32 %v1104_v10, %v4984_v52  ;;  %v5027_v28 = vadd.f32 %v1177_v11, %v4987_v0 }
 0x16f   :  { %v4265_v18 = vpop.eup %4264  ;;  %v1108_v43 = vpop.f32.mrf.mxu0 }
 0x170   :  { %6675 = vst [vmem:[#allocation117_spill] sm:$0xff] %v5024_v20  ;;  %6676 = vst [vmem:[#allocation118_spill] sm:$0xff] %v5027_v28  ;;  %v4267_v45 = vpop.eup %4266  ;;  %v5029_v53 = vmul.f32 %v4265_v18, %v4263_v12  ;;  %v5032_v9 = vadd.f32 %v1108_v43, %v4978_v54  ;;  %v1181_v57 = vpop.f32.mrf.mxu1 }
 0x171   :  { %v4269_v14 = vpop.eup %4268  ;;  %v5035_v2 = vadd.f32 %v1181_v57, %v4981_v34  ;;  %v1110_v29 = vpop.f32.mrf.mxu0 }
 0x172   :  { %6677 = vst [vmem:[#allocation119_spill] sm:$0xff] %v5029_v53  ;;  %6678 = vst [vmem:[#allocation120_spill] sm:$0xff] %v5032_v9  ;;  %v4271_v10 = vpop.eup %4270  ;;  %v5037_v20 = vmul.f32 %v4269_v14, %v4267_v45  ;;  %v5040_v1 = vadd.f32 %v1110_v29, %v4984_v52  ;;  %v1183_v11 = vpop.f32.mrf.mxu1  ;;  %4274 = vtanh.f32 %v5029_v53  ;;  %v1333_v53 = vld [vmem:[#allocation5 + $0x118] sm:$0xff] }
 0x173   :  { %6679 = vst [vmem:[#allocation121_spill] sm:$0xff] %v5035_v2  ;;  %v1278_v28 = vadd.f32 1.0, %v4271_v10  ;;  %v5043_v12 = vadd.f32 %v1183_v11, %v4987_v0  ;;  %v1112_v18 = vpop.f32.mrf.mxu0  ;;  %v4273_v43 = vpop.eup %4272 }
 0x174   :  { %6680 = vst [vmem:[#allocation122_spill] sm:$0xff] %v5037_v20  ;;  %6681 = vst [vmem:[#allocation123_spill] sm:$0xff] %v5040_v1  ;;  %v5047_v9 = vadd.f32 %v1112_v18, %v4978_v54  ;;  %v1185_v57 = vpop.f32.mrf.mxu1  ;;  %v1279_v2 = vadd.f32 1.0, %v4273_v43 }
 0x175   :  { %6682 = vst [vmem:[#allocation124_spill] sm:$0xff] %v5043_v12  ;;  %4276 = vrcp.f32 %v1278_v28  ;;  %v5050_v45 = vadd.f32 %v1185_v57, %v4981_v34  ;;  %v1114_v29 = vpop.f32.mrf.mxu0 }
 0x176   :  { %6683 = vst [vmem:[#allocation125_spill] sm:$0xff] %v5047_v9  ;;  %4278 = vtanh.f32 %v5037_v20  ;;  %v5054_v14 = vadd.f32 %v1114_v29, %v4984_v52  ;;  %v1187_v10 = vpop.f32.mrf.mxu1  ;;  %v1336_v20 = vld [vmem:[#allocation5 + $0x130] sm:$0xff] }
 0x177   :  { %6684 = vst [vmem:[#allocation126_spill] sm:$0xff] %v5050_v45  ;;  %4280 = vrcp.f32 %v1279_v2  ;;  %v5057_v11 = vadd.f32 %v1187_v10, %v4987_v0  ;;  %v1118_v12 = vpop.f32.mrf.mxu0 }
 0x178   :  { %6685 = vst [vmem:[#allocation127_spill] sm:$0xff] %v5054_v14  ;;  %v5060_v18 = vadd.f32 %v1118_v12, %v4978_v54  ;;  %v1191_v28 = vpop.f32.mrf.mxu1 }
 0x179   :  { %6686 = vst [vmem:[#allocation128_spill] sm:$0xff] %v5057_v11  ;;  %v5063_v43 = vadd.f32 %v1191_v28, %v4981_v34  ;;  %v1120_v57 = vpop.f32.mrf.mxu0 }
 0x17a   :  { %6687 = vst [vmem:[#allocation129_spill] sm:$0xff] %v5060_v18  ;;  %v5066_v45 = vadd.f32 %v1120_v57, %v4984_v52  ;;  %v1193_v9 = vpop.f32.mrf.mxu1  ;;  %v1348_v52 = vld [vmem:[#allocation5 + $0x190] sm:$0xff] }
 0x17b   :  { %6688 = vst [vmem:[#allocation130_spill] sm:$0xff] %v5063_v43  ;;  %v5069_v29 = vadd.f32 %v1193_v9, %v4987_v0  ;;  %v1122_v2 = vpop.f32.mrf.mxu0  ;;  %v1349_v9 = vld [vmem:[#allocation5 + $0x198] sm:$0xff] }
 0x17c   :  { %6689 = vst [vmem:[#allocation131_spill] sm:$0xff] %v5066_v45  ;;  %v5072_v10 = vadd.f32 %v1122_v2, %v4978_v54  ;;  %v1195_v11 = vpop.f32.mrf.mxu1  ;;  %v1352_v45 = vld [vmem:[#allocation5 + $0x1b0] sm:$0xff]  ;;  %v1353_v0 = vld [vmem:[#allocation5 + $0x1b8] sm:$0xff] }
 0x17d   :  { %6690 = vst [vmem:[#allocation132_spill] sm:$0xff] %v5069_v29  ;;  %v5075_v12 = vadd.f32 %v1195_v11, %v4981_v34  ;;  %v1340_v34 = vld [vmem:[#allocation5 + $0x150] sm:$0xff]  ;;  %v5087_v11 = vcombine.high %v1348_v52, %v1352_v45 }
 0x17e   :  { %6691 = vst [vmem:[#allocation133_spill] sm:$0xff] %v5072_v10  ;;  %v5097_v10 = vcombine.low %v1349_v9, %v1353_v0 }
 0x17f   :  { %6692 = vst [vmem:[#allocation134_spill] sm:$0xff] %v5075_v12  ;;  %v4275_v18 = vpop.eup %4274  ;;  %6695 = vst [vmem:[#allocation137_spill] sm:$0xff] %v5087_v11  ;;  %v5095_v12 = vcombine.low %v1348_v52, %v1352_v45 }
 0x180   :  { %6698 = vst [vmem:[#allocation140_spill] sm:$0xff] %v5097_v10 }
 0x181   :  { %6697 = vst [vmem:[#allocation139_spill] sm:$0xff] %v5095_v12 }
 0x182   :  { %v4277_v14 = vpop.eup %4276 }
 0x183   :  { %v4279_v28 = vpop.eup %4278  ;;  %v5077_v1 = vmul.f32 %v4277_v14, %v4275_v18  ;;  %v5089_v14 = vcombine.high %v1349_v9, %v1353_v0  ;;  %v1344_v18 = vld [vmem:[#allocation5 + $0x170] sm:$0xff] }
 0x184   :  { %v4281_v43 = vpop.eup %4280  ;;  %v5099_v29 = vcombine.high %v1340_v34, %v1344_v18  ;;  %v5107_v52 = vcombine.low %v1340_v34, %v1344_v18 }
 0x185   :  { %6693 = vst [vmem:[#allocation135_spill] sm:$0xff] %v5077_v1  ;;  %v5079_v57 = vmul.f32 %v4281_v43, %v4279_v28  ;;  %v5085_v2 = vpack.c.bf16 %v5077_v1, %v5077_v1  ;;  %6696 = vst [vmem:[#allocation138_spill] sm:$0xff] %v5089_v14  ;;  %v1341_v43 = vld [vmem:[#allocation5 + $0x158] sm:$0xff]  ;;  %v1332_v1 = vld [vmem:[#allocation5 + $0x110] sm:$0xff] }
 0x186   :  { %v1345_v28 = vld [vmem:[#allocation5 + $0x178] sm:$0xff]  ;;  %6699 = vst [vmem:[#allocation141_spill] sm:$0xff] %v5099_v29  ;;  %6701 = vst [vmem:[#allocation143_spill] sm:$0xff] %v5107_v52  ;;  %v5113_v45 = vcombine.high %v1332_v1, %v1336_v20  ;;  %v5119_v34 = vcombine.low %v1332_v1, %v1336_v20 }
 0x187   :  { %6694 = vst [vmem:[#allocation136_spill] sm:$0xff] %v5079_v57  ;;  %v1297_v54 = vpack.c.bf16 %v5079_v57, %v5079_v57  ;;  %v5101_v57 = vcombine.high %v1341_v43, %v1345_v28  ;;  %v5109_v0 = vcombine.low %v1341_v43, %v1345_v28 }
 0x188   :  { %6703 = vst [vmem:[#allocation145_spill] sm:$0xff] %v5113_v45  ;;  %6705 = vst [vmem:[#allocation147_spill] sm:$0xff] %v5119_v34 }
 0x189   :  { %2098 = vmatprep.mubr.bf16.mxu0 %v1297_v54  ;;  %2139 = vmatprep.mubr.bf16.mxu1 %v1297_v54  ;;  %6700 = vst [vmem:[#allocation142_spill] sm:$0xff] %v5101_v57  ;;  %6702 = vst [vmem:[#allocation144_spill] sm:$0xff] %v5109_v0 }
 0x18a   :  { %2099 = vmatmul.mubr.bf16.vlgmr.msra.gmra.mxu0 %v5085_v2  ;;  %2140 = vmatmul.mubr.bf16.vlgmr.msra.gmra.mxu1 %v5085_v2 }
 0x18b   :  { %2149 = vmatpush1.bf16.msra.mxu0 %v4867_v31  ;;  %2190 = vmatpush1.bf16.msra.mxu1 %v4870_v5  ;;  %v1337_v31 = vld [vmem:[#allocation5 + $0x138] sm:$0xff] }
 0x18c   :  { %2180 = vmatprep.mubr.bf16.mxu0 %v1297_v54  ;;  %2221 = vmatprep.mubr.bf16.mxu1 %v1297_v54  ;;  %v5115_v9 = vcombine.high %v1333_v53, %v1337_v31  ;;  %v1324_v54 = vld [vmem:[#allocation5 + $0xd0] sm:$0xff]  ;;  %v1329_v5 = vld [vmem:[#allocation5 + $0xf8] sm:$0xff]  ;;  %v5121_v18 = vcombine.low %v1333_v53, %v1337_v31 }
 0x18d   :  { %2150 = vmatprep.subr.bf16.mxu0 %v5087_v11  ;;  %2191 = vmatprep.subr.bf16.mxu1 %v5089_v14  ;;  %v1328_v14 = vld [vmem:[#allocation5 + $0xf0] sm:$0xff]  ;;  %v1325_v11 = vld [vmem:[#allocation5 + $0xd8] sm:$0xff] }
 0x18e   :  { %6704 = vst [vmem:[#allocation146_spill] sm:$0xff] %v5115_v9  ;;  %6706 = vst [vmem:[#allocation148_spill] sm:$0xff] %v5121_v18  ;;  %v5125_v43 = vcombine.high %v1324_v54, %v1328_v14  ;;  %v5127_v28 = vcombine.high %v1325_v11, %v1329_v5  ;;  %v5131_v1 = vcombine.low %v1324_v54, %v1328_v14 }
 0x18f   :  { %2151 = vmatpush1.bf16.msra.mxu0 %v5095_v12  ;;  %2192 = vmatpush1.bf16.msra.mxu1 %v5097_v10  ;;  %v1317_v10 = vld [vmem:[#allocation5 + $0x98] sm:$0xff]  ;;  %v5133_v31 = vcombine.low %v1325_v11, %v1329_v5 }
 0x190   :  { %2152 = vmatprep.subr.bf16.mxu0 %v5099_v29  ;;  %2193 = vmatprep.subr.bf16.mxu1 %v5101_v57  ;;  %6707 = vst [vmem:[#allocation149_spill] sm:$0xff] %v5125_v43  ;;  %6708 = vst [vmem:[#allocation150_spill] sm:$0xff] %v5127_v28  ;;  %v1316_v57 = vld [vmem:[#allocation5 + $0x90] sm:$0xff]  ;;  %v1321_v12 = vld [vmem:[#allocation5 + $0xb8] sm:$0xff] }
 0x191   :  { %v1320_v29 = vld [vmem:[#allocation5 + $0xb0] sm:$0xff]  ;;  %6709 = vst [vmem:[#allocation151_spill] sm:$0xff] %v5131_v1  ;;  %6710 = vst [vmem:[#allocation152_spill] sm:$0xff] %v5133_v31  ;;  %v5139_v20 = vcombine.high %v1317_v10, %v1321_v12  ;;  %v5145_v5 = vcombine.low %v1317_v10, %v1321_v12 }
 0x192   :  { %v5137_v53 = vcombine.high %v1316_v57, %v1320_v29  ;;  %v5143_v14 = vcombine.low %v1316_v57, %v1320_v29 }
 0x193   :  { %2153 = vmatpush1.bf16.msra.mxu0 %v5107_v52  ;;  %2194 = vmatpush1.bf16.msra.mxu1 %v5109_v0  ;;  %6712 = vst [vmem:[#allocation154_spill] sm:$0xff] %v5139_v20  ;;  %v1309_v0 = vld [vmem:[#allocation5 + $0x58] sm:$0xff]  ;;  %6714 = vst [vmem:[#allocation156_spill] sm:$0xff] %v5145_v5 }
 0x194   :  { %2154 = vmatprep.subr.bf16.mxu0 %v5113_v45  ;;  %2195 = vmatprep.subr.bf16.mxu1 %v5115_v9  ;;  %6711 = vst [vmem:[#allocation153_spill] sm:$0xff] %v5137_v53  ;;  %v1308_v9 = vld [vmem:[#allocation5 + $0x50] sm:$0xff]  ;;  %v1313_v52 = vld [vmem:[#allocation5 + $0x78] sm:$0xff]  ;;  %6713 = vst [vmem:[#allocation155_spill] sm:$0xff] %v5143_v14 }
 0x195   :  { %v1312_v45 = vld [vmem:[#allocation5 + $0x70] sm:$0xff]  ;;  %v5151_v54 = vcombine.high %v1309_v0, %v1313_v52  ;;  %v5157_v10 = vcombine.low %v1309_v0, %v1313_v52 }
 0x196   :  { %v5149_v11 = vcombine.high %v1308_v9, %v1312_v45  ;;  %v5155_v29 = vcombine.low %v1308_v9, %v1312_v45 }
 0x197   :  { %2155 = vmatpush1.bf16.msra.mxu0 %v5119_v34  ;;  %2196 = vmatpush1.bf16.msra.mxu1 %v5121_v18  ;;  %6716 = vst [vmem:[#allocation158_spill] sm:$0xff] %v5151_v54  ;;  %v1301_v18 = vld [vmem:[#allocation5 + $0x18] sm:$0xff]  ;;  %6718 = vst [vmem:[#allocation160_spill] sm:$0xff] %v5157_v10 }
 0x198   :  { %2156 = vmatprep.subr.bf16.mxu0 %v5125_v43  ;;  %2197 = vmatprep.subr.bf16.mxu1 %v5127_v28  ;;  %6715 = vst [vmem:[#allocation157_spill] sm:$0xff] %v5149_v11  ;;  %v1300_v28 = vld [vmem:[#allocation5 + $0x10] sm:$0xff]  ;;  %v1305_v34 = vld [vmem:[#allocation5 + $0x38] sm:$0xff]  ;;  %6717 = vst [vmem:[#allocation159_spill] sm:$0xff] %v5155_v29 }
 0x199   :  { %v1304_v43 = vld [vmem:[#allocation5 + $0x30] sm:$0xff]  ;;  %v5163_v57 = vcombine.high %v1301_v18, %v1305_v34  ;;  %v5169_v52 = vcombine.low %v1301_v18, %v1305_v34 }
 0x19a   :  { %v5161_v12 = vcombine.high %v1300_v28, %v1304_v43  ;;  %v5167_v45 = vcombine.low %v1300_v28, %v1304_v43 }
 0x19b   :  { %2157 = vmatpush1.bf16.msra.mxu0 %v5131_v1  ;;  %2198 = vmatpush1.bf16.msra.mxu1 %v5133_v31  ;;  %6720 = vst [vmem:[#allocation162_spill] sm:$0xff] %v5163_v57  ;;  %v1421_v31 = vld [vmem:[#allocation5 + $0x3d8] sm:$0xff]  ;;  %6722 = vst [vmem:[#allocation164_spill] sm:$0xff] %v5169_v52 }
 0x19c   :  { %2158 = vmatprep.subr.bf16.mxu0 %v5137_v53  ;;  %2199 = vmatprep.subr.bf16.mxu1 %v5139_v20  ;;  %6719 = vst [vmem:[#allocation161_spill] sm:$0xff] %v5161_v12  ;;  %v1420_v20 = vld [vmem:[#allocation5 + $0x3d0] sm:$0xff]  ;;  %v1425_v1 = vld [vmem:[#allocation5 + $0x3f8] sm:$0xff]  ;;  %6721 = vst [vmem:[#allocation163_spill] sm:$0xff] %v5167_v45 }
 0x19d   :  { %v1424_v53 = vld [vmem:[#allocation5 + $0x3f0] sm:$0xff]  ;;  %v5175_v9 = vcombine.high %v1421_v31, %v1425_v1  ;;  %v5181_v34 = vcombine.low %v1421_v31, %v1425_v1 }
 0x19e   :  { %v5173_v0 = vcombine.high %v1420_v20, %v1424_v53  ;;  %v5179_v43 = vcombine.low %v1420_v20, %v1424_v53 }
 0x19f   :  { %2159 = vmatpush1.bf16.msra.mxu0 %v5143_v14  ;;  %2200 = vmatpush1.bf16.msra.mxu1 %v5145_v5  ;;  %6724 = vst [vmem:[#allocation166_spill] sm:$0xff] %v5175_v9  ;;  %v1413_v5 = vld [vmem:[#allocation5 + $0x398] sm:$0xff]  ;;  %6726 = vst [vmem:[#allocation168_spill] sm:$0xff] %v5181_v34 }
 0x1a0   :  { %2160 = vmatprep.subr.bf16.mxu0 %v5149_v11  ;;  %2201 = vmatprep.subr.bf16.mxu1 %v5151_v54  ;;  %6723 = vst [vmem:[#allocation165_spill] sm:$0xff] %v5173_v0  ;;  %v1412_v54 = vld [vmem:[#allocation5 + $0x390] sm:$0xff]  ;;  %v1417_v14 = vld [vmem:[#allocation5 + $0x3b8] sm:$0xff]  ;;  %6725 = vst [vmem:[#allocation167_spill] sm:$0xff] %v5179_v43 }
 0x1a1   :  { %v1416_v11 = vld [vmem:[#allocation5 + $0x3b0] sm:$0xff]  ;;  %v5187_v28 = vcombine.high %v1413_v5, %v1417_v14  ;;  %v5193_v1 = vcombine.low %v1413_v5, %v1417_v14 }
 0x1a2   :  { %v5185_v18 = vcombine.high %v1412_v54, %v1416_v11  ;;  %v5191_v53 = vcombine.low %v1412_v54, %v1416_v11 }
 0x1a3   :  { %2161 = vmatpush1.bf16.msra.mxu0 %v5155_v29  ;;  %2202 = vmatpush1.bf16.msra.mxu1 %v5157_v10  ;;  %6728 = vst [vmem:[#allocation170_spill] sm:$0xff] %v5187_v28  ;;  %v1405_v10 = vld [vmem:[#allocation5 + $0x358] sm:$0xff]  ;;  %6730 = vst [vmem:[#allocation172_spill] sm:$0xff] %v5193_v1 }
 0x1a4   :  { %2162 = vmatprep.subr.bf16.mxu0 %v5161_v12  ;;  %2203 = vmatprep.subr.bf16.mxu1 %v5163_v57  ;;  %6727 = vst [vmem:[#allocation169_spill] sm:$0xff] %v5185_v18  ;;  %v1404_v57 = vld [vmem:[#allocation5 + $0x350] sm:$0xff]  ;;  %v1409_v29 = vld [vmem:[#allocation5 + $0x378] sm:$0xff]  ;;  %6729 = vst [vmem:[#allocation171_spill] sm:$0xff] %v5191_v53 }
 0x1a5   :  { %v1408_v12 = vld [vmem:[#allocation5 + $0x370] sm:$0xff]  ;;  %v5199_v20 = vcombine.high %v1405_v10, %v1409_v29  ;;  %v5205_v14 = vcombine.low %v1405_v10, %v1409_v29 }
 0x1a6   :  { %v5197_v31 = vcombine.high %v1404_v57, %v1408_v12  ;;  %v5203_v11 = vcombine.low %v1404_v57, %v1408_v12 }
 0x1a7   :  { %2163 = vmatpush1.bf16.msra.mxu0 %v5167_v45  ;;  %2204 = vmatpush1.bf16.msra.mxu1 %v5169_v52  ;;  %6732 = vst [vmem:[#allocation174_spill] sm:$0xff] %v5199_v20  ;;  %v1397_v52 = vld [vmem:[#allocation5 + $0x318] sm:$0xff]  ;;  %6734 = vst [vmem:[#allocation176_spill] sm:$0xff] %v5205_v14 }
 0x1a8   :  { %2164 = vmatprep.subr.bf16.mxu0 %v5173_v0  ;;  %2205 = vmatprep.subr.bf16.mxu1 %v5175_v9  ;;  %6731 = vst [vmem:[#allocation173_spill] sm:$0xff] %v5197_v31  ;;  %v1396_v9 = vld [vmem:[#allocation5 + $0x310] sm:$0xff]  ;;  %v1401_v45 = vld [vmem:[#allocation5 + $0x338] sm:$0xff]  ;;  %6733 = vst [vmem:[#allocation175_spill] sm:$0xff] %v5203_v11 }
 0x1a9   :  { %v1400_v0 = vld [vmem:[#allocation5 + $0x330] sm:$0xff]  ;;  %v5211_v54 = vcombine.high %v1397_v52, %v1401_v45  ;;  %v5217_v29 = vcombine.low %v1397_v52, %v1401_v45 }
 0x1aa   :  { %v5209_v5 = vcombine.high %v1396_v9, %v1400_v0  ;;  %v5215_v12 = vcombine.low %v1396_v9, %v1400_v0 }
 0x1ab   :  { %2165 = vmatpush2.bf16.msra.mxu0 %v5179_v43  ;;  %2206 = vmatpush2.bf16.msra.mxu1 %v5181_v34  ;;  %6736 = vst [vmem:[#allocation178_spill] sm:$0xff] %v5211_v54  ;;  %v1389_v34 = vld [vmem:[#allocation5 + $0x2d8] sm:$0xff]  ;;  %6738 = vst [vmem:[#allocation180_spill] sm:$0xff] %v5217_v29 }
 0x1ac   :  { %2166 = vmatprep.subr.bf16.mxu0 %v5185_v18  ;;  %2207 = vmatprep.subr.bf16.mxu1 %v5187_v28  ;;  %6735 = vst [vmem:[#allocation177_spill] sm:$0xff] %v5209_v5  ;;  %v1388_v28 = vld [vmem:[#allocation5 + $0x2d0] sm:$0xff]  ;;  %v1393_v43 = vld [vmem:[#allocation5 + $0x2f8] sm:$0xff]  ;;  %6737 = vst [vmem:[#allocation179_spill] sm:$0xff] %v5215_v12 }
 0x1ad   :  { %v1392_v18 = vld [vmem:[#allocation5 + $0x2f0] sm:$0xff]  ;;  %v5223_v57 = vcombine.high %v1389_v34, %v1393_v43  ;;  %v5229_v45 = vcombine.low %v1389_v34, %v1393_v43 }
 0x1ae   :  { %v5221_v10 = vcombine.high %v1388_v28, %v1392_v18  ;;  %v5227_v0 = vcombine.low %v1388_v28, %v1392_v18 }
 0x1af   :  { %2167 = vmatpush2.bf16.msra.mxu0 %v5191_v53  ;;  %2208 = vmatpush2.bf16.msra.mxu1 %v5193_v1  ;;  %6740 = vst [vmem:[#allocation182_spill] sm:$0xff] %v5223_v57  ;;  %v1381_v1 = vld [vmem:[#allocation5 + $0x298] sm:$0xff]  ;;  %6742 = vst [vmem:[#allocation184_spill] sm:$0xff] %v5229_v45 }
 0x1b0   :  { %2168 = vmatprep.subr.bf16.mxu0 %v5197_v31  ;;  %2209 = vmatprep.subr.bf16.mxu1 %v5199_v20  ;;  %6739 = vst [vmem:[#allocation181_spill] sm:$0xff] %v5221_v10  ;;  %v1380_v20 = vld [vmem:[#allocation5 + $0x290] sm:$0xff]  ;;  %v1385_v53 = vld [vmem:[#allocation5 + $0x2b8] sm:$0xff]  ;;  %6741 = vst [vmem:[#allocation183_spill] sm:$0xff] %v5227_v0 }
 0x1b1   :  { %v1384_v31 = vld [vmem:[#allocation5 + $0x2b0] sm:$0xff]  ;;  %v5235_v9 = vcombine.high %v1381_v1, %v1385_v53  ;;  %v5241_v43 = vcombine.low %v1381_v1, %v1385_v53 }
 0x1b2   :  { %v5233_v52 = vcombine.high %v1380_v20, %v1384_v31  ;;  %v5239_v18 = vcombine.low %v1380_v20, %v1384_v31 }
 0x1b3   :  { %2169 = vmatpush2.bf16.msra.mxu0 %v5203_v11  ;;  %2210 = vmatpush2.bf16.msra.mxu1 %v5205_v14  ;;  %6744 = vst [vmem:[#allocation186_spill] sm:$0xff] %v5235_v9  ;;  %v1373_v14 = vld [vmem:[#allocation5 + $0x258] sm:$0xff]  ;;  %6746 = vst [vmem:[#allocation188_spill] sm:$0xff] %v5241_v43 }
 0x1b4   :  { %2170 = vmatprep.subr.bf16.mxu0 %v5209_v5  ;;  %2211 = vmatprep.subr.bf16.mxu1 %v5211_v54  ;;  %6743 = vst [vmem:[#allocation185_spill] sm:$0xff] %v5233_v52  ;;  %v1372_v54 = vld [vmem:[#allocation5 + $0x250] sm:$0xff]  ;;  %v1377_v11 = vld [vmem:[#allocation5 + $0x278] sm:$0xff]  ;;  %6745 = vst [vmem:[#allocation187_spill] sm:$0xff] %v5239_v18 }
 0x1b5   :  { %v1376_v5 = vld [vmem:[#allocation5 + $0x270] sm:$0xff]  ;;  %v5247_v28 = vcombine.high %v1373_v14, %v1377_v11  ;;  %v5253_v53 = vcombine.low %v1373_v14, %v1377_v11  ;;  %v6757_v14 = vld [vmem:[#allocation52_spill] sm:$0xff] }
 0x1b6   :  { %v5245_v34 = vcombine.high %v1372_v54, %v1376_v5  ;;  %v5251_v31 = vcombine.low %v1372_v54, %v1376_v5  ;;  %v6756_v11 = vld [vmem:[#allocation51_spill] sm:$0xff]  ;;  %v6758_v5 = vld [vmem:[#allocation53_spill] sm:$0xff]  ;;  %v6759_v54 = vld [vmem:[#allocation54_spill] sm:$0xff] }
 0x1b7   :  { %2171 = vmatpush2.bf16.msra.mxu0 %v5215_v12  ;;  %2212 = vmatpush2.bf16.msra.mxu1 %v5217_v29  ;;  %6748 = vst [vmem:[#allocation190_spill] sm:$0xff] %v5247_v28  ;;  %v1365_v29 = vld [vmem:[#allocation5 + $0x218] sm:$0xff]  ;;  %6750 = vst [vmem:[#allocation192_spill] sm:$0xff] %v5253_v53 }
 0x1b8   :  { %2172 = vmatprep.subr.bf16.mxu0 %v5221_v10  ;;  %2213 = vmatprep.subr.bf16.mxu1 %v5223_v57  ;;  %6747 = vst [vmem:[#allocation189_spill] sm:$0xff] %v5245_v34  ;;  %v1364_v57 = vld [vmem:[#allocation5 + $0x210] sm:$0xff]  ;;  %v1369_v12 = vld [vmem:[#allocation5 + $0x238] sm:$0xff]  ;;  %6749 = vst [vmem:[#allocation191_spill] sm:$0xff] %v5251_v31 }
 0x1b9   :  { %v1368_v10 = vld [vmem:[#allocation5 + $0x230] sm:$0xff]  ;;  %v5259_v20 = vcombine.high %v1365_v29, %v1369_v12 }
 0x1ba   :  { %v5257_v1 = vcombine.high %v1364_v57, %v1368_v10 }
 0x1bb   :  { %2173 = vmatpush2.bf16.msra.mxu0 %v5227_v0  ;;  %2214 = vmatpush2.bf16.msra.mxu1 %v5229_v45  ;;  %6752 = vst [vmem:[#allocation194_spill] sm:$0xff] %v5259_v20 }
 0x1bc   :  { %2174 = vmatprep.subr.bf16.mxu0 %v5233_v52  ;;  %2215 = vmatprep.subr.bf16.mxu1 %v5235_v9  ;;  %6751 = vst [vmem:[#allocation193_spill] sm:$0xff] %v5257_v1  ;;  %v5263_v9 = vcombine.low %v1364_v57, %v1368_v10  ;;  %v6762_v10 = vld [vmem:[#allocation57_spill] sm:$0xff]  ;;  %v6763_v57 = vld [vmem:[#allocation59_spill] sm:$0xff] }
 0x1be   :  { %6753 = vst [vmem:[#allocation195_spill] sm:$0xff] %v5263_v9 }
 0x1bf   :  { %2175 = vmatpush2.bf16.msra.mxu0 %v5239_v18  ;;  %2216 = vmatpush2.bf16.msra.mxu1 %v5241_v43  ;;  %v5265_v18 = vcombine.low %v1365_v29, %v1369_v12  ;;  %v6760_v12 = vld [vmem:[#allocation55_spill] sm:$0xff]  ;;  %v6761_v29 = vld [vmem:[#allocation56_spill] sm:$0xff] }
 0x1c0   :  { %2176 = vmatprep.subr.bf16.mxu0 %v5245_v34  ;;  %2217 = vmatprep.subr.bf16.mxu1 %v5247_v28 }
 0x1c1   :  { %6754 = vst [vmem:[#allocation196_spill] sm:$0xff] %v5265_v18 }
 0x1c3   :  { %2177 = vmatpush2.bf16.msra.mxu0 %v5251_v31  ;;  %2218 = vmatpush2.bf16.msra.mxu1 %v5253_v53 }
 0x1c4   :  { %2178 = vmatprep.subr.bf16.mxu0 %v5257_v1  ;;  %2219 = vmatprep.subr.bf16.mxu1 %v5259_v20 }
 0x1c7   :  { %2179 = vmatpush2.bf16.msra.mxu0 %v5263_v9  ;;  %2220 = vmatpush2.bf16.msra.mxu1 %v5265_v18 }
 0x1c8   :  { %2298 = vmatprep.subr.bf16.mxu0 %v4669_v19  ;;  %2339 = vmatprep.subr.bf16.mxu1 %v4674_v37 }
 0x1ca   :  { %2181 = vmatmul.mubr.bf16.vlgmr.msra.gmra.mxu0 %v5085_v2  ;;  %2222 = vmatmul.mubr.bf16.vlgmr.msra.gmra.mxu1 %v5085_v2  ;;  %v6755_v2 = vld [vmem:[#allocation50_spill] sm:$0xff] }
 0x1cb   :  { %2299 = vmatpush1.bf16.msra.mxu0 %v4671_v22  ;;  %2340 = vmatpush1.bf16.msra.mxu1 %v4676_v24 }
 0x1cc   :  { %2300 = vmatprep.subr.bf16.mxu0 %v4678_v49  ;;  %2341 = vmatprep.subr.bf16.mxu1 %v4682_v27 }
 0x1cf   :  { %2301 = vmatpush1.bf16.msra.mxu0 %v4686_v32  ;;  %2342 = vmatpush1.bf16.msra.mxu1 %v4690_v33 }
 0x1d0   :  { %2302 = vmatprep.subr.bf16.mxu0 %v4692_v4  ;;  %2343 = vmatprep.subr.bf16.mxu1 %v4695_v56 }
 0x1d3   :  { %2303 = vmatpush1.bf16.msra.mxu0 %v4698_v39  ;;  %2344 = vmatpush1.bf16.msra.mxu1 %v4702_v40 }
 0x1d4   :  { %2304 = vmatprep.subr.bf16.mxu0 %v4704_v41  ;;  %2345 = vmatprep.subr.bf16.mxu1 %v4707_v42 }
 0x1d7   :  { %2305 = vmatpush1.bf16.msra.mxu0 %v4710_v47  ;;  %2346 = vmatpush1.bf16.msra.mxu1 %v4714_v48 }
 0x1d8   :  { %2306 = vmatprep.subr.bf16.mxu0 %v4716_v50  ;;  %2347 = vmatprep.subr.bf16.mxu1 %v4719_v51 }
 0x1db   :  { %2307 = vmatpush1.bf16.msra.mxu0 %v4722_v58  ;;  %2348 = vmatpush1.bf16.msra.mxu1 %v4726_v59 }
 0x1dc   :  { %2308 = vmatprep.subr.bf16.mxu0 %v4728_v60  ;;  %2349 = vmatprep.subr.bf16.mxu1 %v4731_v61 }
 0x1df   :  { %2309 = vmatpush1.bf16.msra.mxu0 %v4734_v62  ;;  %2350 = vmatpush1.bf16.msra.mxu1 %v4738_v63 }
 0x1e0   :  { %2310 = vmatprep.subr.bf16.mxu0 %v4743_v3  ;;  %2351 = vmatprep.subr.bf16.mxu1 %v4745_v6 }
 0x1e3   :  { %2311 = vmatpush1.bf16.msra.mxu0 %v4747_v7  ;;  %2352 = vmatpush1.bf16.msra.mxu1 %v4749_v8 }
 0x1e4   :  { %2312 = vmatprep.subr.bf16.mxu0 %v4755_v13  ;;  %2353 = vmatprep.subr.bf16.mxu1 %v4757_v15 }
 0x1e7   :  { %2313 = vmatpush1.bf16.msra.mxu0 %v4759_v16  ;;  %2354 = vmatpush1.bf16.msra.mxu1 %v4761_v17 }
 0x1e8   :  { %2314 = vmatprep.subr.bf16.mxu0 %v4767_v21  ;;  %2355 = vmatprep.subr.bf16.mxu1 %v4769_v23 }
 0x1eb   :  { %2315 = vmatpush2.bf16.msra.mxu0 %v4771_v25  ;;  %2356 = vmatpush2.bf16.msra.mxu1 %v4773_v55 }
 0x1ec   :  { %2316 = vmatprep.subr.bf16.mxu0 %v4779_v30  ;;  %2357 = vmatprep.subr.bf16.mxu1 %v4781_v35 }
 0x1ef   :  { %2317 = vmatpush2.bf16.msra.mxu0 %v4783_v36  ;;  %2358 = vmatpush2.bf16.msra.mxu1 %v4785_v38  ;;  %v6764_v38 = vld [vmem:[#allocation58_spill] sm:$0xff] }
 0x1f0   :  { %2318 = vmatprep.subr.bf16.mxu0 %v4791_v46  ;;  %2359 = vmatprep.subr.bf16.mxu1 %v6755_v2  ;;  %v6765_v46 = vld [vmem:[#allocation60_spill] sm:$0xff]  ;;  %v6766_v2 = vld [vmem:[#allocation61_spill] sm:$0xff] }
 0x1f3   :  { %2319 = vmatpush2.bf16.msra.mxu0 %v6756_v11  ;;  %2360 = vmatpush2.bf16.msra.mxu1 %v6757_v14  ;;  %v6767_v11 = vld [vmem:[#allocation62_spill] sm:$0xff]  ;;  %v6768_v14 = vld [vmem:[#allocation63_spill] sm:$0xff] }
 0x1f4   :  { %2320 = vmatprep.subr.bf16.mxu0 %v6758_v5  ;;  %2361 = vmatprep.subr.bf16.mxu1 %v6759_v54  ;;  %v6769_v5 = vld [vmem:[#allocation64_spill] sm:$0xff]  ;;  %v6770_v54 = vld [vmem:[#allocation65_spill] sm:$0xff] }
 0x1f7   :  { %2321 = vmatpush2.bf16.msra.mxu0 %v6760_v12  ;;  %2362 = vmatpush2.bf16.msra.mxu1 %v6761_v29  ;;  %v6771_v12 = vld [vmem:[#allocation66_spill] sm:$0xff]  ;;  %v6772_v29 = vld [vmem:[#allocation67_spill] sm:$0xff] }
 0x1f8   :  { %2322 = vmatprep.subr.bf16.mxu0 %v6762_v10  ;;  %2363 = vmatprep.subr.bf16.mxu1 %v6763_v57  ;;  %v6773_v10 = vld [vmem:[#allocation68_spill] sm:$0xff]  ;;  %v6774_v57 = vld [vmem:[#allocation69_spill] sm:$0xff] }
 0x1fb   :  { %2323 = vmatpush2.bf16.msra.mxu0 %v6764_v38  ;;  %2364 = vmatpush2.bf16.msra.mxu1 %v6765_v46  ;;  %v6775_v38 = vld [vmem:[#allocation70_spill] sm:$0xff]  ;;  %v6776_v46 = vld [vmem:[#allocation71_spill] sm:$0xff] }
 0x1fc   :  { %2324 = vmatprep.subr.bf16.mxu0 %v6766_v2  ;;  %2365 = vmatprep.subr.bf16.mxu1 %v6767_v11  ;;  %v6777_v2 = vld [vmem:[#allocation72_spill] sm:$0xff]  ;;  %v6778_v11 = vld [vmem:[#allocation73_spill] sm:$0xff] }
 0x1ff   :  { %2325 = vmatpush2.bf16.msra.mxu0 %v6768_v14  ;;  %2366 = vmatpush2.bf16.msra.mxu1 %v6769_v5  ;;  %v6779_v14 = vld [vmem:[#allocation74_spill] sm:$0xff]  ;;  %v5339_v5 = vpop.f32.mrf.mxu0 }
 0x200   :  { %2326 = vmatprep.subr.bf16.mxu0 %v6770_v54  ;;  %2367 = vmatprep.subr.bf16.mxu1 %v6771_v12  ;;  %6780 = vst [vmem:[#allocation197_spill] sm:$0xff] %v5339_v5  ;;  %v5341_v54 = vpop.f32.mrf.mxu1  ;;  %v6785_v5 = vld [vmem:[#allocation79_spill] sm:$0xff] }
 0x201   :  { %6781 = vst [vmem:[#allocation198_spill] sm:$0xff] %v5341_v54 }
 0x203   :  { %2327 = vmatpush2.bf16.msra.mxu0 %v6772_v29  ;;  %2368 = vmatpush2.bf16.msra.mxu1 %v6773_v10 }
 0x204   :  { %2328 = vmatprep.subr.bf16.mxu0 %v6774_v57  ;;  %2369 = vmatprep.subr.bf16.mxu1 %v6775_v38 }
 0x207   :  { %2329 = vmatpush2.bf16.msra.mxu0 %v6776_v46  ;;  %2370 = vmatpush2.bf16.msra.mxu1 %v6777_v2  ;;  %v6782_v46 = vld [vmem:[#allocation78_spill] sm:$0xff]  ;;  %v6783_v2 = vld [vmem:[#allocation77_spill] sm:$0xff] }
 0x208   :  { %2380 = vmatprep.subr.bf16.mxu0 %v6778_v11  ;;  %2421 = vmatprep.subr.bf16.mxu1 %v6779_v14  ;;  %v1020_v55 = vadd.f32 %v6782_v46, %v4900_v44  ;;  %v6784_v14 = vld [vmem:[#allocation80_spill] sm:$0xff] }
 0x209   :  { %v1022_v23 = vadd.f32 %v6784_v14, %v4906_v26 }
 0x24a   :  { %v2100_v12 = vpop.f32.mrf.mxu0  ;;  %v2141_v29 = vpop.f32.mrf.mxu1 }
 0x24b   :  { %v2230_v25 = vadd.f32 %v2100_v12, %v6783_v2  ;;  %v2232_v11 = vadd.f32 %v2141_v29, %v1020_v55  ;;  %v6789_v29 = vld [vmem:[#allocation110_spill] sm:$0xff] }
 0x24c   :  { %v2102_v36 = vpop.f32.mrf.mxu0  ;;  %v2143_v10 = vpop.f32.mrf.mxu1 }
 0x24d   :  { %v2231_v21 = vadd.f32 %v2102_v36, %v6785_v5  ;;  %v4145_v54 = vmul.f32 -1.442695, %v2230_v25  ;;  %v2233_v17 = vadd.f32 %v2143_v10, %v1022_v23  ;;  %v4147_v16 = vmul.f32 -1.442695, %v2232_v11  ;;  %v6786_v23 = vld [vmem:[#allocation107_spill] sm:$0xff]  ;;  %v6788_v5 = vld [vmem:[#allocation109_spill] sm:$0xff] }
 0x24e   :  { %v2104_v35 = vpop.f32.mrf.mxu0  ;;  %v2145_v57 = vpop.f32.mrf.mxu1 }
 0x24f   :  { %v4146_v15 = vmul.f32 -1.442695, %v2231_v21  ;;  %4282 = vpow2.f32 %v4145_v54  ;;  %v4148_v35 = vmul.f32 -1.442695, %v2233_v17  ;;  %v6787_v21 = vld [vmem:[#allocation108_spill] sm:$0xff] }
 0x250   :  { %v2105_v30 = vpop.f32.mrf.mxu0  ;;  %v2146_v38 = vpop.f32.mrf.mxu1  ;;  %4284 = vpow2.f32 %v4147_v16 }
 0x251   :  { %4286 = vpow2.f32 %v4146_v15 }
 0x252   :  { %4288 = vpow2.f32 %v4148_v35 }
 0x25c   :  { %v4283_v30 = vpop.eup %4282 }
 0x25d   :  { %v4285_v38 = vpop.eup %4284  ;;  %v2244_v44 = vadd.f32 1.0, %v4283_v30 }
 0x25e   :  { %v4287_v46 = vpop.eup %4286  ;;  %v2256_v55 = vadd.f32 1.0, %v4285_v38 }
 0x25f   :  { %v4289_v2 = vpop.eup %4288  ;;  %v2245_v12 = vadd.f32 1.0, %v4287_v46  ;;  %4290 = vrcp.f32 %v2244_v44 }
 0x260   :  { %v2257_v26 = vadd.f32 1.0, %v4289_v2  ;;  %4292 = vrcp.f32 %v2256_v55 }
 0x261   :  { %4294 = vrcp.f32 %v2245_v12 }
 0x26c   :  { %v4291_v44 = vpop.eup %4290 }
 0x26d   :  { %v4293_v2 = vpop.eup %4292 }
 0x26e   :  { %v4295_v55 = vpop.eup %4294 }
 0x28a   :  { %v2182_v14 = vpop.f32.mrf.mxu0  ;;  %v2223_v36 = vpop.f32.mrf.mxu1 }
 0x28b   :  { %v2234_v25 = vadd.f32 %v2182_v14, %v6786_v23  ;;  %v2236_v11 = vadd.f32 %v2223_v36, %v6787_v21  ;;  %v6790_v36 = vld [vmem:[#allocation119_spill] sm:$0xff] }
 0x28c   :  { %v2184_v16 = vpop.f32.mrf.mxu0  ;;  %v2225_v15 = vpop.f32.mrf.mxu1  ;;  %v2276_v23 = vmul.f32 %v4293_v2, %v6790_v36  ;;  %v6794_v36 = vld [vmem:[#allocation137_spill] sm:$0xff] }
 0x28d   :  { %4296 = vtanh.f32 %v2234_v25  ;;  %v4149_v17 = vmul.f32 -1.442695, %v2236_v11  ;;  %v2235_v54 = vadd.f32 %v2184_v16, %v6788_v5  ;;  %v2237_v10 = vadd.f32 %v2225_v15, %v6789_v29 }
 0x28e   :  { %4298 = vrcp.f32 %v2257_v26  ;;  %v2186_v57 = vpop.f32.mrf.mxu0  ;;  %v2227_v35 = vpop.f32.mrf.mxu1 }
 0x28f   :  { %4300 = vpow2.f32 %v4149_v17  ;;  %v4150_v30 = vmul.f32 -1.442695, %v2237_v10  ;;  %v6791_v17 = vld [vmem:[#allocation122_spill] sm:$0xff] }
 0x290   :  { %4302 = vtanh.f32 %v2235_v54  ;;  %v2187_v38 = vpop.f32.mrf.mxu0  ;;  %v2228_v46 = vpop.f32.mrf.mxu1 }
 0x291   :  { %4304 = vpow2.f32 %v4150_v30 }
 0x29a   :  { %v4297_v12 = vpop.eup %4296 }
 0x29b   :  { %v4299_v14 = vpop.eup %4298  ;;  %v2278_v25 = vmul.f32 %v4297_v12, %v4291_v44  ;;  %v6792_v12 = vld [vmem:[#allocation75_spill] sm:$0xff] }
 0x29c   :  { %v4301_v21 = vpop.eup %4300  ;;  %v2277_v5 = vmul.f32 %v4299_v14, %v6791_v17  ;;  %v6793_v14 = vld [vmem:[#allocation76_spill] sm:$0xff] }
 0x29d   :  { %v4303_v11 = vpop.eup %4302  ;;  %v5354_v16 = vadd.f32 %v2278_v25, %v2276_v23  ;;  %v2270_v26 = vadd.f32 1.0, %v4301_v21  ;;  %v6795_v23 = vld [vmem:[#allocation138_spill] sm:$0xff]  ;;  %v6796_v25 = vld [vmem:[#allocation139_spill] sm:$0xff]  ;;  %v6797_v21 = vld [vmem:[#allocation140_spill] sm:$0xff] }
 0x29e   :  { %v4305_v15 = vpop.eup %4304  ;;  %v2279_v54 = vmul.f32 %v4303_v11, %v4295_v55  ;;  %v6798_v11 = vld [vmem:[#allocation141_spill] sm:$0xff]  ;;  %v6801_v17 = vld [vmem:[#allocation144_spill] sm:$0xff] }
 0x29f   :  { %4306 = vtanh.f32 %v5354_v16  ;;  %v2271_v29 = vadd.f32 1.0, %v4305_v15  ;;  %v6800_v15 = vld [vmem:[#allocation143_spill] sm:$0xff] }
 0x2a0   :  { %4308 = vrcp.f32 %v2270_v26  ;;  %v5358_v10 = vadd.f32 %v2279_v54, %v2277_v5  ;;  %v6799_v26 = vld [vmem:[#allocation142_spill] sm:$0xff]  ;;  %v6802_v5 = vld [vmem:[#allocation145_spill] sm:$0xff] }
 0x2a1   :  { %4310 = vrcp.f32 %v2271_v29  ;;  %v6803_v54 = vld [vmem:[#allocation146_spill] sm:$0xff]  ;;  %v6804_v29 = vld [vmem:[#allocation147_spill] sm:$0xff] }
 0x2a2   :  { %4312 = vtanh.f32 %v5358_v10 }
 0x2ac   :  { %v4307_v57 = vpop.eup %4306 }
 0x2ad   :  { %v4309_v35 = vpop.eup %4308 }
 0x2ae   :  { %v4311_v30 = vpop.eup %4310  ;;  %v5361_v46 = vmul.f32 %v4309_v35, %v4307_v57  ;;  %v6805_v57 = vld [vmem:[#allocation148_spill] sm:$0xff]  ;;  %v6806_v35 = vld [vmem:[#allocation149_spill] sm:$0xff] }
 0x2af   :  { %v4313_v38 = vpop.eup %4312 }
 0x2b0   :  { %v5363_v44 = vmul.f32 %v4313_v38, %v4311_v30  ;;  %v5369_v55 = vpack.c.bf16 %v5361_v46, %v5361_v46  ;;  %v6807_v30 = vld [vmem:[#allocation150_spill] sm:$0xff]  ;;  %v6808_v38 = vld [vmem:[#allocation151_spill] sm:$0xff] }
 0x2b2   :  { %v2297_v2 = vpack.c.bf16 %v5363_v44, %v5363_v44 }
 0x2b4   :  { %2330 = vmatprep.mubr.bf16.mxu0 %v2297_v2  ;;  %2371 = vmatprep.mubr.bf16.mxu1 %v2297_v2 }
 0x2b5   :  { %2331 = vmatmul.mubr.bf16.vlgmr.msra.gmra.mxu0 %v5369_v55  ;;  %2372 = vmatmul.mubr.bf16.vlgmr.msra.gmra.mxu1 %v5369_v55 }
 0x2b6   :  { %2381 = vmatpush1.bf16.msra.mxu0 %v6792_v12  ;;  %2422 = vmatpush1.bf16.msra.mxu1 %v6793_v14 }
 0x2b7   :  { %2412 = vmatprep.mubr.bf16.mxu0 %v2297_v2  ;;  %2453 = vmatprep.mubr.bf16.mxu1 %v2297_v2  ;;  %v6809_v2 = vld [vmem:[#allocation152_spill] sm:$0xff] }
 0x2b8   :  { %2382 = vmatprep.subr.bf16.mxu0 %v6794_v36  ;;  %2423 = vmatprep.subr.bf16.mxu1 %v6795_v23 }
 0x2ba   :  { %2383 = vmatpush1.bf16.msra.mxu0 %v6796_v25  ;;  %2424 = vmatpush1.bf16.msra.mxu1 %v6797_v21 }
 0x2bb   :  { %2384 = vmatprep.subr.bf16.mxu0 %v6798_v11  ;;  %2425 = vmatprep.subr.bf16.mxu1 %v6799_v26  ;;  %v6810_v26 = vld [vmem:[#allocation153_spill] sm:$0xff] }
 0x2be   :  { %2385 = vmatpush1.bf16.msra.mxu0 %v6800_v15  ;;  %2426 = vmatpush1.bf16.msra.mxu1 %v6801_v17  ;;  %v6811_v15 = vld [vmem:[#allocation154_spill] sm:$0xff]  ;;  %v6812_v17 = vld [vmem:[#allocation155_spill] sm:$0xff] }
 0x2bf   :  { %2386 = vmatprep.subr.bf16.mxu0 %v6802_v5  ;;  %2427 = vmatprep.subr.bf16.mxu1 %v6803_v54  ;;  %v6813_v5 = vld [vmem:[#allocation156_spill] sm:$0xff]  ;;  %v6814_v54 = vld [vmem:[#allocation157_spill] sm:$0xff] }
 0x2c2   :  { %2387 = vmatpush1.bf16.msra.mxu0 %v6804_v29  ;;  %2428 = vmatpush1.bf16.msra.mxu1 %v6805_v57  ;;  %v6815_v29 = vld [vmem:[#allocation158_spill] sm:$0xff]  ;;  %v6816_v57 = vld [vmem:[#allocation159_spill] sm:$0xff] }
 0x2c3   :  { %2388 = vmatprep.subr.bf16.mxu0 %v6806_v35  ;;  %2429 = vmatprep.subr.bf16.mxu1 %v6807_v30  ;;  %v6817_v35 = vld [vmem:[#allocation160_spill] sm:$0xff]  ;;  %v6818_v30 = vld [vmem:[#allocation161_spill] sm:$0xff] }
 0x2c6   :  { %2389 = vmatpush1.bf16.msra.mxu0 %v6808_v38  ;;  %2430 = vmatpush1.bf16.msra.mxu1 %v6809_v2  ;;  %v6819_v38 = vld [vmem:[#allocation162_spill] sm:$0xff]  ;;  %v6820_v2 = vld [vmem:[#allocation163_spill] sm:$0xff] }
 0x2c7   :  { %2390 = vmatprep.subr.bf16.mxu0 %v6810_v26  ;;  %2431 = vmatprep.subr.bf16.mxu1 %v6811_v15  ;;  %v6821_v26 = vld [vmem:[#allocation164_spill] sm:$0xff]  ;;  %v6822_v15 = vld [vmem:[#allocation165_spill] sm:$0xff] }
 0x2ca   :  { %2391 = vmatpush1.bf16.msra.mxu0 %v6812_v17  ;;  %2432 = vmatpush1.bf16.msra.mxu1 %v6813_v5  ;;  %v6823_v17 = vld [vmem:[#allocation166_spill] sm:$0xff]  ;;  %v6824_v5 = vld [vmem:[#allocation167_spill] sm:$0xff] }
 0x2cb   :  { %2392 = vmatprep.subr.bf16.mxu0 %v6814_v54  ;;  %2433 = vmatprep.subr.bf16.mxu1 %v6815_v29  ;;  %v6825_v54 = vld [vmem:[#allocation168_spill] sm:$0xff]  ;;  %v6826_v29 = vld [vmem:[#allocation169_spill] sm:$0xff] }
 0x2ce   :  { %2393 = vmatpush1.bf16.msra.mxu0 %v6816_v57  ;;  %2434 = vmatpush1.bf16.msra.mxu1 %v6817_v35  ;;  %v6827_v57 = vld [vmem:[#allocation170_spill] sm:$0xff]  ;;  %v6828_v35 = vld [vmem:[#allocation171_spill] sm:$0xff] }
 0x2cf   :  { %2394 = vmatprep.subr.bf16.mxu0 %v6818_v30  ;;  %2435 = vmatprep.subr.bf16.mxu1 %v6819_v38  ;;  %v6829_v30 = vld [vmem:[#allocation172_spill] sm:$0xff]  ;;  %v6830_v38 = vld [vmem:[#allocation173_spill] sm:$0xff] }
 0x2d2   :  { %2395 = vmatpush1.bf16.msra.mxu0 %v6820_v2  ;;  %2436 = vmatpush1.bf16.msra.mxu1 %v6821_v26  ;;  %v6831_v2 = vld [vmem:[#allocation174_spill] sm:$0xff]  ;;  %v6832_v26 = vld [vmem:[#allocation175_spill] sm:$0xff] }
 0x2d3   :  { %2396 = vmatprep.subr.bf16.mxu0 %v6822_v15  ;;  %2437 = vmatprep.subr.bf16.mxu1 %v6823_v17  ;;  %v6833_v15 = vld [vmem:[#allocation176_spill] sm:$0xff]  ;;  %v6834_v17 = vld [vmem:[#allocation177_spill] sm:$0xff] }
 0x2d6   :  { %2397 = vmatpush2.bf16.msra.mxu0 %v6824_v5  ;;  %2438 = vmatpush2.bf16.msra.mxu1 %v6825_v54  ;;  %v6835_v5 = vld [vmem:[#allocation178_spill] sm:$0xff]  ;;  %v6836_v54 = vld [vmem:[#allocation179_spill] sm:$0xff] }
 0x2d7   :  { %2398 = vmatprep.subr.bf16.mxu0 %v6826_v29  ;;  %2439 = vmatprep.subr.bf16.mxu1 %v6827_v57  ;;  %v6837_v29 = vld [vmem:[#allocation180_spill] sm:$0xff]  ;;  %v6838_v57 = vld [vmem:[#allocation181_spill] sm:$0xff] }
 0x2da   :  { %2399 = vmatpush2.bf16.msra.mxu0 %v6828_v35  ;;  %2440 = vmatpush2.bf16.msra.mxu1 %v6829_v30  ;;  %v6839_v35 = vld [vmem:[#allocation182_spill] sm:$0xff] }
 0x2db   :  { %2400 = vmatprep.subr.bf16.mxu0 %v6830_v38  ;;  %2441 = vmatprep.subr.bf16.mxu1 %v6831_v2 }
 0x2de   :  { %2401 = vmatpush2.bf16.msra.mxu0 %v6832_v26  ;;  %2442 = vmatpush2.bf16.msra.mxu1 %v6833_v15  ;;  %v6840_v26 = vld [vmem:[#allocation186_spill] sm:$0xff]  ;;  %v6841_v15 = vld [vmem:[#allocation187_spill] sm:$0xff] }
 0x2df   :  { %2402 = vmatprep.subr.bf16.mxu0 %v6834_v17  ;;  %2443 = vmatprep.subr.bf16.mxu1 %v6835_v5 }
 0x2e2   :  { %2403 = vmatpush2.bf16.msra.mxu0 %v6836_v54  ;;  %2444 = vmatpush2.bf16.msra.mxu1 %v6837_v29 }
 0x2e3   :  { %2404 = vmatprep.subr.bf16.mxu0 %v6838_v57  ;;  %2445 = vmatprep.subr.bf16.mxu1 %v6839_v35 }
 0x2e6   :  { %2405 = vmatpush2.bf16.msra.mxu0 %v5227_v0  ;;  %2446 = vmatpush2.bf16.msra.mxu1 %v5229_v45 }
 0x2e7   :  { %2406 = vmatprep.subr.bf16.mxu0 %v5233_v52  ;;  %2447 = vmatprep.subr.bf16.mxu1 %v6840_v26 }
 0x2ea   :  { %2407 = vmatpush2.bf16.msra.mxu0 %v6841_v15  ;;  %2448 = vmatpush2.bf16.msra.mxu1 %v5241_v43 }
 0x2eb   :  { %2408 = vmatprep.subr.bf16.mxu0 %v5245_v34  ;;  %2449 = vmatprep.subr.bf16.mxu1 %v5247_v28 }
 0x2ee   :  { %2409 = vmatpush2.bf16.msra.mxu0 %v5251_v31  ;;  %2450 = vmatpush2.bf16.msra.mxu1 %v5253_v53 }
 0x2ef   :  { %2410 = vmatprep.subr.bf16.mxu0 %v5257_v1  ;;  %2451 = vmatprep.subr.bf16.mxu1 %v5259_v20 }
 0x2f2   :  { %2411 = vmatpush2.bf16.msra.mxu0 %v5263_v9  ;;  %2452 = vmatpush2.bf16.msra.mxu1 %v5265_v18 }
 0x2f3   :  { %2530 = vmatprep.subr.bf16.mxu0 %v4669_v19  ;;  %2571 = vmatprep.subr.bf16.mxu1 %v4674_v37 }
 0x2f5   :  { %2413 = vmatmul.mubr.bf16.vlgmr.msra.gmra.mxu0 %v5369_v55  ;;  %2454 = vmatmul.mubr.bf16.vlgmr.msra.gmra.mxu1 %v5369_v55  ;;  %v6842_v55 = vld [vmem:[#allocation38_spill] sm:$0xff] }
 0x2f6   :  { %2531 = vmatpush1.bf16.msra.mxu0 %v4671_v22  ;;  %2572 = vmatpush1.bf16.msra.mxu1 %v4676_v24 }
 0x2f7   :  { %2532 = vmatprep.subr.bf16.mxu0 %v4678_v49  ;;  %2573 = vmatprep.subr.bf16.mxu1 %v4682_v27 }
 0x2fa   :  { %2533 = vmatpush1.bf16.msra.mxu0 %v4686_v32  ;;  %2574 = vmatpush1.bf16.msra.mxu1 %v4690_v33 }
 0x2fb   :  { %2534 = vmatprep.subr.bf16.mxu0 %v4692_v4  ;;  %2575 = vmatprep.subr.bf16.mxu1 %v4695_v56 }
 0x2fe   :  { %2535 = vmatpush1.bf16.msra.mxu0 %v4698_v39  ;;  %2576 = vmatpush1.bf16.msra.mxu1 %v4702_v40 }
 0x2ff   :  { %2536 = vmatprep.subr.bf16.mxu0 %v4704_v41  ;;  %2577 = vmatprep.subr.bf16.mxu1 %v4707_v42  ;;  %v6881_v42 = vld [vmem:[#allocation83_spill] sm:$0xff] }
 0x302   :  { %2537 = vmatpush1.bf16.msra.mxu0 %v4710_v47  ;;  %2578 = vmatpush1.bf16.msra.mxu1 %v4714_v48  ;;  %v6879_v48 = vld [vmem:[#allocation81_spill] sm:$0xff]  ;;  %v6880_v47 = vld [vmem:[#allocation82_spill] sm:$0xff] }
 0x303   :  { %2538 = vmatprep.subr.bf16.mxu0 %v4716_v50  ;;  %2579 = vmatprep.subr.bf16.mxu1 %v4719_v51 }
 0x306   :  { %2539 = vmatpush1.bf16.msra.mxu0 %v4722_v58  ;;  %2580 = vmatpush1.bf16.msra.mxu1 %v4726_v59  ;;  %v6843_v59 = vld [vmem:[#allocation39_spill] sm:$0xff] }
 0x307   :  { %2540 = vmatprep.subr.bf16.mxu0 %v4728_v60  ;;  %2581 = vmatprep.subr.bf16.mxu1 %v4731_v61  ;;  %v6844_v60 = vld [vmem:[#allocation40_spill] sm:$0xff]  ;;  %v6845_v61 = vld [vmem:[#allocation41_spill] sm:$0xff] }
 0x30a   :  { %2541 = vmatpush1.bf16.msra.mxu0 %v4734_v62  ;;  %2582 = vmatpush1.bf16.msra.mxu1 %v4738_v63  ;;  %v6846_v62 = vld [vmem:[#allocation42_spill] sm:$0xff]  ;;  %v6847_v63 = vld [vmem:[#allocation43_spill] sm:$0xff] }
 0x30b   :  { %2542 = vmatprep.subr.bf16.mxu0 %v4743_v3  ;;  %2583 = vmatprep.subr.bf16.mxu1 %v4745_v6  ;;  %v6848_v3 = vld [vmem:[#allocation44_spill] sm:$0xff]  ;;  %v6849_v6 = vld [vmem:[#allocation45_spill] sm:$0xff] }
 0x30e   :  { %2543 = vmatpush1.bf16.msra.mxu0 %v4747_v7  ;;  %2584 = vmatpush1.bf16.msra.mxu1 %v4749_v8  ;;  %v6850_v7 = vld [vmem:[#allocation46_spill] sm:$0xff]  ;;  %v6851_v8 = vld [vmem:[#allocation47_spill] sm:$0xff] }
 0x30f   :  { %2544 = vmatprep.subr.bf16.mxu0 %v4755_v13  ;;  %2585 = vmatprep.subr.bf16.mxu1 %v6842_v55  ;;  %v6852_v13 = vld [vmem:[#allocation48_spill] sm:$0xff]  ;;  %v6853_v55 = vld [vmem:[#allocation49_spill] sm:$0xff] }
 0x312   :  { %2545 = vmatpush1.bf16.msra.mxu0 %v6843_v59  ;;  %2586 = vmatpush1.bf16.msra.mxu1 %v6844_v60  ;;  %v6854_v59 = vld [vmem:[#allocation50_spill] sm:$0xff]  ;;  %v6855_v60 = vld [vmem:[#allocation51_spill] sm:$0xff] }
 0x313   :  { %2546 = vmatprep.subr.bf16.mxu0 %v6845_v61  ;;  %2587 = vmatprep.subr.bf16.mxu1 %v6846_v62  ;;  %v6856_v61 = vld [vmem:[#allocation52_spill] sm:$0xff]  ;;  %v6857_v62 = vld [vmem:[#allocation53_spill] sm:$0xff] }
 0x316   :  { %2547 = vmatpush2.bf16.msra.mxu0 %v6847_v63  ;;  %2588 = vmatpush2.bf16.msra.mxu1 %v6848_v3  ;;  %v6858_v63 = vld [vmem:[#allocation54_spill] sm:$0xff]  ;;  %v6859_v3 = vld [vmem:[#allocation55_spill] sm:$0xff] }
 0x317   :  { %2548 = vmatprep.subr.bf16.mxu0 %v6849_v6  ;;  %2589 = vmatprep.subr.bf16.mxu1 %v6850_v7  ;;  %v6860_v6 = vld [vmem:[#allocation56_spill] sm:$0xff]  ;;  %v6861_v7 = vld [vmem:[#allocation57_spill] sm:$0xff] }
 0x31a   :  { %2549 = vmatpush2.bf16.msra.mxu0 %v6851_v8  ;;  %2590 = vmatpush2.bf16.msra.mxu1 %v6852_v13  ;;  %v6862_v8 = vld [vmem:[#allocation59_spill] sm:$0xff]  ;;  %v6863_v13 = vld [vmem:[#allocation58_spill] sm:$0xff] }
 0x31b   :  { %2550 = vmatprep.subr.bf16.mxu0 %v6853_v55  ;;  %2591 = vmatprep.subr.bf16.mxu1 %v6854_v59  ;;  %v6864_v55 = vld [vmem:[#allocation60_spill] sm:$0xff]  ;;  %v6865_v59 = vld [vmem:[#allocation61_spill] sm:$0xff] }
 0x31e   :  { %2551 = vmatpush2.bf16.msra.mxu0 %v6855_v60  ;;  %2592 = vmatpush2.bf16.msra.mxu1 %v6856_v61  ;;  %v6866_v60 = vld [vmem:[#allocation62_spill] sm:$0xff]  ;;  %v6867_v61 = vld [vmem:[#allocation63_spill] sm:$0xff] }
 0x31f   :  { %2552 = vmatprep.subr.bf16.mxu0 %v6857_v62  ;;  %2593 = vmatprep.subr.bf16.mxu1 %v6858_v63  ;;  %v6868_v62 = vld [vmem:[#allocation64_spill] sm:$0xff]  ;;  %v6869_v63 = vld [vmem:[#allocation65_spill] sm:$0xff] }
 0x322   :  { %2553 = vmatpush2.bf16.msra.mxu0 %v6859_v3  ;;  %2594 = vmatpush2.bf16.msra.mxu1 %v6860_v6  ;;  %v6870_v3 = vld [vmem:[#allocation66_spill] sm:$0xff]  ;;  %v6871_v6 = vld [vmem:[#allocation67_spill] sm:$0xff] }
 0x323   :  { %2554 = vmatprep.subr.bf16.mxu0 %v6861_v7  ;;  %2595 = vmatprep.subr.bf16.mxu1 %v6862_v8  ;;  %v6872_v7 = vld [vmem:[#allocation68_spill] sm:$0xff]  ;;  %v6873_v8 = vld [vmem:[#allocation69_spill] sm:$0xff] }
 0x326   :  { %2555 = vmatpush2.bf16.msra.mxu0 %v6863_v13  ;;  %2596 = vmatpush2.bf16.msra.mxu1 %v6864_v55  ;;  %v6874_v13 = vld [vmem:[#allocation70_spill] sm:$0xff]  ;;  %v6875_v55 = vld [vmem:[#allocation71_spill] sm:$0xff] }
 0x327   :  { %2556 = vmatprep.subr.bf16.mxu0 %v6865_v59  ;;  %2597 = vmatprep.subr.bf16.mxu1 %v6866_v60  ;;  %v6876_v59 = vld [vmem:[#allocation72_spill] sm:$0xff]  ;;  %v6877_v60 = vld [vmem:[#allocation73_spill] sm:$0xff] }
 0x32a   :  { %2557 = vmatpush2.bf16.msra.mxu0 %v6867_v61  ;;  %2598 = vmatpush2.bf16.msra.mxu1 %v6868_v62  ;;  %v6878_v61 = vld [vmem:[#allocation74_spill] sm:$0xff] }
 0x32b   :  { %2558 = vmatprep.subr.bf16.mxu0 %v6869_v63  ;;  %2599 = vmatprep.subr.bf16.mxu1 %v6870_v3 }
 0x32e   :  { %2559 = vmatpush2.bf16.msra.mxu0 %v6871_v6  ;;  %2600 = vmatpush2.bf16.msra.mxu1 %v6872_v7 }
 0x32f   :  { %2560 = vmatprep.subr.bf16.mxu0 %v6873_v8  ;;  %2601 = vmatprep.subr.bf16.mxu1 %v6874_v13 }
 0x332   :  { %2561 = vmatpush2.bf16.msra.mxu0 %v6875_v55  ;;  %2602 = vmatpush2.bf16.msra.mxu1 %v6876_v59  ;;  %v6882_v59 = vld [vmem:[#allocation84_spill] sm:$0xff] }
 0x333   :  { %2612 = vmatprep.subr.bf16.mxu0 %v6877_v60  ;;  %2653 = vmatprep.subr.bf16.mxu1 %v6878_v61 }
 0x375   :  { %v2332_v62 = vpop.f32.mrf.mxu0  ;;  %v2373_v63 = vpop.f32.mrf.mxu1 }
 0x376   :  { %v2462_v8 = vadd.f32 %v2332_v62, %v6879_v48  ;;  %v2464_v13 = vadd.f32 %v2373_v63, %v6880_v47 }
 0x377   :  { %v2334_v58 = vpop.f32.mrf.mxu0  ;;  %v2375_v3 = vpop.f32.mrf.mxu1 }
 0x378   :  { %v2463_v55 = vadd.f32 %v2334_v58, %v6881_v42  ;;  %v4151_v41 = vmul.f32 -1.442695, %v2462_v8  ;;  %v2465_v40 = vadd.f32 %v2375_v3, %v6882_v59  ;;  %v4153_v60 = vmul.f32 -1.442695, %v2464_v13  ;;  %v6883_v59 = vld [vmem:[#allocation111_spill] sm:$0xff]  ;;  %v6884_v3 = vld [vmem:[#allocation112_spill] sm:$0xff] }
 0x379   :  { %v2336_v51 = vpop.f32.mrf.mxu0  ;;  %v2377_v6 = vpop.f32.mrf.mxu1  ;;  %v6886_v13 = vld [vmem:[#allocation114_spill] sm:$0xff] }
 0x37a   :  { %v4152_v39 = vmul.f32 -1.442695, %v2463_v55  ;;  %4314 = vpow2.f32 %v4151_v41  ;;  %v4154_v61 = vmul.f32 -1.442695, %v2465_v40 }
 0x37b   :  { %v2337_v50 = vpop.f32.mrf.mxu0  ;;  %v2378_v7 = vpop.f32.mrf.mxu1  ;;  %4316 = vpow2.f32 %v4153_v60 }
 0x37c   :  { %4318 = vpow2.f32 %v4152_v39 }
 0x37d   :  { %4320 = vpow2.f32 %v4154_v61  ;;  %v6885_v61 = vld [vmem:[#allocation113_spill] sm:$0xff] }
 0x387   :  { %v4315_v51 = vpop.eup %4314 }
 0x388   :  { %v4317_v6 = vpop.eup %4316  ;;  %v2476_v7 = vadd.f32 1.0, %v4315_v51 }
 0x389   :  { %v4319_v50 = vpop.eup %4318  ;;  %v2488_v48 = vadd.f32 1.0, %v4317_v6 }
 0x38a   :  { %v4321_v56 = vpop.eup %4320  ;;  %v2477_v62 = vadd.f32 1.0, %v4319_v50  ;;  %4322 = vrcp.f32 %v2476_v7 }
 0x38b   :  { %v2489_v47 = vadd.f32 1.0, %v4321_v56  ;;  %4324 = vrcp.f32 %v2488_v48 }
 0x38c   :  { %4326 = vrcp.f32 %v2477_v62 }
 0x397   :  { %v4323_v48 = vpop.eup %4322 }
 0x3b5   :  { %v2414_v42 = vpop.f32.mrf.mxu0  ;;  %v2455_v58 = vpop.f32.mrf.mxu1 }
 0x3b6   :  { %v2466_v63 = vadd.f32 %v2414_v42, %v6883_v59  ;;  %v2468_v41 = vadd.f32 %v2455_v58, %v6884_v3  ;;  %v4325_v42 = vpop.eup %4324 }
 0x3b7   :  { %v2416_v40 = vpop.f32.mrf.mxu0  ;;  %v2457_v39 = vpop.f32.mrf.mxu1 }
 0x3b8   :  { %4328 = vtanh.f32 %v2466_v63  ;;  %v4155_v60 = vmul.f32 -1.442695, %v2468_v41  ;;  %v2467_v8 = vadd.f32 %v2416_v40, %v6885_v61  ;;  %v2469_v55 = vadd.f32 %v2457_v39, %v6886_v13  ;;  %v4327_v62 = vpop.eup %4326 }
 0x3b9   :  { %4330 = vrcp.f32 %v2489_v47  ;;  %v2418_v51 = vpop.f32.mrf.mxu0  ;;  %v2459_v6 = vpop.f32.mrf.mxu1  ;;  %v2508_v63 = vmul.f32 %v4325_v42, %v5354_v16  ;;  %v6888_v42 = vld [vmem:[#allocation136_spill] sm:$0xff] }
 0x3ba   :  { %4332 = vpow2.f32 %v4155_v60  ;;  %v4156_v56 = vmul.f32 -1.442695, %v2469_v55 }
 0x3bb   :  { %4334 = vtanh.f32 %v2467_v8  ;;  %v2419_v50 = vpop.f32.mrf.mxu0  ;;  %v2460_v7 = vpop.f32.mrf.mxu1 }
 0x3bc   :  { %4336 = vpow2.f32 %v4156_v56  ;;  %v6887_v56 = vld [vmem:[#allocation135_spill] sm:$0xff] }
 0x3bd   :  { %v2286_v50 = vadd.f32 %v5361_v46, %v6887_v56  ;;  %v6889_v46 = vld [vmem:[#allocation142_spill] sm:$0xff] }
 0x3be   :  { %v6901_v56 = vld [vmem:[#allocation154_spill] sm:$0xff] }
 0x3c5   :  { %v4329_v58 = vpop.eup %4328 }
 0x3c6   :  { %v4331_v59 = vpop.eup %4330  ;;  %v2510_v3 = vmul.f32 %v4329_v58, %v4323_v48 }
 0x3c7   :  { %v4333_v41 = vpop.eup %4332  ;;  %v2509_v60 = vmul.f32 %v4331_v59, %v5358_v10  ;;  %v2287_v10 = vadd.f32 %v5363_v44, %v6888_v42  ;;  %v6890_v44 = vld [vmem:[#allocation143_spill] sm:$0xff]  ;;  %v6905_v42 = vld [vmem:[#allocation158_spill] sm:$0xff] }
 0x3c8   :  { %v4335_v40 = vpop.eup %4334  ;;  %v5512_v39 = vadd.f32 %v2510_v3, %v2508_v63  ;;  %v2502_v47 = vadd.f32 1.0, %v4333_v41  ;;  %v6891_v41 = vld [vmem:[#allocation144_spill] sm:$0xff] }
 0x3c9   :  { %v4337_v61 = vpop.eup %4336  ;;  %v2511_v8 = vmul.f32 %v4335_v40, %v4327_v62  ;;  %v6892_v40 = vld [vmem:[#allocation145_spill] sm:$0xff] }
 0x3ca   :  { %4338 = vtanh.f32 %v5512_v39  ;;  %v2503_v13 = vadd.f32 1.0, %v4337_v61  ;;  %v6894_v61 = vld [vmem:[#allocation147_spill] sm:$0xff] }
 0x3cb   :  { %4340 = vrcp.f32 %v2502_v47  ;;  %v5516_v55 = vadd.f32 %v2511_v8, %v2509_v60  ;;  %v6893_v47 = vld [vmem:[#allocation146_spill] sm:$0xff]  ;;  %v6895_v60 = vld [vmem:[#allocation148_spill] sm:$0xff]  ;;  %v6896_v8 = vld [vmem:[#allocation149_spill] sm:$0xff] }
 0x3cc   :  { %4342 = vrcp.f32 %v2503_v13  ;;  %v6897_v13 = vld [vmem:[#allocation150_spill] sm:$0xff] }
 0x3cd   :  { %4344 = vtanh.f32 %v5516_v55 }
 0x3d7   :  { %v4339_v16 = vpop.eup %4338 }
 0x3d8   :  { %v4341_v51 = vpop.eup %4340 }
 0x3d9   :  { %v4343_v6 = vpop.eup %4342  ;;  %v2516_v7 = vmul.f32 %v4341_v51, %v4339_v16  ;;  %v6898_v16 = vld [vmem:[#allocation151_spill] sm:$0xff]  ;;  %v6899_v51 = vld [vmem:[#allocation152_spill] sm:$0xff] }
 0x3da   :  { %v4345_v48 = vpop.eup %4344 }
 0x3db   :  { %v2517_v62 = vmul.f32 %v4345_v48, %v4343_v6  ;;  %v5523_v58 = vadd.f32 %v2516_v7, %v2286_v50  ;;  %v5527_v3 = vpack.c.bf16 %v2516_v7, %v2516_v7  ;;  %v6900_v6 = vld [vmem:[#allocation153_spill] sm:$0xff]  ;;  %v6902_v50 = vld [vmem:[#allocation155_spill] sm:$0xff]  ;;  %v6903_v7 = vld [vmem:[#allocation156_spill] sm:$0xff] }
 0x3dc   :  { %v6904_v48 = vld [vmem:[#allocation157_spill] sm:$0xff] }
 0x3dd   :  { %v5525_v59 = vadd.f32 %v2517_v62, %v2287_v10  ;;  %v2529_v63 = vpack.c.bf16 %v2517_v62, %v2517_v62  ;;  %v6906_v10 = vld [vmem:[#allocation159_spill] sm:$0xff]  ;;  %v6907_v62 = vld [vmem:[#allocation160_spill] sm:$0xff] }
 0x3df   :  { %2562 = vmatprep.mubr.bf16.mxu0 %v2529_v63  ;;  %2603 = vmatprep.mubr.bf16.mxu1 %v2529_v63 }
 0x3e0   :  { %2563 = vmatmul.mubr.bf16.vlgmr.msra.gmra.mxu0 %v5527_v3  ;;  %2604 = vmatmul.mubr.bf16.vlgmr.msra.gmra.mxu1 %v5527_v3 }
 0x3e1   :  { %2613 = vmatpush1.bf16.msra.mxu0 %v6792_v12  ;;  %2654 = vmatpush1.bf16.msra.mxu1 %v6793_v14 }
 0x3e2   :  { %2644 = vmatprep.mubr.bf16.mxu0 %v2529_v63  ;;  %2685 = vmatprep.mubr.bf16.mxu1 %v2529_v63  ;;  %v6908_v63 = vld [vmem:[#allocation161_spill] sm:$0xff] }
 0x3e3   :  { %2614 = vmatprep.subr.bf16.mxu0 %v6794_v36  ;;  %2655 = vmatprep.subr.bf16.mxu1 %v6795_v23 }
 0x3e5   :  { %2615 = vmatpush1.bf16.msra.mxu0 %v6796_v25  ;;  %2656 = vmatpush1.bf16.msra.mxu1 %v6797_v21 }
 0x3e6   :  { %2616 = vmatprep.subr.bf16.mxu0 %v6798_v11  ;;  %2657 = vmatprep.subr.bf16.mxu1 %v6889_v46 }
 0x3e9   :  { %2617 = vmatpush1.bf16.msra.mxu0 %v6890_v44  ;;  %2658 = vmatpush1.bf16.msra.mxu1 %v6891_v41 }
 0x3ea   :  { %2618 = vmatprep.subr.bf16.mxu0 %v6892_v40  ;;  %2659 = vmatprep.subr.bf16.mxu1 %v6893_v47 }
 0x3ed   :  { %2619 = vmatpush1.bf16.msra.mxu0 %v6894_v61  ;;  %2660 = vmatpush1.bf16.msra.mxu1 %v6895_v60 }
 0x3ee   :  { %2620 = vmatprep.subr.bf16.mxu0 %v6896_v8  ;;  %2661 = vmatprep.subr.bf16.mxu1 %v6897_v13 }
 0x3f1   :  { %2621 = vmatpush1.bf16.msra.mxu0 %v6898_v16  ;;  %2662 = vmatpush1.bf16.msra.mxu1 %v6899_v51  ;;  %v6909_v16 = vld [vmem:[#allocation162_spill] sm:$0xff]  ;;  %v6910_v51 = vld [vmem:[#allocation163_spill] sm:$0xff] }
 0x3f2   :  { %2622 = vmatprep.subr.bf16.mxu0 %v6900_v6  ;;  %2663 = vmatprep.subr.bf16.mxu1 %v6901_v56  ;;  %v6911_v6 = vld [vmem:[#allocation164_spill] sm:$0xff]  ;;  %v6912_v56 = vld [vmem:[#allocation165_spill] sm:$0xff] }
 0x3f5   :  { %2623 = vmatpush1.bf16.msra.mxu0 %v6902_v50  ;;  %2664 = vmatpush1.bf16.msra.mxu1 %v6903_v7  ;;  %v6913_v50 = vld [vmem:[#allocation166_spill] sm:$0xff]  ;;  %v6914_v7 = vld [vmem:[#allocation167_spill] sm:$0xff] }
 0x3f6   :  { %2624 = vmatprep.subr.bf16.mxu0 %v6904_v48  ;;  %2665 = vmatprep.subr.bf16.mxu1 %v6905_v42  ;;  %v6915_v48 = vld [vmem:[#allocation168_spill] sm:$0xff]  ;;  %v6916_v42 = vld [vmem:[#allocation169_spill] sm:$0xff] }
 0x3f9   :  { %2625 = vmatpush1.bf16.msra.mxu0 %v6906_v10  ;;  %2666 = vmatpush1.bf16.msra.mxu1 %v6907_v62  ;;  %v6917_v10 = vld [vmem:[#allocation170_spill] sm:$0xff]  ;;  %v6918_v62 = vld [vmem:[#allocation171_spill] sm:$0xff] }
 0x3fa   :  { %2626 = vmatprep.subr.bf16.mxu0 %v6908_v63  ;;  %2667 = vmatprep.subr.bf16.mxu1 %v6909_v16 }
 0x3fd   :  { %2627 = vmatpush1.bf16.msra.mxu0 %v6910_v51  ;;  %2668 = vmatpush1.bf16.msra.mxu1 %v6911_v6  ;;  %v6919_v6 = vld [vmem:[#allocation175_spill] sm:$0xff] }
 0x3fe   :  { %2628 = vmatprep.subr.bf16.mxu0 %v6912_v56  ;;  %2669 = vmatprep.subr.bf16.mxu1 %v6913_v50  ;;  %v6920_v56 = vld [vmem:[#allocation176_spill] sm:$0xff] }
 0x401   :  { %2629 = vmatpush2.bf16.msra.mxu0 %v6914_v7  ;;  %2670 = vmatpush2.bf16.msra.mxu1 %v6915_v48 }
 0x402   :  { %2630 = vmatprep.subr.bf16.mxu0 %v6916_v42  ;;  %2671 = vmatprep.subr.bf16.mxu1 %v6917_v10 }
 0x405   :  { %2631 = vmatpush2.bf16.msra.mxu0 %v6918_v62  ;;  %2672 = vmatpush2.bf16.msra.mxu1 %v6829_v30 }
 0x406   :  { %2632 = vmatprep.subr.bf16.mxu0 %v6830_v38  ;;  %2673 = vmatprep.subr.bf16.mxu1 %v6831_v2 }
 0x409   :  { %2633 = vmatpush2.bf16.msra.mxu0 %v6919_v6  ;;  %2674 = vmatpush2.bf16.msra.mxu1 %v6920_v56 }
 0x40a   :  { %2634 = vmatprep.subr.bf16.mxu0 %v6834_v17  ;;  %2675 = vmatprep.subr.bf16.mxu1 %v6835_v5 }
 0x40d   :  { %2635 = vmatpush2.bf16.msra.mxu0 %v6836_v54  ;;  %2676 = vmatpush2.bf16.msra.mxu1 %v6837_v29 }
 0x40e   :  { %2636 = vmatprep.subr.bf16.mxu0 %v6838_v57  ;;  %2677 = vmatprep.subr.bf16.mxu1 %v6839_v35 }
 0x411   :  { %2637 = vmatpush2.bf16.msra.mxu0 %v5227_v0  ;;  %2678 = vmatpush2.bf16.msra.mxu1 %v5229_v45 }
 0x412   :  { %2638 = vmatprep.subr.bf16.mxu0 %v5233_v52  ;;  %2679 = vmatprep.subr.bf16.mxu1 %v6840_v26 }
 0x415   :  { %2639 = vmatpush2.bf16.msra.mxu0 %v6841_v15  ;;  %2680 = vmatpush2.bf16.msra.mxu1 %v5241_v43 }
 0x416   :  { %2640 = vmatprep.subr.bf16.mxu0 %v5245_v34  ;;  %2681 = vmatprep.subr.bf16.mxu1 %v5247_v28  ;;  %v6980_v28 = vld [vmem:[#allocation87_spill] sm:$0xff] }
 0x419   :  { %2641 = vmatpush2.bf16.msra.mxu0 %v5251_v31  ;;  %2682 = vmatpush2.bf16.msra.mxu1 %v5253_v53  ;;  %v6978_v53 = vld [vmem:[#allocation85_spill] sm:$0xff]  ;;  %v6979_v31 = vld [vmem:[#allocation86_spill] sm:$0xff] }
 0x41a   :  { %2642 = vmatprep.subr.bf16.mxu0 %v5257_v1  ;;  %2683 = vmatprep.subr.bf16.mxu1 %v5259_v20 }
 0x41d   :  { %2643 = vmatpush2.bf16.msra.mxu0 %v5263_v9  ;;  %2684 = vmatpush2.bf16.msra.mxu1 %v5265_v18  ;;  %v6923_v18 = vld [vmem:[#allocation20_spill] sm:$0xff] }
 0x41e   :  { %2762 = vmatprep.subr.bf16.mxu0 %v4669_v19  ;;  %2803 = vmatprep.subr.bf16.mxu1 %v4674_v37  ;;  %v6921_v19 = vld [vmem:[#allocation18_spill] sm:$0xff]  ;;  %v6922_v37 = vld [vmem:[#allocation19_spill] sm:$0xff] }
 0x420   :  { %2645 = vmatmul.mubr.bf16.vlgmr.msra.gmra.mxu0 %v5527_v3  ;;  %2686 = vmatmul.mubr.bf16.vlgmr.msra.gmra.mxu1 %v5527_v3  ;;  %v6924_v3 = vld [vmem:[#allocation21_spill] sm:$0xff] }
 0x421   :  { %2763 = vmatpush1.bf16.msra.mxu0 %v4671_v22  ;;  %2804 = vmatpush1.bf16.msra.mxu1 %v4676_v24  ;;  %v6925_v22 = vld [vmem:[#allocation22_spill] sm:$0xff]  ;;  %v6926_v24 = vld [vmem:[#allocation23_spill] sm:$0xff] }
 0x422   :  { %2764 = vmatprep.subr.bf16.mxu0 %v4678_v49  ;;  %2805 = vmatprep.subr.bf16.mxu1 %v4682_v27  ;;  %v6927_v49 = vld [vmem:[#allocation24_spill] sm:$0xff]  ;;  %v6928_v27 = vld [vmem:[#allocation25_spill] sm:$0xff] }
 0x425   :  { %2765 = vmatpush1.bf16.msra.mxu0 %v4686_v32  ;;  %2806 = vmatpush1.bf16.msra.mxu1 %v4690_v33  ;;  %v6929_v32 = vld [vmem:[#allocation26_spill] sm:$0xff]  ;;  %v6930_v33 = vld [vmem:[#allocation27_spill] sm:$0xff] }
 0x426   :  { %2766 = vmatprep.subr.bf16.mxu0 %v4692_v4  ;;  %2807 = vmatprep.subr.bf16.mxu1 %v6921_v19  ;;  %v6931_v4 = vld [vmem:[#allocation28_spill] sm:$0xff]  ;;  %v6932_v19 = vld [vmem:[#allocation29_spill] sm:$0xff] }
 0x429   :  { %2767 = vmatpush1.bf16.msra.mxu0 %v6922_v37  ;;  %2808 = vmatpush1.bf16.msra.mxu1 %v6923_v18  ;;  %v6933_v37 = vld [vmem:[#allocation30_spill] sm:$0xff]  ;;  %v6934_v18 = vld [vmem:[#allocation31_spill] sm:$0xff] }
 0x42a   :  { %2768 = vmatprep.subr.bf16.mxu0 %v6924_v3  ;;  %2809 = vmatprep.subr.bf16.mxu1 %v6925_v22  ;;  %v6935_v3 = vld [vmem:[#allocation32_spill] sm:$0xff]  ;;  %v6936_v22 = vld [vmem:[#allocation33_spill] sm:$0xff] }
 0x42d   :  { %2769 = vmatpush1.bf16.msra.mxu0 %v6926_v24  ;;  %2810 = vmatpush1.bf16.msra.mxu1 %v6927_v49  ;;  %v6937_v24 = vld [vmem:[#allocation34_spill] sm:$0xff]  ;;  %v6938_v49 = vld [vmem:[#allocation35_spill] sm:$0xff] }
 0x42e   :  { %2770 = vmatprep.subr.bf16.mxu0 %v6928_v27  ;;  %2811 = vmatprep.subr.bf16.mxu1 %v6929_v32  ;;  %v6939_v27 = vld [vmem:[#allocation36_spill] sm:$0xff]  ;;  %v6940_v32 = vld [vmem:[#allocation37_spill] sm:$0xff] }
 0x431   :  { %2771 = vmatpush1.bf16.msra.mxu0 %v6930_v33  ;;  %2812 = vmatpush1.bf16.msra.mxu1 %v6931_v4  ;;  %v6941_v33 = vld [vmem:[#allocation38_spill] sm:$0xff]  ;;  %v6942_v4 = vld [vmem:[#allocation39_spill] sm:$0xff] }
 0x432   :  { %2772 = vmatprep.subr.bf16.mxu0 %v6932_v19  ;;  %2813 = vmatprep.subr.bf16.mxu1 %v6933_v37  ;;  %v6943_v19 = vld [vmem:[#allocation40_spill] sm:$0xff]  ;;  %v6944_v37 = vld [vmem:[#allocation41_spill] sm:$0xff] }
 0x435   :  { %2773 = vmatpush1.bf16.msra.mxu0 %v6934_v18  ;;  %2814 = vmatpush1.bf16.msra.mxu1 %v6935_v3  ;;  %v6945_v18 = vld [vmem:[#allocation42_spill] sm:$0xff]  ;;  %v6946_v3 = vld [vmem:[#allocation43_spill] sm:$0xff] }
 0x436   :  { %2774 = vmatprep.subr.bf16.mxu0 %v6936_v22  ;;  %2815 = vmatprep.subr.bf16.mxu1 %v6937_v24  ;;  %v6947_v22 = vld [vmem:[#allocation44_spill] sm:$0xff]  ;;  %v6948_v24 = vld [vmem:[#allocation45_spill] sm:$0xff] }
 0x439   :  { %2775 = vmatpush1.bf16.msra.mxu0 %v6938_v49  ;;  %2816 = vmatpush1.bf16.msra.mxu1 %v6939_v27  ;;  %v6949_v49 = vld [vmem:[#allocation46_spill] sm:$0xff]  ;;  %v6950_v27 = vld [vmem:[#allocation47_spill] sm:$0xff] }
 0x43a   :  { %2776 = vmatprep.subr.bf16.mxu0 %v6940_v32  ;;  %2817 = vmatprep.subr.bf16.mxu1 %v6941_v33  ;;  %v6951_v32 = vld [vmem:[#allocation48_spill] sm:$0xff]  ;;  %v6952_v33 = vld [vmem:[#allocation49_spill] sm:$0xff] }
 0x43d   :  { %2777 = vmatpush1.bf16.msra.mxu0 %v6942_v4  ;;  %2818 = vmatpush1.bf16.msra.mxu1 %v6943_v19  ;;  %v6953_v4 = vld [vmem:[#allocation50_spill] sm:$0xff]  ;;  %v6954_v19 = vld [vmem:[#allocation51_spill] sm:$0xff] }
 0x43e   :  { %2778 = vmatprep.subr.bf16.mxu0 %v6944_v37  ;;  %2819 = vmatprep.subr.bf16.mxu1 %v6945_v18  ;;  %v6955_v37 = vld [vmem:[#allocation52_spill] sm:$0xff]  ;;  %v6956_v18 = vld [vmem:[#allocation53_spill] sm:$0xff] }
 0x441   :  { %2779 = vmatpush2.bf16.msra.mxu0 %v6946_v3  ;;  %2820 = vmatpush2.bf16.msra.mxu1 %v6947_v22  ;;  %v6957_v3 = vld [vmem:[#allocation54_spill] sm:$0xff]  ;;  %v6958_v22 = vld [vmem:[#allocation55_spill] sm:$0xff] }
 0x442   :  { %2780 = vmatprep.subr.bf16.mxu0 %v6948_v24  ;;  %2821 = vmatprep.subr.bf16.mxu1 %v6949_v49  ;;  %v6959_v24 = vld [vmem:[#allocation56_spill] sm:$0xff]  ;;  %v6960_v49 = vld [vmem:[#allocation57_spill] sm:$0xff] }
 0x445   :  { %2781 = vmatpush2.bf16.msra.mxu0 %v6950_v27  ;;  %2822 = vmatpush2.bf16.msra.mxu1 %v6951_v32  ;;  %v6961_v27 = vld [vmem:[#allocation59_spill] sm:$0xff]  ;;  %v6962_v32 = vld [vmem:[#allocation58_spill] sm:$0xff] }
 0x446   :  { %2782 = vmatprep.subr.bf16.mxu0 %v6952_v33  ;;  %2823 = vmatprep.subr.bf16.mxu1 %v6953_v4  ;;  %v6963_v33 = vld [vmem:[#allocation60_spill] sm:$0xff]  ;;  %v6964_v4 = vld [vmem:[#allocation61_spill] sm:$0xff] }
 0x449   :  { %2783 = vmatpush2.bf16.msra.mxu0 %v6954_v19  ;;  %2824 = vmatpush2.bf16.msra.mxu1 %v6955_v37  ;;  %v6965_v19 = vld [vmem:[#allocation62_spill] sm:$0xff]  ;;  %v6966_v37 = vld [vmem:[#allocation63_spill] sm:$0xff] }
 0x44a   :  { %2784 = vmatprep.subr.bf16.mxu0 %v6956_v18  ;;  %2825 = vmatprep.subr.bf16.mxu1 %v6957_v3  ;;  %v6967_v18 = vld [vmem:[#allocation64_spill] sm:$0xff]  ;;  %v6968_v3 = vld [vmem:[#allocation65_spill] sm:$0xff] }
 0x44d   :  { %2785 = vmatpush2.bf16.msra.mxu0 %v6958_v22  ;;  %2826 = vmatpush2.bf16.msra.mxu1 %v6959_v24  ;;  %v6969_v22 = vld [vmem:[#allocation66_spill] sm:$0xff]  ;;  %v6970_v24 = vld [vmem:[#allocation67_spill] sm:$0xff] }
 0x44e   :  { %2786 = vmatprep.subr.bf16.mxu0 %v6960_v49  ;;  %2827 = vmatprep.subr.bf16.mxu1 %v6961_v27  ;;  %v6971_v49 = vld [vmem:[#allocation68_spill] sm:$0xff]  ;;  %v6972_v27 = vld [vmem:[#allocation69_spill] sm:$0xff] }
 0x451   :  { %2787 = vmatpush2.bf16.msra.mxu0 %v6962_v32  ;;  %2828 = vmatpush2.bf16.msra.mxu1 %v6963_v33  ;;  %v6973_v32 = vld [vmem:[#allocation70_spill] sm:$0xff]  ;;  %v6974_v33 = vld [vmem:[#allocation71_spill] sm:$0xff] }
 0x452   :  { %2788 = vmatprep.subr.bf16.mxu0 %v6964_v4  ;;  %2829 = vmatprep.subr.bf16.mxu1 %v6965_v19  ;;  %v6975_v4 = vld [vmem:[#allocation72_spill] sm:$0xff]  ;;  %v6976_v19 = vld [vmem:[#allocation73_spill] sm:$0xff] }
 0x455   :  { %2789 = vmatpush2.bf16.msra.mxu0 %v6966_v37  ;;  %2830 = vmatpush2.bf16.msra.mxu1 %v6967_v18  ;;  %v6977_v37 = vld [vmem:[#allocation74_spill] sm:$0xff] }
 0x456   :  { %2790 = vmatprep.subr.bf16.mxu0 %v6968_v3  ;;  %2831 = vmatprep.subr.bf16.mxu1 %v6969_v22 }
 0x459   :  { %2791 = vmatpush2.bf16.msra.mxu0 %v6970_v24  ;;  %2832 = vmatpush2.bf16.msra.mxu1 %v6971_v49 }
 0x45a   :  { %2792 = vmatprep.subr.bf16.mxu0 %v6972_v27  ;;  %2833 = vmatprep.subr.bf16.mxu1 %v6973_v32 }
 0x45d   :  { %2793 = vmatpush2.bf16.msra.mxu0 %v6974_v33  ;;  %2834 = vmatpush2.bf16.msra.mxu1 %v6975_v4  ;;  %v6981_v4 = vld [vmem:[#allocation88_spill] sm:$0xff] }
 0x45e   :  { %2844 = vmatprep.subr.bf16.mxu0 %v6976_v19  ;;  %2885 = vmatprep.subr.bf16.mxu1 %v6977_v37 }
 0x4a0   :  { %v2564_v18 = vpop.f32.mrf.mxu0  ;;  %v2605_v3 = vpop.f32.mrf.mxu1 }
 0x4a1   :  { %v2694_v27 = vadd.f32 %v2564_v18, %v6978_v53  ;;  %v2696_v32 = vadd.f32 %v2605_v3, %v6979_v31 }
 0x4a2   :  { %v2566_v9 = vpop.f32.mrf.mxu0  ;;  %v2607_v22 = vpop.f32.mrf.mxu1 }
 0x4a3   :  { %v2695_v33 = vadd.f32 %v2566_v9, %v6980_v28  ;;  %v4157_v34 = vmul.f32 -1.442695, %v2694_v27  ;;  %v2697_v43 = vadd.f32 %v2607_v22, %v6981_v4  ;;  %v4159_v19 = vmul.f32 -1.442695, %v2696_v32  ;;  %v6982_v22 = vld [vmem:[#allocation115_spill] sm:$0xff] }
 0x4a4   :  { %v2568_v20 = vpop.f32.mrf.mxu0  ;;  %v2609_v24 = vpop.f32.mrf.mxu1 }
 0x4a5   :  { %v4158_v15 = vmul.f32 -1.442695, %v2695_v33  ;;  %4346 = vpow2.f32 %v4157_v34  ;;  %v4160_v37 = vmul.f32 -1.442695, %v2697_v43  ;;  %v6983_v33 = vld [vmem:[#allocation116_spill] sm:$0xff]  ;;  %v6984_v34 = vld [vmem:[#allocation117_spill] sm:$0xff] }
 0x4a6   :  { %v2569_v1 = vpop.f32.mrf.mxu0  ;;  %v2610_v49 = vpop.f32.mrf.mxu1  ;;  %4348 = vpow2.f32 %v4159_v19 }
 0x4a7   :  { %4350 = vpow2.f32 %v4158_v15  ;;  %v6985_v15 = vld [vmem:[#allocation118_spill] sm:$0xff] }
 0x4a8   :  { %4352 = vpow2.f32 %v4160_v37 }
 0x4b2   :  { %v4347_v20 = vpop.eup %4346 }
 0x4b3   :  { %v4349_v24 = vpop.eup %4348  ;;  %v2708_v49 = vadd.f32 1.0, %v4347_v20 }
 0x4b4   :  { %v4351_v1 = vpop.eup %4350  ;;  %v2720_v18 = vadd.f32 1.0, %v4349_v24 }
 0x4b5   :  { %v4353_v26 = vpop.eup %4352  ;;  %v2709_v53 = vadd.f32 1.0, %v4351_v1  ;;  %4354 = vrcp.f32 %v2708_v49 }
 0x4b6   :  { %v2721_v31 = vadd.f32 1.0, %v4353_v26  ;;  %4356 = vrcp.f32 %v2720_v18 }
 0x4b7   :  { %4358 = vrcp.f32 %v2709_v53 }
 0x4c2   :  { %v4355_v18 = vpop.eup %4354 }
 0x4e0   :  { %v2646_v9 = vpop.f32.mrf.mxu0  ;;  %v2687_v27 = vpop.f32.mrf.mxu1 }
 0x4e1   :  { %v2698_v32 = vadd.f32 %v2646_v9, %v6982_v22  ;;  %v2700_v4 = vadd.f32 %v2687_v27, %v6983_v33  ;;  %v4357_v9 = vpop.eup %4356 }
 0x4e2   :  { %v2648_v19 = vpop.f32.mrf.mxu0  ;;  %v2689_v43 = vpop.f32.mrf.mxu1 }
 0x4e3   :  { %4360 = vtanh.f32 %v2698_v32  ;;  %v4161_v37 = vmul.f32 -1.442695, %v2700_v4  ;;  %v2699_v28 = vadd.f32 %v2648_v19, %v6984_v34  ;;  %v2701_v3 = vadd.f32 %v2689_v43, %v6985_v15  ;;  %v4359_v53 = vpop.eup %4358 }
 0x4e4   :  { %4362 = vrcp.f32 %v2721_v31  ;;  %v2650_v20 = vpop.f32.mrf.mxu0  ;;  %v2691_v24 = vpop.f32.mrf.mxu1  ;;  %v2740_v32 = vmul.f32 %v4357_v9, %v5512_v39 }
 0x4e5   :  { %4364 = vpow2.f32 %v4161_v37  ;;  %v4162_v26 = vmul.f32 -1.442695, %v2701_v3 }
 0x4e6   :  { %4366 = vtanh.f32 %v2699_v28  ;;  %v2651_v1 = vpop.f32.mrf.mxu0  ;;  %v2692_v49 = vpop.f32.mrf.mxu1 }
 0x4e7   :  { %4368 = vpow2.f32 %v4162_v26 }
 0x4f0   :  { %v4361_v27 = vpop.eup %4360 }
 0x4f1   :  { %v4363_v22 = vpop.eup %4362  ;;  %v2742_v33 = vmul.f32 %v4361_v27, %v4355_v18  ;;  %v6988_v27 = vld [vmem:[#allocation153_spill] sm:$0xff] }
 0x4f2   :  { %v4365_v4 = vpop.eup %4364  ;;  %v2741_v37 = vmul.f32 %v4363_v22, %v5516_v55  ;;  %v6989_v22 = vld [vmem:[#allocation154_spill] sm:$0xff] }
 0x4f3   :  { %v4367_v19 = vpop.eup %4366  ;;  %v5670_v43 = vadd.f32 %v2742_v33, %v2740_v32  ;;  %v2734_v31 = vadd.f32 1.0, %v4365_v4  ;;  %v6990_v32 = vld [vmem:[#allocation155_spill] sm:$0xff]  ;;  %v6991_v33 = vld [vmem:[#allocation156_spill] sm:$0xff]  ;;  %v6992_v4 = vld [vmem:[#allocation157_spill] sm:$0xff] }
 0x4f4   :  { %v4369_v34 = vpop.eup %4368  ;;  %v2743_v28 = vmul.f32 %v4367_v19, %v4359_v53  ;;  %v6993_v19 = vld [vmem:[#allocation158_spill] sm:$0xff] }
 0x4f5   :  { %4370 = vtanh.f32 %v5670_v43  ;;  %v2735_v15 = vadd.f32 1.0, %v4369_v34  ;;  %v6995_v34 = vld [vmem:[#allocation160_spill] sm:$0xff] }
 0x4f6   :  { %4372 = vrcp.f32 %v2734_v31  ;;  %v5674_v3 = vadd.f32 %v2743_v28, %v2741_v37  ;;  %v6994_v31 = vld [vmem:[#allocation159_spill] sm:$0xff]  ;;  %v6996_v37 = vld [vmem:[#allocation164_spill] sm:$0xff]  ;;  %v6997_v28 = vld [vmem:[#allocation165_spill] sm:$0xff] }
 0x4f7   :  { %4374 = vrcp.f32 %v2735_v15  ;;  %v6998_v15 = vld [vmem:[#allocation186_spill] sm:$0xff] }
 0x4f8   :  { %4376 = vtanh.f32 %v5674_v3 }
 0x502   :  { %v4371_v39 = vpop.eup %4370 }
 0x503   :  { %v4373_v20 = vpop.eup %4372 }
 0x504   :  { %v4375_v24 = vpop.eup %4374  ;;  %v2748_v26 = vmul.f32 %v4373_v20, %v4371_v39  ;;  %v6999_v39 = vld [vmem:[#allocation187_spill] sm:$0xff]  ;;  %v7000_v20 = vld [vmem:[#allocation188_spill] sm:$0xff] }
 0x505   :  { %v4377_v1 = vpop.eup %4376 }
 0x506   :  { %v2749_v49 = vmul.f32 %v4377_v1, %v4375_v24  ;;  %v5678_v18 = vadd.f32 %v2748_v26, %v5523_v58  ;;  %v5683_v53 = vpack.c.bf16 %v2748_v26, %v2748_v26  ;;  %v6986_v58 = vld [vmem:[#allocation151_spill] sm:$0xff]  ;;  %v7001_v24 = vld [vmem:[#allocation189_spill] sm:$0xff]  ;;  %v7002_v26 = vld [vmem:[#allocation190_spill] sm:$0xff] }
 0x507   :  { %v7003_v1 = vld [vmem:[#allocation191_spill] sm:$0xff] }
 0x508   :  { %v5681_v55 = vadd.f32 %v2749_v49, %v5525_v59  ;;  %v2761_v9 = vpack.c.bf16 %v2749_v49, %v2749_v49  ;;  %v6987_v59 = vld [vmem:[#allocation152_spill] sm:$0xff] }
 0x509   :  { %v7004_v49 = vld [vmem:[#allocation192_spill] sm:$0xff] }
 0x50a   :  { %2794 = vmatprep.mubr.bf16.mxu0 %v2761_v9  ;;  %2835 = vmatprep.mubr.bf16.mxu1 %v2761_v9 }
 0x50b   :  { %2795 = vmatmul.mubr.bf16.vlgmr.msra.gmra.mxu0 %v5683_v53  ;;  %2836 = vmatmul.mubr.bf16.vlgmr.msra.gmra.mxu1 %v5683_v53 }
 0x50c   :  { %2845 = vmatpush1.bf16.msra.mxu0 %v6792_v12  ;;  %2886 = vmatpush1.bf16.msra.mxu1 %v6793_v14 }
 0x50d   :  { %2876 = vmatprep.mubr.bf16.mxu0 %v2761_v9  ;;  %2917 = vmatprep.mubr.bf16.mxu1 %v2761_v9  ;;  %v7005_v9 = vld [vmem:[#allocation193_spill] sm:$0xff] }
 0x50e   :  { %2846 = vmatprep.subr.bf16.mxu0 %v6794_v36  ;;  %2887 = vmatprep.subr.bf16.mxu1 %v6795_v23 }
 0x510   :  { %2847 = vmatpush1.bf16.msra.mxu0 %v6796_v25  ;;  %2888 = vmatpush1.bf16.msra.mxu1 %v6797_v21 }
 0x511   :  { %2848 = vmatprep.subr.bf16.mxu0 %v6798_v11  ;;  %2889 = vmatprep.subr.bf16.mxu1 %v6889_v46 }
 0x514   :  { %2849 = vmatpush1.bf16.msra.mxu0 %v6890_v44  ;;  %2890 = vmatpush1.bf16.msra.mxu1 %v6891_v41 }
 0x515   :  { %2850 = vmatprep.subr.bf16.mxu0 %v6892_v40  ;;  %2891 = vmatprep.subr.bf16.mxu1 %v6893_v47 }
 0x518   :  { %2851 = vmatpush1.bf16.msra.mxu0 %v6894_v61  ;;  %2892 = vmatpush1.bf16.msra.mxu1 %v6895_v60 }
 0x519   :  { %2852 = vmatprep.subr.bf16.mxu0 %v6896_v8  ;;  %2893 = vmatprep.subr.bf16.mxu1 %v6897_v13 }
 0x51c   :  { %2853 = vmatpush1.bf16.msra.mxu0 %v6986_v58  ;;  %2894 = vmatpush1.bf16.msra.mxu1 %v6987_v59 }
 0x51d   :  { %2854 = vmatprep.subr.bf16.mxu0 %v6988_v27  ;;  %2895 = vmatprep.subr.bf16.mxu1 %v6989_v22 }
 0x520   :  { %2855 = vmatpush1.bf16.msra.mxu0 %v6990_v32  ;;  %2896 = vmatpush1.bf16.msra.mxu1 %v6991_v33 }
 0x521   :  { %2856 = vmatprep.subr.bf16.mxu0 %v6992_v4  ;;  %2897 = vmatprep.subr.bf16.mxu1 %v6993_v19 }
 0x524   :  { %2857 = vmatpush1.bf16.msra.mxu0 %v6994_v31  ;;  %2898 = vmatpush1.bf16.msra.mxu1 %v6995_v34 }
 0x525   :  { %2858 = vmatprep.subr.bf16.mxu0 %v6908_v63  ;;  %2899 = vmatprep.subr.bf16.mxu1 %v6909_v16 }
 0x528   :  { %2859 = vmatpush1.bf16.msra.mxu0 %v6910_v51  ;;  %2900 = vmatpush1.bf16.msra.mxu1 %v6996_v37 }
 0x529   :  { %2860 = vmatprep.subr.bf16.mxu0 %v6997_v28  ;;  %2901 = vmatprep.subr.bf16.mxu1 %v6913_v50 }
 0x52c   :  { %2861 = vmatpush2.bf16.msra.mxu0 %v6914_v7  ;;  %2902 = vmatpush2.bf16.msra.mxu1 %v6915_v48 }
 0x52d   :  { %2862 = vmatprep.subr.bf16.mxu0 %v6916_v42  ;;  %2903 = vmatprep.subr.bf16.mxu1 %v6917_v10 }
 0x530   :  { %2863 = vmatpush2.bf16.msra.mxu0 %v6918_v62  ;;  %2904 = vmatpush2.bf16.msra.mxu1 %v6829_v30 }
 0x531   :  { %2864 = vmatprep.subr.bf16.mxu0 %v6830_v38  ;;  %2905 = vmatprep.subr.bf16.mxu1 %v6831_v2 }
 0x534   :  { %2865 = vmatpush2.bf16.msra.mxu0 %v6919_v6  ;;  %2906 = vmatpush2.bf16.msra.mxu1 %v6920_v56 }
 0x535   :  { %2866 = vmatprep.subr.bf16.mxu0 %v6834_v17  ;;  %2907 = vmatprep.subr.bf16.mxu1 %v6835_v5  ;;  %v7077_v5 = vld [vmem:[#allocation91_spill] sm:$0xff] }
 0x538   :  { %2867 = vmatpush2.bf16.msra.mxu0 %v6836_v54  ;;  %2908 = vmatpush2.bf16.msra.mxu1 %v6837_v29  ;;  %v7075_v29 = vld [vmem:[#allocation89_spill] sm:$0xff]  ;;  %v7076_v54 = vld [vmem:[#allocation90_spill] sm:$0xff] }
 0x539   :  { %2868 = vmatprep.subr.bf16.mxu0 %v6838_v57  ;;  %2909 = vmatprep.subr.bf16.mxu1 %v6839_v35 }
 0x53c   :  { %2869 = vmatpush2.bf16.msra.mxu0 %v5227_v0  ;;  %2910 = vmatpush2.bf16.msra.mxu1 %v5229_v45  ;;  %v7006_v0 = vld [vmem:[#allocation194_spill] sm:$0xff]  ;;  %v7007_v45 = vld [vmem:[#allocation195_spill] sm:$0xff] }
 0x53d   :  { %2870 = vmatprep.subr.bf16.mxu0 %v5233_v52  ;;  %2911 = vmatprep.subr.bf16.mxu1 %v6998_v15  ;;  %v7008_v52 = vld [vmem:[#allocation196_spill] sm:$0xff]  ;;  %v7009_v15 = vld [vmem:[#allocation9_spill] sm:$0xff] }
 0x540   :  { %2871 = vmatpush2.bf16.msra.mxu0 %v6999_v39  ;;  %2912 = vmatpush2.bf16.msra.mxu1 %v7000_v20  ;;  %v7010_v39 = vld [vmem:[#allocation11_spill] sm:$0xff] }
 0x541   :  { %2872 = vmatprep.subr.bf16.mxu0 %v7001_v24  ;;  %2913 = vmatprep.subr.bf16.mxu1 %v7002_v26  ;;  %v7011_v26 = vld [vmem:[#allocation10_spill] sm:$0xff]  ;;  %v7020_v24 = vld [vmem:[#allocation20_spill] sm:$0xff] }
 0x544   :  { %2873 = vmatpush2.bf16.msra.mxu0 %v7003_v1  ;;  %2914 = vmatpush2.bf16.msra.mxu1 %v7004_v49  ;;  %v7012_v1 = vld [vmem:[#allocation12_spill] sm:$0xff]  ;;  %v7013_v49 = vld [vmem:[#allocation13_spill] sm:$0xff] }
 0x545   :  { %2874 = vmatprep.subr.bf16.mxu0 %v7005_v9  ;;  %2915 = vmatprep.subr.bf16.mxu1 %v7006_v0  ;;  %v7014_v9 = vld [vmem:[#allocation14_spill] sm:$0xff]  ;;  %v7015_v0 = vld [vmem:[#allocation15_spill] sm:$0xff] }
 0x548   :  { %2875 = vmatpush2.bf16.msra.mxu0 %v7007_v45  ;;  %2916 = vmatpush2.bf16.msra.mxu1 %v7008_v52  ;;  %v7016_v45 = vld [vmem:[#allocation16_spill] sm:$0xff]  ;;  %v7017_v52 = vld [vmem:[#allocation17_spill] sm:$0xff] }
 0x549   :  { %2994 = vmatprep.subr.bf16.mxu0 %v7009_v15  ;;  %3035 = vmatprep.subr.bf16.mxu1 %v7010_v39  ;;  %v7018_v15 = vld [vmem:[#allocation18_spill] sm:$0xff]  ;;  %v7019_v39 = vld [vmem:[#allocation19_spill] sm:$0xff] }
 0x54b   :  { %2877 = vmatmul.mubr.bf16.vlgmr.msra.gmra.mxu0 %v5683_v53  ;;  %2918 = vmatmul.mubr.bf16.vlgmr.msra.gmra.mxu1 %v5683_v53  ;;  %v7021_v53 = vld [vmem:[#allocation21_spill] sm:$0xff] }
 0x54c   :  { %2995 = vmatpush1.bf16.msra.mxu0 %v7011_v26  ;;  %3036 = vmatpush1.bf16.msra.mxu1 %v7012_v1  ;;  %v7022_v26 = vld [vmem:[#allocation22_spill] sm:$0xff]  ;;  %v7023_v1 = vld [vmem:[#allocation23_spill] sm:$0xff] }
 0x54d   :  { %2996 = vmatprep.subr.bf16.mxu0 %v7013_v49  ;;  %3037 = vmatprep.subr.bf16.mxu1 %v7014_v9  ;;  %v7024_v49 = vld [vmem:[#allocation24_spill] sm:$0xff]  ;;  %v7025_v9 = vld [vmem:[#allocation25_spill] sm:$0xff] }
 0x550   :  { %2997 = vmatpush1.bf16.msra.mxu0 %v7015_v0  ;;  %3038 = vmatpush1.bf16.msra.mxu1 %v7016_v45  ;;  %v7026_v0 = vld [vmem:[#allocation26_spill] sm:$0xff]  ;;  %v7027_v45 = vld [vmem:[#allocation27_spill] sm:$0xff] }
 0x551   :  { %2998 = vmatprep.subr.bf16.mxu0 %v7017_v52  ;;  %3039 = vmatprep.subr.bf16.mxu1 %v7018_v15  ;;  %v7028_v52 = vld [vmem:[#allocation28_spill] sm:$0xff]  ;;  %v7029_v15 = vld [vmem:[#allocation29_spill] sm:$0xff] }
 0x554   :  { %2999 = vmatpush1.bf16.msra.mxu0 %v7019_v39  ;;  %3040 = vmatpush1.bf16.msra.mxu1 %v7020_v24  ;;  %v7030_v39 = vld [vmem:[#allocation30_spill] sm:$0xff]  ;;  %v7031_v24 = vld [vmem:[#allocation31_spill] sm:$0xff] }
 0x555   :  { %3000 = vmatprep.subr.bf16.mxu0 %v7021_v53  ;;  %3041 = vmatprep.subr.bf16.mxu1 %v7022_v26  ;;  %v7032_v53 = vld [vmem:[#allocation32_spill] sm:$0xff]  ;;  %v7033_v26 = vld [vmem:[#allocation33_spill] sm:$0xff] }
 0x558   :  { %3001 = vmatpush1.bf16.msra.mxu0 %v7023_v1  ;;  %3042 = vmatpush1.bf16.msra.mxu1 %v7024_v49  ;;  %v7034_v1 = vld [vmem:[#allocation34_spill] sm:$0xff]  ;;  %v7035_v49 = vld [vmem:[#allocation35_spill] sm:$0xff] }
 0x559   :  { %3002 = vmatprep.subr.bf16.mxu0 %v7025_v9  ;;  %3043 = vmatprep.subr.bf16.mxu1 %v7026_v0  ;;  %v7036_v9 = vld [vmem:[#allocation36_spill] sm:$0xff]  ;;  %v7037_v0 = vld [vmem:[#allocation37_spill] sm:$0xff] }
 0x55c   :  { %3003 = vmatpush1.bf16.msra.mxu0 %v7027_v45  ;;  %3044 = vmatpush1.bf16.msra.mxu1 %v7028_v52  ;;  %v7038_v45 = vld [vmem:[#allocation38_spill] sm:$0xff]  ;;  %v7039_v52 = vld [vmem:[#allocation39_spill] sm:$0xff] }
 0x55d   :  { %3004 = vmatprep.subr.bf16.mxu0 %v7029_v15  ;;  %3045 = vmatprep.subr.bf16.mxu1 %v7030_v39  ;;  %v7040_v15 = vld [vmem:[#allocation40_spill] sm:$0xff]  ;;  %v7041_v39 = vld [vmem:[#allocation41_spill] sm:$0xff] }
 0x560   :  { %3005 = vmatpush1.bf16.msra.mxu0 %v7031_v24  ;;  %3046 = vmatpush1.bf16.msra.mxu1 %v7032_v53  ;;  %v7042_v24 = vld [vmem:[#allocation42_spill] sm:$0xff]  ;;  %v7043_v53 = vld [vmem:[#allocation43_spill] sm:$0xff] }
 0x561   :  { %3006 = vmatprep.subr.bf16.mxu0 %v7033_v26  ;;  %3047 = vmatprep.subr.bf16.mxu1 %v7034_v1  ;;  %v7044_v26 = vld [vmem:[#allocation44_spill] sm:$0xff]  ;;  %v7045_v1 = vld [vmem:[#allocation45_spill] sm:$0xff] }
 0x564   :  { %3007 = vmatpush1.bf16.msra.mxu0 %v7035_v49  ;;  %3048 = vmatpush1.bf16.msra.mxu1 %v7036_v9  ;;  %v7046_v49 = vld [vmem:[#allocation46_spill] sm:$0xff]  ;;  %v7047_v9 = vld [vmem:[#allocation47_spill] sm:$0xff] }
 0x565   :  { %3008 = vmatprep.subr.bf16.mxu0 %v7037_v0  ;;  %3049 = vmatprep.subr.bf16.mxu1 %v7038_v45  ;;  %v7048_v0 = vld [vmem:[#allocation48_spill] sm:$0xff]  ;;  %v7049_v45 = vld [vmem:[#allocation49_spill] sm:$0xff] }
 0x568   :  { %3009 = vmatpush1.bf16.msra.mxu0 %v7039_v52  ;;  %3050 = vmatpush1.bf16.msra.mxu1 %v7040_v15  ;;  %v7050_v52 = vld [vmem:[#allocation50_spill] sm:$0xff]  ;;  %v7051_v15 = vld [vmem:[#allocation51_spill] sm:$0xff] }
 0x569   :  { %3010 = vmatprep.subr.bf16.mxu0 %v7041_v39  ;;  %3051 = vmatprep.subr.bf16.mxu1 %v7042_v24  ;;  %v7052_v39 = vld [vmem:[#allocation52_spill] sm:$0xff]  ;;  %v7053_v24 = vld [vmem:[#allocation53_spill] sm:$0xff] }
 0x56c   :  { %3011 = vmatpush2.bf16.msra.mxu0 %v7043_v53  ;;  %3052 = vmatpush2.bf16.msra.mxu1 %v7044_v26  ;;  %v7054_v53 = vld [vmem:[#allocation54_spill] sm:$0xff]  ;;  %v7055_v26 = vld [vmem:[#allocation55_spill] sm:$0xff] }
 0x56d   :  { %3012 = vmatprep.subr.bf16.mxu0 %v7045_v1  ;;  %3053 = vmatprep.subr.bf16.mxu1 %v7046_v49  ;;  %v7056_v1 = vld [vmem:[#allocation56_spill] sm:$0xff]  ;;  %v7057_v49 = vld [vmem:[#allocation57_spill] sm:$0xff] }
 0x570   :  { %3013 = vmatpush2.bf16.msra.mxu0 %v7047_v9  ;;  %3054 = vmatpush2.bf16.msra.mxu1 %v7048_v0  ;;  %v7058_v9 = vld [vmem:[#allocation59_spill] sm:$0xff]  ;;  %v7059_v0 = vld [vmem:[#allocation58_spill] sm:$0xff] }
 0x571   :  { %3014 = vmatprep.subr.bf16.mxu0 %v7049_v45  ;;  %3055 = vmatprep.subr.bf16.mxu1 %v7050_v52  ;;  %v7060_v45 = vld [vmem:[#allocation60_spill] sm:$0xff]  ;;  %v7061_v52 = vld [vmem:[#allocation61_spill] sm:$0xff] }
 0x574   :  { %3015 = vmatpush2.bf16.msra.mxu0 %v7051_v15  ;;  %3056 = vmatpush2.bf16.msra.mxu1 %v7052_v39  ;;  %v7062_v15 = vld [vmem:[#allocation62_spill] sm:$0xff]  ;;  %v7063_v39 = vld [vmem:[#allocation63_spill] sm:$0xff] }
 0x575   :  { %3016 = vmatprep.subr.bf16.mxu0 %v7053_v24  ;;  %3057 = vmatprep.subr.bf16.mxu1 %v7054_v53  ;;  %v7064_v24 = vld [vmem:[#allocation64_spill] sm:$0xff]  ;;  %v7065_v53 = vld [vmem:[#allocation65_spill] sm:$0xff] }
 0x578   :  { %3017 = vmatpush2.bf16.msra.mxu0 %v7055_v26  ;;  %3058 = vmatpush2.bf16.msra.mxu1 %v7056_v1  ;;  %v7066_v26 = vld [vmem:[#allocation66_spill] sm:$0xff]  ;;  %v7067_v1 = vld [vmem:[#allocation67_spill] sm:$0xff] }
 0x579   :  { %3018 = vmatprep.subr.bf16.mxu0 %v7057_v49  ;;  %3059 = vmatprep.subr.bf16.mxu1 %v7058_v9  ;;  %v7068_v49 = vld [vmem:[#allocation68_spill] sm:$0xff]  ;;  %v7069_v9 = vld [vmem:[#allocation69_spill] sm:$0xff] }
 0x57c   :  { %3019 = vmatpush2.bf16.msra.mxu0 %v7059_v0  ;;  %3060 = vmatpush2.bf16.msra.mxu1 %v7060_v45  ;;  %v7070_v0 = vld [vmem:[#allocation70_spill] sm:$0xff]  ;;  %v7071_v45 = vld [vmem:[#allocation71_spill] sm:$0xff] }
 0x57d   :  { %3020 = vmatprep.subr.bf16.mxu0 %v7061_v52  ;;  %3061 = vmatprep.subr.bf16.mxu1 %v7062_v15  ;;  %v7072_v52 = vld [vmem:[#allocation72_spill] sm:$0xff]  ;;  %v7073_v15 = vld [vmem:[#allocation73_spill] sm:$0xff] }
 0x580   :  { %3021 = vmatpush2.bf16.msra.mxu0 %v7063_v39  ;;  %3062 = vmatpush2.bf16.msra.mxu1 %v7064_v24  ;;  %v7074_v39 = vld [vmem:[#allocation74_spill] sm:$0xff] }
 0x581   :  { %3022 = vmatprep.subr.bf16.mxu0 %v7065_v53  ;;  %3063 = vmatprep.subr.bf16.mxu1 %v7066_v26 }
 0x584   :  { %3023 = vmatpush2.bf16.msra.mxu0 %v7067_v1  ;;  %3064 = vmatpush2.bf16.msra.mxu1 %v7068_v49 }
 0x585   :  { %3024 = vmatprep.subr.bf16.mxu0 %v7069_v9  ;;  %3065 = vmatprep.subr.bf16.mxu1 %v7070_v0 }
 0x588   :  { %3025 = vmatpush2.bf16.msra.mxu0 %v7071_v45  ;;  %3066 = vmatpush2.bf16.msra.mxu1 %v7072_v52  ;;  %v7078_v52 = vld [vmem:[#allocation92_spill] sm:$0xff] }
 0x589   :  { %3076 = vmatprep.subr.bf16.mxu0 %v7073_v15  ;;  %3117 = vmatprep.subr.bf16.mxu1 %v7074_v39 }
 0x5cb   :  { %v2796_v24 = vpop.f32.mrf.mxu0  ;;  %v2837_v53 = vpop.f32.mrf.mxu1 }
 0x5cc   :  { %v2926_v9 = vadd.f32 %v2796_v24, %v7075_v29  ;;  %v2928_v0 = vadd.f32 %v2837_v53, %v7076_v54 }
 0x5cd   :  { %v2798_v20 = vpop.f32.mrf.mxu0  ;;  %v2839_v26 = vpop.f32.mrf.mxu1 }
 0x5ce   :  { %v2927_v45 = vadd.f32 %v2798_v20, %v7077_v5  ;;  %v4163_v17 = vmul.f32 -1.442695, %v2926_v9  ;;  %v2929_v56 = vadd.f32 %v2839_v26, %v7078_v52  ;;  %v4165_v15 = vmul.f32 -1.442695, %v2928_v0  ;;  %v7079_v52 = vld [vmem:[#allocation120_spill] sm:$0xff] }
 0x5cf   :  { %v2800_v35 = vpop.f32.mrf.mxu0  ;;  %v2841_v1 = vpop.f32.mrf.mxu1  ;;  %v7082_v9 = vld [vmem:[#allocation124_spill] sm:$0xff] }
 0x5d0   :  { %v4164_v6 = vmul.f32 -1.442695, %v2927_v45  ;;  %4378 = vpow2.f32 %v4163_v17  ;;  %v4166_v39 = vmul.f32 -1.442695, %v2929_v56  ;;  %v7080_v45 = vld [vmem:[#allocation121_spill] sm:$0xff] }
 0x5d1   :  { %v2801_v57 = vpop.f32.mrf.mxu0  ;;  %v2842_v49 = vpop.f32.mrf.mxu1  ;;  %4380 = vpow2.f32 %v4165_v15 }
 0x5d2   :  { %4382 = vpow2.f32 %v4164_v6 }
 0x5d3   :  { %4384 = vpow2.f32 %v4166_v39  ;;  %v7081_v39 = vld [vmem:[#allocation123_spill] sm:$0xff] }
 0x5dd   :  { %v4379_v35 = vpop.eup %4378 }
 0x5de   :  { %v4381_v1 = vpop.eup %4380  ;;  %v2940_v49 = vadd.f32 1.0, %v4379_v35 }
 0x5df   :  { %v4383_v57 = vpop.eup %4382  ;;  %v2952_v29 = vadd.f32 1.0, %v4381_v1 }
 0x5e0   :  { %v4385_v2 = vpop.eup %4384  ;;  %v2941_v24 = vadd.f32 1.0, %v4383_v57  ;;  %4386 = vrcp.f32 %v2940_v49 }
 0x5e1   :  { %v2953_v54 = vadd.f32 1.0, %v4385_v2  ;;  %4388 = vrcp.f32 %v2952_v29 }
 0x5e2   :  { %4390 = vrcp.f32 %v2941_v24 }
 0x5ed   :  { %v4387_v29 = vpop.eup %4386 }
 0x60b   :  { %v2878_v5 = vpop.f32.mrf.mxu0  ;;  %v2919_v20 = vpop.f32.mrf.mxu1 }
 0x60c   :  { %v2930_v0 = vadd.f32 %v2878_v5, %v7079_v52  ;;  %v2932_v17 = vadd.f32 %v2919_v20, %v7080_v45  ;;  %v4389_v5 = vpop.eup %4388 }
 0x60d   :  { %v2880_v56 = vpop.f32.mrf.mxu0  ;;  %v2921_v6 = vpop.f32.mrf.mxu1 }
 0x60e   :  { %4392 = vtanh.f32 %v2930_v0  ;;  %v4167_v15 = vmul.f32 -1.442695, %v2932_v17  ;;  %v2931_v26 = vadd.f32 %v2880_v56, %v7081_v39  ;;  %v2933_v53 = vadd.f32 %v2921_v6, %v7082_v9  ;;  %v4391_v24 = vpop.eup %4390 }
 0x60f   :  { %4394 = vrcp.f32 %v2953_v54  ;;  %v2882_v35 = vpop.f32.mrf.mxu0  ;;  %v2923_v1 = vpop.f32.mrf.mxu1  ;;  %v2972_v0 = vmul.f32 %v4389_v5, %v5670_v43 }
 0x610   :  { %4396 = vpow2.f32 %v4167_v15  ;;  %v4168_v2 = vmul.f32 -1.442695, %v2933_v53 }
 0x611   :  { %4398 = vtanh.f32 %v2931_v26  ;;  %v2883_v57 = vpop.f32.mrf.mxu0  ;;  %v2924_v49 = vpop.f32.mrf.mxu1 }
 0x612   :  { %4400 = vpow2.f32 %v4168_v2 }
 0x61b   :  { %v4393_v20 = vpop.eup %4392 }
 0x61c   :  { %v4395_v52 = vpop.eup %4394  ;;  %v2974_v45 = vmul.f32 %v4393_v20, %v4387_v29  ;;  %v7085_v20 = vld [vmem:[#allocation176_spill] sm:$0xff] }
 0x61d   :  { %v4397_v17 = vpop.eup %4396  ;;  %v2973_v15 = vmul.f32 %v4395_v52, %v5674_v3  ;;  %v7086_v52 = vld [vmem:[#allocation177_spill] sm:$0xff] }
 0x61e   :  { %v4399_v56 = vpop.eup %4398  ;;  %v5826_v6 = vadd.f32 %v2974_v45, %v2972_v0  ;;  %v2966_v54 = vadd.f32 1.0, %v4397_v17  ;;  %v7087_v0 = vld [vmem:[#allocation178_spill] sm:$0xff]  ;;  %v7088_v45 = vld [vmem:[#allocation179_spill] sm:$0xff]  ;;  %v7089_v17 = vld [vmem:[#allocation180_spill] sm:$0xff] }
 0x61f   :  { %v4401_v39 = vpop.eup %4400  ;;  %v2975_v26 = vmul.f32 %v4399_v56, %v4391_v24  ;;  %v7090_v56 = vld [vmem:[#allocation181_spill] sm:$0xff] }
 0x620   :  { %4402 = vtanh.f32 %v5826_v6  ;;  %v2967_v9 = vadd.f32 1.0, %v4401_v39  ;;  %v7092_v39 = vld [vmem:[#allocation183_spill] sm:$0xff] }
 0x621   :  { %4404 = vrcp.f32 %v2966_v54  ;;  %v5830_v53 = vadd.f32 %v2975_v26, %v2973_v15  ;;  %v7091_v54 = vld [vmem:[#allocation182_spill] sm:$0xff]  ;;  %v7093_v15 = vld [vmem:[#allocation184_spill] sm:$0xff]  ;;  %v7094_v26 = vld [vmem:[#allocation185_spill] sm:$0xff] }
 0x622   :  { %4406 = vrcp.f32 %v2967_v9  ;;  %v7095_v9 = vld [vmem:[#allocation186_spill] sm:$0xff] }
 0x623   :  { %4408 = vtanh.f32 %v5830_v53 }
 0x62d   :  { %v4403_v43 = vpop.eup %4402 }
 0x62e   :  { %v4405_v35 = vpop.eup %4404 }
 0x62f   :  { %v4407_v1 = vpop.eup %4406  ;;  %v2980_v2 = vmul.f32 %v4405_v35, %v4403_v43  ;;  %v7096_v43 = vld [vmem:[#allocation187_spill] sm:$0xff]  ;;  %v7097_v35 = vld [vmem:[#allocation188_spill] sm:$0xff] }
 0x630   :  { %v4409_v57 = vpop.eup %4408 }
 0x631   :  { %v2981_v49 = vmul.f32 %v4409_v57, %v4407_v1  ;;  %v5834_v29 = vadd.f32 %v2980_v2, %v5678_v18  ;;  %v5839_v24 = vpack.c.bf16 %v2980_v2, %v2980_v2  ;;  %v7083_v18 = vld [vmem:[#allocation174_spill] sm:$0xff]  ;;  %v7098_v1 = vld [vmem:[#allocation189_spill] sm:$0xff]  ;;  %v7100_v57 = vld [vmem:[#allocation191_spill] sm:$0xff] }
 0x632   :  { %v7099_v2 = vld [vmem:[#allocation190_spill] sm:$0xff] }
 0x633   :  { %v2993_v3 = vpack.c.bf16 %v2981_v49, %v2981_v49  ;;  %v5837_v5 = vadd.f32 %v2981_v49, %v5681_v55  ;;  %v7084_v55 = vld [vmem:[#allocation175_spill] sm:$0xff]  ;;  %v7101_v49 = vld [vmem:[#allocation192_spill] sm:$0xff] }
 0x635   :  { %3026 = vmatprep.mubr.bf16.mxu0 %v2993_v3  ;;  %3067 = vmatprep.mubr.bf16.mxu1 %v2993_v3 }
 0x636   :  { %3027 = vmatmul.mubr.bf16.vlgmr.msra.gmra.mxu0 %v5839_v24  ;;  %3068 = vmatmul.mubr.bf16.vlgmr.msra.gmra.mxu1 %v5839_v24 }
 0x637   :  { %3077 = vmatpush1.bf16.msra.mxu0 %v6792_v12  ;;  %3118 = vmatpush1.bf16.msra.mxu1 %v6793_v14 }
 0x638   :  { %3108 = vmatprep.mubr.bf16.mxu0 %v2993_v3  ;;  %3149 = vmatprep.mubr.bf16.mxu1 %v2993_v3  ;;  %v7102_v3 = vld [vmem:[#allocation193_spill] sm:$0xff] }
 0x639   :  { %3078 = vmatprep.subr.bf16.mxu0 %v6794_v36  ;;  %3119 = vmatprep.subr.bf16.mxu1 %v6795_v23 }
 0x63b   :  { %3079 = vmatpush1.bf16.msra.mxu0 %v6796_v25  ;;  %3120 = vmatpush1.bf16.msra.mxu1 %v6797_v21 }
 0x63c   :  { %3080 = vmatprep.subr.bf16.mxu0 %v6798_v11  ;;  %3121 = vmatprep.subr.bf16.mxu1 %v6889_v46 }
 0x63f   :  { %3081 = vmatpush1.bf16.msra.mxu0 %v6890_v44  ;;  %3122 = vmatpush1.bf16.msra.mxu1 %v6891_v41 }
 0x640   :  { %3082 = vmatprep.subr.bf16.mxu0 %v6892_v40  ;;  %3123 = vmatprep.subr.bf16.mxu1 %v6893_v47 }
 0x643   :  { %3083 = vmatpush1.bf16.msra.mxu0 %v6894_v61  ;;  %3124 = vmatpush1.bf16.msra.mxu1 %v6895_v60 }
 0x644   :  { %3084 = vmatprep.subr.bf16.mxu0 %v6896_v8  ;;  %3125 = vmatprep.subr.bf16.mxu1 %v6897_v13 }
 0x647   :  { %3085 = vmatpush1.bf16.msra.mxu0 %v6986_v58  ;;  %3126 = vmatpush1.bf16.msra.mxu1 %v6987_v59 }
 0x648   :  { %3086 = vmatprep.subr.bf16.mxu0 %v6988_v27  ;;  %3127 = vmatprep.subr.bf16.mxu1 %v6989_v22 }
 0x64b   :  { %3087 = vmatpush1.bf16.msra.mxu0 %v6990_v32  ;;  %3128 = vmatpush1.bf16.msra.mxu1 %v6991_v33 }
 0x64c   :  { %3088 = vmatprep.subr.bf16.mxu0 %v6992_v4  ;;  %3129 = vmatprep.subr.bf16.mxu1 %v6993_v19 }
 0x64f   :  { %3089 = vmatpush1.bf16.msra.mxu0 %v6994_v31  ;;  %3130 = vmatpush1.bf16.msra.mxu1 %v6995_v34 }
 0x650   :  { %3090 = vmatprep.subr.bf16.mxu0 %v6908_v63  ;;  %3131 = vmatprep.subr.bf16.mxu1 %v6909_v16 }
 0x653   :  { %3091 = vmatpush1.bf16.msra.mxu0 %v6910_v51  ;;  %3132 = vmatpush1.bf16.msra.mxu1 %v6996_v37 }
 0x654   :  { %3092 = vmatprep.subr.bf16.mxu0 %v6997_v28  ;;  %3133 = vmatprep.subr.bf16.mxu1 %v6913_v50 }
 0x657   :  { %3093 = vmatpush2.bf16.msra.mxu0 %v6914_v7  ;;  %3134 = vmatpush2.bf16.msra.mxu1 %v6915_v48 }
 0x658   :  { %3094 = vmatprep.subr.bf16.mxu0 %v6916_v42  ;;  %3135 = vmatprep.subr.bf16.mxu1 %v6917_v10 }
 0x65b   :  { %3095 = vmatpush2.bf16.msra.mxu0 %v6918_v62  ;;  %3136 = vmatpush2.bf16.msra.mxu1 %v6829_v30 }
 0x65c   :  { %3096 = vmatprep.subr.bf16.mxu0 %v6830_v38  ;;  %3137 = vmatprep.subr.bf16.mxu1 %v7083_v18 }
 0x65f   :  { %3097 = vmatpush2.bf16.msra.mxu0 %v7084_v55  ;;  %3138 = vmatpush2.bf16.msra.mxu1 %v7085_v20 }
 0x660   :  { %3098 = vmatprep.subr.bf16.mxu0 %v7086_v52  ;;  %3139 = vmatprep.subr.bf16.mxu1 %v7087_v0  ;;  %v7174_v0 = vld [vmem:[#allocation95_spill] sm:$0xff] }
 0x663   :  { %3099 = vmatpush2.bf16.msra.mxu0 %v7088_v45  ;;  %3140 = vmatpush2.bf16.msra.mxu1 %v7089_v17  ;;  %v7172_v17 = vld [vmem:[#allocation93_spill] sm:$0xff]  ;;  %v7173_v45 = vld [vmem:[#allocation94_spill] sm:$0xff] }
 0x664   :  { %3100 = vmatprep.subr.bf16.mxu0 %v7090_v56  ;;  %3141 = vmatprep.subr.bf16.mxu1 %v7091_v54 }
 0x667   :  { %3101 = vmatpush2.bf16.msra.mxu0 %v7092_v39  ;;  %3142 = vmatpush2.bf16.msra.mxu1 %v7093_v15  ;;  %v7103_v39 = vld [vmem:[#allocation194_spill] sm:$0xff]  ;;  %v7104_v15 = vld [vmem:[#allocation195_spill] sm:$0xff] }
 0x668   :  { %3102 = vmatprep.subr.bf16.mxu0 %v7094_v26  ;;  %3143 = vmatprep.subr.bf16.mxu1 %v7095_v9  ;;  %v7105_v26 = vld [vmem:[#allocation196_spill] sm:$0xff]  ;;  %v7106_v9 = vld [vmem:[#allocation9_spill] sm:$0xff] }
 0x66b   :  { %3103 = vmatpush2.bf16.msra.mxu0 %v7096_v43  ;;  %3144 = vmatpush2.bf16.msra.mxu1 %v7097_v35  ;;  %v7107_v43 = vld [vmem:[#allocation11_spill] sm:$0xff] }
 0x66c   :  { %3104 = vmatprep.subr.bf16.mxu0 %v7098_v1  ;;  %3145 = vmatprep.subr.bf16.mxu1 %v7099_v2  ;;  %v7108_v2 = vld [vmem:[#allocation10_spill] sm:$0xff]  ;;  %v7117_v1 = vld [vmem:[#allocation20_spill] sm:$0xff] }
 0x66f   :  { %3105 = vmatpush2.bf16.msra.mxu0 %v7100_v57  ;;  %3146 = vmatpush2.bf16.msra.mxu1 %v7101_v49  ;;  %v7109_v57 = vld [vmem:[#allocation12_spill] sm:$0xff]  ;;  %v7110_v49 = vld [vmem:[#allocation13_spill] sm:$0xff] }
 0x670   :  { %3106 = vmatprep.subr.bf16.mxu0 %v7102_v3  ;;  %3147 = vmatprep.subr.bf16.mxu1 %v7103_v39  ;;  %v7111_v3 = vld [vmem:[#allocation14_spill] sm:$0xff]  ;;  %v7112_v39 = vld [vmem:[#allocation15_spill] sm:$0xff] }
 0x673   :  { %3107 = vmatpush2.bf16.msra.mxu0 %v7104_v15  ;;  %3148 = vmatpush2.bf16.msra.mxu1 %v7105_v26  ;;  %v7113_v15 = vld [vmem:[#allocation16_spill] sm:$0xff]  ;;  %v7114_v26 = vld [vmem:[#allocation17_spill] sm:$0xff] }
 0x674   :  { %3226 = vmatprep.subr.bf16.mxu0 %v7106_v9  ;;  %3267 = vmatprep.subr.bf16.mxu1 %v7107_v43  ;;  %v7115_v9 = vld [vmem:[#allocation18_spill] sm:$0xff]  ;;  %v7116_v43 = vld [vmem:[#allocation19_spill] sm:$0xff] }
 0x676   :  { %3109 = vmatmul.mubr.bf16.vlgmr.msra.gmra.mxu0 %v5839_v24  ;;  %3150 = vmatmul.mubr.bf16.vlgmr.msra.gmra.mxu1 %v5839_v24  ;;  %v7118_v24 = vld [vmem:[#allocation21_spill] sm:$0xff] }
 0x677   :  { %3227 = vmatpush1.bf16.msra.mxu0 %v7108_v2  ;;  %3268 = vmatpush1.bf16.msra.mxu1 %v7109_v57  ;;  %v7119_v2 = vld [vmem:[#allocation22_spill] sm:$0xff]  ;;  %v7120_v57 = vld [vmem:[#allocation23_spill] sm:$0xff] }
 0x678   :  { %3228 = vmatprep.subr.bf16.mxu0 %v7110_v49  ;;  %3269 = vmatprep.subr.bf16.mxu1 %v7111_v3  ;;  %v7121_v49 = vld [vmem:[#allocation24_spill] sm:$0xff]  ;;  %v7122_v3 = vld [vmem:[#allocation25_spill] sm:$0xff] }
 0x67b   :  { %3229 = vmatpush1.bf16.msra.mxu0 %v7112_v39  ;;  %3270 = vmatpush1.bf16.msra.mxu1 %v7113_v15  ;;  %v7123_v39 = vld [vmem:[#allocation26_spill] sm:$0xff]  ;;  %v7124_v15 = vld [vmem:[#allocation27_spill] sm:$0xff] }
 0x67c   :  { %3230 = vmatprep.subr.bf16.mxu0 %v7114_v26  ;;  %3271 = vmatprep.subr.bf16.mxu1 %v7115_v9  ;;  %v7125_v26 = vld [vmem:[#allocation28_spill] sm:$0xff]  ;;  %v7126_v9 = vld [vmem:[#allocation29_spill] sm:$0xff] }
 0x67f   :  { %3231 = vmatpush1.bf16.msra.mxu0 %v7116_v43  ;;  %3272 = vmatpush1.bf16.msra.mxu1 %v7117_v1  ;;  %v7127_v43 = vld [vmem:[#allocation30_spill] sm:$0xff]  ;;  %v7128_v1 = vld [vmem:[#allocation31_spill] sm:$0xff] }
 0x680   :  { %3232 = vmatprep.subr.bf16.mxu0 %v7118_v24  ;;  %3273 = vmatprep.subr.bf16.mxu1 %v7119_v2  ;;  %v7129_v24 = vld [vmem:[#allocation32_spill] sm:$0xff]  ;;  %v7130_v2 = vld [vmem:[#allocation33_spill] sm:$0xff] }
 0x683   :  { %3233 = vmatpush1.bf16.msra.mxu0 %v7120_v57  ;;  %3274 = vmatpush1.bf16.msra.mxu1 %v7121_v49  ;;  %v7131_v57 = vld [vmem:[#allocation34_spill] sm:$0xff]  ;;  %v7132_v49 = vld [vmem:[#allocation35_spill] sm:$0xff] }
 0x684   :  { %3234 = vmatprep.subr.bf16.mxu0 %v7122_v3  ;;  %3275 = vmatprep.subr.bf16.mxu1 %v7123_v39  ;;  %v7133_v3 = vld [vmem:[#allocation36_spill] sm:$0xff]  ;;  %v7134_v39 = vld [vmem:[#allocation37_spill] sm:$0xff] }
 0x687   :  { %3235 = vmatpush1.bf16.msra.mxu0 %v7124_v15  ;;  %3276 = vmatpush1.bf16.msra.mxu1 %v7125_v26  ;;  %v7135_v15 = vld [vmem:[#allocation38_spill] sm:$0xff]  ;;  %v7136_v26 = vld [vmem:[#allocation39_spill] sm:$0xff] }
 0x688   :  { %3236 = vmatprep.subr.bf16.mxu0 %v7126_v9  ;;  %3277 = vmatprep.subr.bf16.mxu1 %v7127_v43  ;;  %v7137_v9 = vld [vmem:[#allocation40_spill] sm:$0xff]  ;;  %v7138_v43 = vld [vmem:[#allocation41_spill] sm:$0xff] }
 0x68b   :  { %3237 = vmatpush1.bf16.msra.mxu0 %v7128_v1  ;;  %3278 = vmatpush1.bf16.msra.mxu1 %v7129_v24  ;;  %v7139_v1 = vld [vmem:[#allocation42_spill] sm:$0xff]  ;;  %v7140_v24 = vld [vmem:[#allocation43_spill] sm:$0xff] }
 0x68c   :  { %3238 = vmatprep.subr.bf16.mxu0 %v7130_v2  ;;  %3279 = vmatprep.subr.bf16.mxu1 %v7131_v57  ;;  %v7141_v2 = vld [vmem:[#allocation44_spill] sm:$0xff]  ;;  %v7142_v57 = vld [vmem:[#allocation45_spill] sm:$0xff] }
 0x68f   :  { %3239 = vmatpush1.bf16.msra.mxu0 %v7132_v49  ;;  %3280 = vmatpush1.bf16.msra.mxu1 %v7133_v3  ;;  %v7143_v49 = vld [vmem:[#allocation46_spill] sm:$0xff]  ;;  %v7144_v3 = vld [vmem:[#allocation47_spill] sm:$0xff] }
 0x690   :  { %3240 = vmatprep.subr.bf16.mxu0 %v7134_v39  ;;  %3281 = vmatprep.subr.bf16.mxu1 %v7135_v15  ;;  %v7145_v39 = vld [vmem:[#allocation48_spill] sm:$0xff]  ;;  %v7146_v15 = vld [vmem:[#allocation49_spill] sm:$0xff] }
 0x693   :  { %3241 = vmatpush1.bf16.msra.mxu0 %v7136_v26  ;;  %3282 = vmatpush1.bf16.msra.mxu1 %v7137_v9  ;;  %v7147_v26 = vld [vmem:[#allocation50_spill] sm:$0xff]  ;;  %v7148_v9 = vld [vmem:[#allocation51_spill] sm:$0xff] }
 0x694   :  { %3242 = vmatprep.subr.bf16.mxu0 %v7138_v43  ;;  %3283 = vmatprep.subr.bf16.mxu1 %v7139_v1  ;;  %v7149_v43 = vld [vmem:[#allocation52_spill] sm:$0xff]  ;;  %v7150_v1 = vld [vmem:[#allocation53_spill] sm:$0xff] }
 0x697   :  { %3243 = vmatpush2.bf16.msra.mxu0 %v7140_v24  ;;  %3284 = vmatpush2.bf16.msra.mxu1 %v7141_v2  ;;  %v7151_v24 = vld [vmem:[#allocation54_spill] sm:$0xff]  ;;  %v7152_v2 = vld [vmem:[#allocation55_spill] sm:$0xff] }
 0x698   :  { %3244 = vmatprep.subr.bf16.mxu0 %v7142_v57  ;;  %3285 = vmatprep.subr.bf16.mxu1 %v7143_v49  ;;  %v7153_v57 = vld [vmem:[#allocation56_spill] sm:$0xff]  ;;  %v7154_v49 = vld [vmem:[#allocation57_spill] sm:$0xff] }
 0x69b   :  { %3245 = vmatpush2.bf16.msra.mxu0 %v7144_v3  ;;  %3286 = vmatpush2.bf16.msra.mxu1 %v7145_v39  ;;  %v7155_v3 = vld [vmem:[#allocation59_spill] sm:$0xff]  ;;  %v7156_v39 = vld [vmem:[#allocation58_spill] sm:$0xff] }
 0x69c   :  { %3246 = vmatprep.subr.bf16.mxu0 %v7146_v15  ;;  %3287 = vmatprep.subr.bf16.mxu1 %v7147_v26  ;;  %v7157_v15 = vld [vmem:[#allocation60_spill] sm:$0xff]  ;;  %v7158_v26 = vld [vmem:[#allocation61_spill] sm:$0xff] }
 0x69f   :  { %3247 = vmatpush2.bf16.msra.mxu0 %v7148_v9  ;;  %3288 = vmatpush2.bf16.msra.mxu1 %v7149_v43  ;;  %v7159_v9 = vld [vmem:[#allocation62_spill] sm:$0xff]  ;;  %v7160_v43 = vld [vmem:[#allocation63_spill] sm:$0xff] }
 0x6a0   :  { %3248 = vmatprep.subr.bf16.mxu0 %v7150_v1  ;;  %3289 = vmatprep.subr.bf16.mxu1 %v7151_v24  ;;  %v7161_v1 = vld [vmem:[#allocation64_spill] sm:$0xff]  ;;  %v7162_v24 = vld [vmem:[#allocation65_spill] sm:$0xff] }
 0x6a3   :  { %3249 = vmatpush2.bf16.msra.mxu0 %v7152_v2  ;;  %3290 = vmatpush2.bf16.msra.mxu1 %v7153_v57  ;;  %v7163_v2 = vld [vmem:[#allocation66_spill] sm:$0xff]  ;;  %v7164_v57 = vld [vmem:[#allocation67_spill] sm:$0xff] }
 0x6a4   :  { %3250 = vmatprep.subr.bf16.mxu0 %v7154_v49  ;;  %3291 = vmatprep.subr.bf16.mxu1 %v7155_v3  ;;  %v7165_v49 = vld [vmem:[#allocation68_spill] sm:$0xff]  ;;  %v7166_v3 = vld [vmem:[#allocation69_spill] sm:$0xff] }
 0x6a7   :  { %3251 = vmatpush2.bf16.msra.mxu0 %v7156_v39  ;;  %3292 = vmatpush2.bf16.msra.mxu1 %v7157_v15  ;;  %v7167_v39 = vld [vmem:[#allocation70_spill] sm:$0xff]  ;;  %v7168_v15 = vld [vmem:[#allocation71_spill] sm:$0xff] }
 0x6a8   :  { %3252 = vmatprep.subr.bf16.mxu0 %v7158_v26  ;;  %3293 = vmatprep.subr.bf16.mxu1 %v7159_v9  ;;  %v7169_v26 = vld [vmem:[#allocation72_spill] sm:$0xff]  ;;  %v7170_v9 = vld [vmem:[#allocation73_spill] sm:$0xff] }
 0x6ab   :  { %3253 = vmatpush2.bf16.msra.mxu0 %v7160_v43  ;;  %3294 = vmatpush2.bf16.msra.mxu1 %v7161_v1  ;;  %v7171_v43 = vld [vmem:[#allocation74_spill] sm:$0xff] }
 0x6ac   :  { %3254 = vmatprep.subr.bf16.mxu0 %v7162_v24  ;;  %3295 = vmatprep.subr.bf16.mxu1 %v7163_v2 }
 0x6af   :  { %3255 = vmatpush2.bf16.msra.mxu0 %v7164_v57  ;;  %3296 = vmatpush2.bf16.msra.mxu1 %v7165_v49 }
 0x6b0   :  { %3256 = vmatprep.subr.bf16.mxu0 %v7166_v3  ;;  %3297 = vmatprep.subr.bf16.mxu1 %v7167_v39 }
 0x6b3   :  { %3257 = vmatpush2.bf16.msra.mxu0 %v7168_v15  ;;  %3298 = vmatpush2.bf16.msra.mxu1 %v7169_v26  ;;  %v7175_v26 = vld [vmem:[#allocation96_spill] sm:$0xff] }
 0x6b4   :  { %3308 = vmatprep.subr.bf16.mxu0 %v7170_v9  ;;  %3349 = vmatprep.subr.bf16.mxu1 %v7171_v43 }
 0x6f6   :  { %v3028_v1 = vpop.f32.mrf.mxu0  ;;  %v3069_v24 = vpop.f32.mrf.mxu1 }
 0x6f7   :  { %v3158_v3 = vadd.f32 %v3028_v1, %v7172_v17  ;;  %v3160_v39 = vadd.f32 %v3069_v24, %v7173_v45 }
 0x6f8   :  { %v3030_v35 = vpop.f32.mrf.mxu0  ;;  %v3071_v2 = vpop.f32.mrf.mxu1 }
 0x6f9   :  { %v3159_v15 = vadd.f32 %v3030_v35, %v7174_v0  ;;  %v4169_v52 = vmul.f32 -1.442695, %v3158_v3  ;;  %v3161_v20 = vadd.f32 %v3071_v2, %v7175_v26  ;;  %v4171_v9 = vmul.f32 -1.442695, %v3160_v39  ;;  %v7176_v26 = vld [vmem:[#allocation125_spill] sm:$0xff]  ;;  %v7179_v3 = vld [vmem:[#allocation128_spill] sm:$0xff] }
 0x6fa   :  { %v3032_v54 = vpop.f32.mrf.mxu0  ;;  %v3073_v57 = vpop.f32.mrf.mxu1 }
 0x6fb   :  { %v4170_v55 = vmul.f32 -1.442695, %v3159_v15  ;;  %4410 = vpow2.f32 %v4169_v52  ;;  %v4172_v43 = vmul.f32 -1.442695, %v3161_v20  ;;  %v7177_v15 = vld [vmem:[#allocation126_spill] sm:$0xff] }
 0x6fc   :  { %v3033_v56 = vpop.f32.mrf.mxu0  ;;  %v3074_v49 = vpop.f32.mrf.mxu1  ;;  %4412 = vpow2.f32 %v4171_v9 }
 0x6fd   :  { %4414 = vpow2.f32 %v4170_v55 }
 0x6fe   :  { %4416 = vpow2.f32 %v4172_v43  ;;  %v7178_v43 = vld [vmem:[#allocation127_spill] sm:$0xff] }
 0x708   :  { %v4411_v54 = vpop.eup %4410 }
 0x709   :  { %v4413_v57 = vpop.eup %4412  ;;  %v3172_v49 = vadd.f32 1.0, %v4411_v54 }
 0x70a   :  { %v4415_v56 = vpop.eup %4414  ;;  %v3184_v17 = vadd.f32 1.0, %v4413_v57 }
 0x70b   :  { %v4417_v18 = vpop.eup %4416  ;;  %v3173_v1 = vadd.f32 1.0, %v4415_v56  ;;  %4418 = vrcp.f32 %v3172_v49 }
 0x70c   :  { %v3185_v45 = vadd.f32 1.0, %v4417_v18  ;;  %4420 = vrcp.f32 %v3184_v17 }
 0x70d   :  { %4422 = vrcp.f32 %v3173_v1 }
 0x718   :  { %v4419_v17 = vpop.eup %4418 }
 0x736   :  { %v3110_v0 = vpop.f32.mrf.mxu0  ;;  %v3151_v35 = vpop.f32.mrf.mxu1 }
 0x737   :  { %v3162_v39 = vadd.f32 %v3110_v0, %v7176_v26  ;;  %v3164_v52 = vadd.f32 %v3151_v35, %v7177_v15  ;;  %v4421_v0 = vpop.eup %4420 }
 0x738   :  { %v3112_v20 = vpop.f32.mrf.mxu0  ;;  %v3153_v55 = vpop.f32.mrf.mxu1 }
 0x739   :  { %4424 = vtanh.f32 %v3162_v39  ;;  %v4173_v9 = vmul.f32 -1.442695, %v3164_v52  ;;  %v3163_v2 = vadd.f32 %v3112_v20, %v7178_v43  ;;  %v3165_v24 = vadd.f32 %v3153_v55, %v7179_v3  ;;  %v4423_v1 = vpop.eup %4422 }
 0x73a   :  { %4426 = vrcp.f32 %v3185_v45  ;;  %v3114_v54 = vpop.f32.mrf.mxu0  ;;  %v3155_v57 = vpop.f32.mrf.mxu1  ;;  %v3204_v39 = vmul.f32 %v4421_v0, %v5826_v6 }
 0x73b   :  { %4428 = vpow2.f32 %v4173_v9  ;;  %v4174_v18 = vmul.f32 -1.442695, %v3165_v24 }
 0x73c   :  { %4430 = vtanh.f32 %v3163_v2  ;;  %v3115_v56 = vpop.f32.mrf.mxu0  ;;  %v3156_v49 = vpop.f32.mrf.mxu1 }
 0x73d   :  { %4432 = vpow2.f32 %v4174_v18 }
 0x746   :  { %v4425_v35 = vpop.eup %4424 }
 0x747   :  { %v4427_v26 = vpop.eup %4426  ;;  %v3206_v15 = vmul.f32 %v4425_v35, %v4419_v17  ;;  %v7182_v35 = vld [vmem:[#allocation176_spill] sm:$0xff] }
 0x748   :  { %v4429_v52 = vpop.eup %4428  ;;  %v3205_v9 = vmul.f32 %v4427_v26, %v5830_v53  ;;  %v7183_v26 = vld [vmem:[#allocation177_spill] sm:$0xff] }
 0x749   :  { %v4431_v20 = vpop.eup %4430  ;;  %v5982_v55 = vadd.f32 %v3206_v15, %v3204_v39  ;;  %v3198_v45 = vadd.f32 1.0, %v4429_v52  ;;  %v7184_v39 = vld [vmem:[#allocation178_spill] sm:$0xff]  ;;  %v7185_v15 = vld [vmem:[#allocation179_spill] sm:$0xff]  ;;  %v7186_v52 = vld [vmem:[#allocation180_spill] sm:$0xff] }
 0x74a   :  { %v4433_v43 = vpop.eup %4432  ;;  %v3207_v2 = vmul.f32 %v4431_v20, %v4423_v1  ;;  %v7187_v20 = vld [vmem:[#allocation181_spill] sm:$0xff] }
 0x74b   :  { %4434 = vtanh.f32 %v5982_v55  ;;  %v3199_v3 = vadd.f32 1.0, %v4433_v43  ;;  %v7189_v43 = vld [vmem:[#allocation183_spill] sm:$0xff] }
 0x74c   :  { %4436 = vrcp.f32 %v3198_v45  ;;  %v5986_v24 = vadd.f32 %v3207_v2, %v3205_v9  ;;  %v7188_v45 = vld [vmem:[#allocation182_spill] sm:$0xff]  ;;  %v7190_v9 = vld [vmem:[#allocation184_spill] sm:$0xff]  ;;  %v7191_v2 = vld [vmem:[#allocation185_spill] sm:$0xff] }
 0x74d   :  { %4438 = vrcp.f32 %v3199_v3  ;;  %v7192_v3 = vld [vmem:[#allocation186_spill] sm:$0xff] }
 0x74e   :  { %4440 = vtanh.f32 %v5986_v24 }
 0x758   :  { %v4435_v6 = vpop.eup %4434 }
 0x759   :  { %v4437_v54 = vpop.eup %4436 }
 0x75a   :  { %v4439_v57 = vpop.eup %4438  ;;  %v3212_v18 = vmul.f32 %v4437_v54, %v4435_v6  ;;  %v7193_v6 = vld [vmem:[#allocation187_spill] sm:$0xff]  ;;  %v7194_v54 = vld [vmem:[#allocation188_spill] sm:$0xff] }
 0x75b   :  { %v4441_v56 = vpop.eup %4440 }
 0x75c   :  { %v3213_v49 = vmul.f32 %v4441_v56, %v4439_v57  ;;  %v5990_v17 = vadd.f32 %v3212_v18, %v5834_v29  ;;  %v5995_v1 = vpack.c.bf16 %v3212_v18, %v3212_v18  ;;  %v7180_v29 = vld [vmem:[#allocation174_spill] sm:$0xff]  ;;  %v7195_v57 = vld [vmem:[#allocation189_spill] sm:$0xff]  ;;  %v7197_v56 = vld [vmem:[#allocation191_spill] sm:$0xff] }
 0x75d   :  { %v7196_v18 = vld [vmem:[#allocation190_spill] sm:$0xff] }
 0x75e   :  { %v3225_v53 = vpack.c.bf16 %v3213_v49, %v3213_v49  ;;  %v5993_v0 = vadd.f32 %v3213_v49, %v5837_v5  ;;  %v7181_v5 = vld [vmem:[#allocation175_spill] sm:$0xff]  ;;  %v7198_v49 = vld [vmem:[#allocation192_spill] sm:$0xff] }
 0x760   :  { %3258 = vmatprep.mubr.bf16.mxu0 %v3225_v53  ;;  %3299 = vmatprep.mubr.bf16.mxu1 %v3225_v53 }
 0x761   :  { %3259 = vmatmul.mubr.bf16.vlgmr.msra.gmra.mxu0 %v5995_v1  ;;  %3300 = vmatmul.mubr.bf16.vlgmr.msra.gmra.mxu1 %v5995_v1 }
 0x762   :  { %3309 = vmatpush1.bf16.msra.mxu0 %v6792_v12  ;;  %3350 = vmatpush1.bf16.msra.mxu1 %v6793_v14 }
 0x763   :  { %3340 = vmatprep.mubr.bf16.mxu0 %v3225_v53  ;;  %3381 = vmatprep.mubr.bf16.mxu1 %v3225_v53  ;;  %v7199_v53 = vld [vmem:[#allocation193_spill] sm:$0xff] }
 0x764   :  { %3310 = vmatprep.subr.bf16.mxu0 %v6794_v36  ;;  %3351 = vmatprep.subr.bf16.mxu1 %v6795_v23 }
 0x766   :  { %3311 = vmatpush1.bf16.msra.mxu0 %v6796_v25  ;;  %3352 = vmatpush1.bf16.msra.mxu1 %v6797_v21 }
 0x767   :  { %3312 = vmatprep.subr.bf16.mxu0 %v6798_v11  ;;  %3353 = vmatprep.subr.bf16.mxu1 %v6889_v46 }
 0x76a   :  { %3313 = vmatpush1.bf16.msra.mxu0 %v6890_v44  ;;  %3354 = vmatpush1.bf16.msra.mxu1 %v6891_v41 }
 0x76b   :  { %3314 = vmatprep.subr.bf16.mxu0 %v6892_v40  ;;  %3355 = vmatprep.subr.bf16.mxu1 %v6893_v47 }
 0x76e   :  { %3315 = vmatpush1.bf16.msra.mxu0 %v6894_v61  ;;  %3356 = vmatpush1.bf16.msra.mxu1 %v6895_v60 }
 0x76f   :  { %3316 = vmatprep.subr.bf16.mxu0 %v6896_v8  ;;  %3357 = vmatprep.subr.bf16.mxu1 %v6897_v13 }
 0x772   :  { %3317 = vmatpush1.bf16.msra.mxu0 %v6986_v58  ;;  %3358 = vmatpush1.bf16.msra.mxu1 %v6987_v59 }
 0x773   :  { %3318 = vmatprep.subr.bf16.mxu0 %v6988_v27  ;;  %3359 = vmatprep.subr.bf16.mxu1 %v6989_v22 }
 0x776   :  { %3319 = vmatpush1.bf16.msra.mxu0 %v6990_v32  ;;  %3360 = vmatpush1.bf16.msra.mxu1 %v6991_v33 }
 0x777   :  { %3320 = vmatprep.subr.bf16.mxu0 %v6992_v4  ;;  %3361 = vmatprep.subr.bf16.mxu1 %v6993_v19 }
 0x77a   :  { %3321 = vmatpush1.bf16.msra.mxu0 %v6994_v31  ;;  %3362 = vmatpush1.bf16.msra.mxu1 %v6995_v34 }
 0x77b   :  { %3322 = vmatprep.subr.bf16.mxu0 %v6908_v63  ;;  %3363 = vmatprep.subr.bf16.mxu1 %v6909_v16 }
 0x77e   :  { %3323 = vmatpush1.bf16.msra.mxu0 %v6910_v51  ;;  %3364 = vmatpush1.bf16.msra.mxu1 %v6996_v37 }
 0x77f   :  { %3324 = vmatprep.subr.bf16.mxu0 %v6997_v28  ;;  %3365 = vmatprep.subr.bf16.mxu1 %v6913_v50 }
 0x782   :  { %3325 = vmatpush2.bf16.msra.mxu0 %v6914_v7  ;;  %3366 = vmatpush2.bf16.msra.mxu1 %v6915_v48 }
 0x783   :  { %3326 = vmatprep.subr.bf16.mxu0 %v6916_v42  ;;  %3367 = vmatprep.subr.bf16.mxu1 %v6917_v10 }
 0x786   :  { %3327 = vmatpush2.bf16.msra.mxu0 %v6918_v62  ;;  %3368 = vmatpush2.bf16.msra.mxu1 %v6829_v30 }
 0x787   :  { %3328 = vmatprep.subr.bf16.mxu0 %v6830_v38  ;;  %3369 = vmatprep.subr.bf16.mxu1 %v7180_v29 }
 0x78a   :  { %3329 = vmatpush2.bf16.msra.mxu0 %v7181_v5  ;;  %3370 = vmatpush2.bf16.msra.mxu1 %v7182_v35 }
 0x78b   :  { %3330 = vmatprep.subr.bf16.mxu0 %v7183_v26  ;;  %3371 = vmatprep.subr.bf16.mxu1 %v7184_v39  ;;  %v7271_v39 = vld [vmem:[#allocation99_spill] sm:$0xff] }
 0x78e   :  { %3331 = vmatpush2.bf16.msra.mxu0 %v7185_v15  ;;  %3372 = vmatpush2.bf16.msra.mxu1 %v7186_v52  ;;  %v7269_v52 = vld [vmem:[#allocation97_spill] sm:$0xff]  ;;  %v7270_v15 = vld [vmem:[#allocation98_spill] sm:$0xff] }
 0x78f   :  { %3332 = vmatprep.subr.bf16.mxu0 %v7187_v20  ;;  %3373 = vmatprep.subr.bf16.mxu1 %v7188_v45 }
 0x792   :  { %3333 = vmatpush2.bf16.msra.mxu0 %v7189_v43  ;;  %3374 = vmatpush2.bf16.msra.mxu1 %v7190_v9  ;;  %v7200_v43 = vld [vmem:[#allocation194_spill] sm:$0xff]  ;;  %v7201_v9 = vld [vmem:[#allocation195_spill] sm:$0xff] }
 0x793   :  { %3334 = vmatprep.subr.bf16.mxu0 %v7191_v2  ;;  %3375 = vmatprep.subr.bf16.mxu1 %v7192_v3  ;;  %v7202_v2 = vld [vmem:[#allocation196_spill] sm:$0xff]  ;;  %v7203_v3 = vld [vmem:[#allocation9_spill] sm:$0xff] }
 0x796   :  { %3335 = vmatpush2.bf16.msra.mxu0 %v7193_v6  ;;  %3376 = vmatpush2.bf16.msra.mxu1 %v7194_v54  ;;  %v7204_v6 = vld [vmem:[#allocation11_spill] sm:$0xff] }
 0x797   :  { %3336 = vmatprep.subr.bf16.mxu0 %v7195_v57  ;;  %3377 = vmatprep.subr.bf16.mxu1 %v7196_v18  ;;  %v7205_v18 = vld [vmem:[#allocation10_spill] sm:$0xff]  ;;  %v7214_v57 = vld [vmem:[#allocation20_spill] sm:$0xff] }
 0x79a   :  { %3337 = vmatpush2.bf16.msra.mxu0 %v7197_v56  ;;  %3378 = vmatpush2.bf16.msra.mxu1 %v7198_v49  ;;  %v7206_v56 = vld [vmem:[#allocation12_spill] sm:$0xff]  ;;  %v7207_v49 = vld [vmem:[#allocation13_spill] sm:$0xff] }
 0x79b   :  { %3338 = vmatprep.subr.bf16.mxu0 %v7199_v53  ;;  %3379 = vmatprep.subr.bf16.mxu1 %v7200_v43  ;;  %v7208_v53 = vld [vmem:[#allocation14_spill] sm:$0xff]  ;;  %v7209_v43 = vld [vmem:[#allocation15_spill] sm:$0xff] }
 0x79e   :  { %3339 = vmatpush2.bf16.msra.mxu0 %v7201_v9  ;;  %3380 = vmatpush2.bf16.msra.mxu1 %v7202_v2  ;;  %v7210_v9 = vld [vmem:[#allocation16_spill] sm:$0xff]  ;;  %v7211_v2 = vld [vmem:[#allocation17_spill] sm:$0xff] }
 0x79f   :  { %3458 = vmatprep.subr.bf16.mxu0 %v7203_v3  ;;  %3499 = vmatprep.subr.bf16.mxu1 %v7204_v6  ;;  %v7212_v3 = vld [vmem:[#allocation18_spill] sm:$0xff]  ;;  %v7213_v6 = vld [vmem:[#allocation19_spill] sm:$0xff] }
 0x7a1   :  { %3341 = vmatmul.mubr.bf16.vlgmr.msra.gmra.mxu0 %v5995_v1  ;;  %3382 = vmatmul.mubr.bf16.vlgmr.msra.gmra.mxu1 %v5995_v1  ;;  %v7215_v1 = vld [vmem:[#allocation21_spill] sm:$0xff] }
 0x7a2   :  { %3459 = vmatpush1.bf16.msra.mxu0 %v7205_v18  ;;  %3500 = vmatpush1.bf16.msra.mxu1 %v7206_v56  ;;  %v7216_v18 = vld [vmem:[#allocation22_spill] sm:$0xff]  ;;  %v7217_v56 = vld [vmem:[#allocation23_spill] sm:$0xff] }
 0x7a3   :  { %3460 = vmatprep.subr.bf16.mxu0 %v7207_v49  ;;  %3501 = vmatprep.subr.bf16.mxu1 %v7208_v53  ;;  %v7218_v49 = vld [vmem:[#allocation24_spill] sm:$0xff]  ;;  %v7219_v53 = vld [vmem:[#allocation25_spill] sm:$0xff] }
 0x7a6   :  { %3461 = vmatpush1.bf16.msra.mxu0 %v7209_v43  ;;  %3502 = vmatpush1.bf16.msra.mxu1 %v7210_v9  ;;  %v7220_v43 = vld [vmem:[#allocation26_spill] sm:$0xff]  ;;  %v7221_v9 = vld [vmem:[#allocation27_spill] sm:$0xff] }
 0x7a7   :  { %3462 = vmatprep.subr.bf16.mxu0 %v7211_v2  ;;  %3503 = vmatprep.subr.bf16.mxu1 %v7212_v3  ;;  %v7222_v2 = vld [vmem:[#allocation28_spill] sm:$0xff]  ;;  %v7223_v3 = vld [vmem:[#allocation29_spill] sm:$0xff] }
 0x7aa   :  { %3463 = vmatpush1.bf16.msra.mxu0 %v7213_v6  ;;  %3504 = vmatpush1.bf16.msra.mxu1 %v7214_v57  ;;  %v7224_v6 = vld [vmem:[#allocation30_spill] sm:$0xff]  ;;  %v7225_v57 = vld [vmem:[#allocation31_spill] sm:$0xff] }
 0x7ab   :  { %3464 = vmatprep.subr.bf16.mxu0 %v7215_v1  ;;  %3505 = vmatprep.subr.bf16.mxu1 %v7216_v18  ;;  %v7226_v1 = vld [vmem:[#allocation32_spill] sm:$0xff]  ;;  %v7227_v18 = vld [vmem:[#allocation33_spill] sm:$0xff] }
 0x7ae   :  { %3465 = vmatpush1.bf16.msra.mxu0 %v7217_v56  ;;  %3506 = vmatpush1.bf16.msra.mxu1 %v7218_v49  ;;  %v7228_v56 = vld [vmem:[#allocation34_spill] sm:$0xff]  ;;  %v7229_v49 = vld [vmem:[#allocation35_spill] sm:$0xff] }
 0x7af   :  { %3466 = vmatprep.subr.bf16.mxu0 %v7219_v53  ;;  %3507 = vmatprep.subr.bf16.mxu1 %v7220_v43  ;;  %v7230_v53 = vld [vmem:[#allocation36_spill] sm:$0xff]  ;;  %v7231_v43 = vld [vmem:[#allocation37_spill] sm:$0xff] }
 0x7b2   :  { %3467 = vmatpush1.bf16.msra.mxu0 %v7221_v9  ;;  %3508 = vmatpush1.bf16.msra.mxu1 %v7222_v2  ;;  %v7232_v9 = vld [vmem:[#allocation38_spill] sm:$0xff]  ;;  %v7233_v2 = vld [vmem:[#allocation39_spill] sm:$0xff] }
 0x7b3   :  { %3468 = vmatprep.subr.bf16.mxu0 %v7223_v3  ;;  %3509 = vmatprep.subr.bf16.mxu1 %v7224_v6  ;;  %v7234_v3 = vld [vmem:[#allocation40_spill] sm:$0xff]  ;;  %v7235_v6 = vld [vmem:[#allocation41_spill] sm:$0xff] }
 0x7b6   :  { %3469 = vmatpush1.bf16.msra.mxu0 %v7225_v57  ;;  %3510 = vmatpush1.bf16.msra.mxu1 %v7226_v1  ;;  %v7236_v57 = vld [vmem:[#allocation42_spill] sm:$0xff]  ;;  %v7237_v1 = vld [vmem:[#allocation43_spill] sm:$0xff] }
 0x7b7   :  { %3470 = vmatprep.subr.bf16.mxu0 %v7227_v18  ;;  %3511 = vmatprep.subr.bf16.mxu1 %v7228_v56  ;;  %v7238_v18 = vld [vmem:[#allocation44_spill] sm:$0xff]  ;;  %v7239_v56 = vld [vmem:[#allocation45_spill] sm:$0xff] }
 0x7ba   :  { %3471 = vmatpush1.bf16.msra.mxu0 %v7229_v49  ;;  %3512 = vmatpush1.bf16.msra.mxu1 %v7230_v53  ;;  %v7240_v49 = vld [vmem:[#allocation46_spill] sm:$0xff]  ;;  %v7241_v53 = vld [vmem:[#allocation47_spill] sm:$0xff] }
 0x7bb   :  { %3472 = vmatprep.subr.bf16.mxu0 %v7231_v43  ;;  %3513 = vmatprep.subr.bf16.mxu1 %v7232_v9  ;;  %v7242_v43 = vld [vmem:[#allocation48_spill] sm:$0xff]  ;;  %v7243_v9 = vld [vmem:[#allocation49_spill] sm:$0xff] }
 0x7be   :  { %3473 = vmatpush1.bf16.msra.mxu0 %v7233_v2  ;;  %3514 = vmatpush1.bf16.msra.mxu1 %v7234_v3  ;;  %v7244_v2 = vld [vmem:[#allocation50_spill] sm:$0xff]  ;;  %v7245_v3 = vld [vmem:[#allocation51_spill] sm:$0xff] }
 0x7bf   :  { %3474 = vmatprep.subr.bf16.mxu0 %v7235_v6  ;;  %3515 = vmatprep.subr.bf16.mxu1 %v7236_v57  ;;  %v7246_v6 = vld [vmem:[#allocation52_spill] sm:$0xff]  ;;  %v7247_v57 = vld [vmem:[#allocation53_spill] sm:$0xff] }
 0x7c2   :  { %3475 = vmatpush2.bf16.msra.mxu0 %v7237_v1  ;;  %3516 = vmatpush2.bf16.msra.mxu1 %v7238_v18  ;;  %v7248_v1 = vld [vmem:[#allocation54_spill] sm:$0xff]  ;;  %v7249_v18 = vld [vmem:[#allocation55_spill] sm:$0xff] }
 0x7c3   :  { %3476 = vmatprep.subr.bf16.mxu0 %v7239_v56  ;;  %3517 = vmatprep.subr.bf16.mxu1 %v7240_v49  ;;  %v7250_v56 = vld [vmem:[#allocation56_spill] sm:$0xff]  ;;  %v7251_v49 = vld [vmem:[#allocation57_spill] sm:$0xff] }
 0x7c6   :  { %3477 = vmatpush2.bf16.msra.mxu0 %v7241_v53  ;;  %3518 = vmatpush2.bf16.msra.mxu1 %v7242_v43  ;;  %v7252_v53 = vld [vmem:[#allocation59_spill] sm:$0xff]  ;;  %v7253_v43 = vld [vmem:[#allocation58_spill] sm:$0xff] }
 0x7c7   :  { %3478 = vmatprep.subr.bf16.mxu0 %v7243_v9  ;;  %3519 = vmatprep.subr.bf16.mxu1 %v7244_v2  ;;  %v7254_v9 = vld [vmem:[#allocation60_spill] sm:$0xff]  ;;  %v7255_v2 = vld [vmem:[#allocation61_spill] sm:$0xff] }
 0x7ca   :  { %3479 = vmatpush2.bf16.msra.mxu0 %v7245_v3  ;;  %3520 = vmatpush2.bf16.msra.mxu1 %v7246_v6  ;;  %v7256_v3 = vld [vmem:[#allocation62_spill] sm:$0xff]  ;;  %v7257_v6 = vld [vmem:[#allocation63_spill] sm:$0xff] }
 0x7cb   :  { %3480 = vmatprep.subr.bf16.mxu0 %v7247_v57  ;;  %3521 = vmatprep.subr.bf16.mxu1 %v7248_v1  ;;  %v7258_v57 = vld [vmem:[#allocation64_spill] sm:$0xff]  ;;  %v7259_v1 = vld [vmem:[#allocation65_spill] sm:$0xff] }
 0x7ce   :  { %3481 = vmatpush2.bf16.msra.mxu0 %v7249_v18  ;;  %3522 = vmatpush2.bf16.msra.mxu1 %v7250_v56  ;;  %v7260_v18 = vld [vmem:[#allocation66_spill] sm:$0xff]  ;;  %v7261_v56 = vld [vmem:[#allocation67_spill] sm:$0xff] }
 0x7cf   :  { %3482 = vmatprep.subr.bf16.mxu0 %v7251_v49  ;;  %3523 = vmatprep.subr.bf16.mxu1 %v7252_v53  ;;  %v7262_v49 = vld [vmem:[#allocation68_spill] sm:$0xff]  ;;  %v7263_v53 = vld [vmem:[#allocation69_spill] sm:$0xff] }
 0x7d2   :  { %3483 = vmatpush2.bf16.msra.mxu0 %v7253_v43  ;;  %3524 = vmatpush2.bf16.msra.mxu1 %v7254_v9  ;;  %v7264_v43 = vld [vmem:[#allocation70_spill] sm:$0xff]  ;;  %v7265_v9 = vld [vmem:[#allocation71_spill] sm:$0xff] }
 0x7d3   :  { %3484 = vmatprep.subr.bf16.mxu0 %v7255_v2  ;;  %3525 = vmatprep.subr.bf16.mxu1 %v7256_v3  ;;  %v7266_v2 = vld [vmem:[#allocation72_spill] sm:$0xff]  ;;  %v7267_v3 = vld [vmem:[#allocation73_spill] sm:$0xff] }
 0x7d6   :  { %3485 = vmatpush2.bf16.msra.mxu0 %v7257_v6  ;;  %3526 = vmatpush2.bf16.msra.mxu1 %v7258_v57  ;;  %v7268_v6 = vld [vmem:[#allocation74_spill] sm:$0xff] }
 0x7d7   :  { %3486 = vmatprep.subr.bf16.mxu0 %v7259_v1  ;;  %3527 = vmatprep.subr.bf16.mxu1 %v7260_v18 }
 0x7da   :  { %3487 = vmatpush2.bf16.msra.mxu0 %v7261_v56  ;;  %3528 = vmatpush2.bf16.msra.mxu1 %v7262_v49 }
 0x7db   :  { %3488 = vmatprep.subr.bf16.mxu0 %v7263_v53  ;;  %3529 = vmatprep.subr.bf16.mxu1 %v7264_v43 }
 0x7de   :  { %3489 = vmatpush2.bf16.msra.mxu0 %v7265_v9  ;;  %3530 = vmatpush2.bf16.msra.mxu1 %v7266_v2  ;;  %v7272_v2 = vld [vmem:[#allocation100_spill] sm:$0xff] }
 0x7df   :  { %3540 = vmatprep.subr.bf16.mxu0 %v7267_v3  ;;  %3581 = vmatprep.subr.bf16.mxu1 %v7268_v6 }
 0x821   :  { %v3260_v57 = vpop.f32.mrf.mxu0  ;;  %v3301_v1 = vpop.f32.mrf.mxu1 }
 0x822   :  { %v3390_v53 = vadd.f32 %v3260_v57, %v7269_v52  ;;  %v3392_v43 = vadd.f32 %v3301_v1, %v7270_v15  ;;  %v7273_v1 = vld [vmem:[#allocation129_spill] sm:$0xff] }
 0x823   :  { %v3262_v54 = vpop.f32.mrf.mxu0  ;;  %v3303_v18 = vpop.f32.mrf.mxu1 }
 0x824   :  { %v3391_v9 = vadd.f32 %v3262_v54, %v7271_v39  ;;  %v4175_v26 = vmul.f32 -1.442695, %v3390_v53  ;;  %v3393_v35 = vadd.f32 %v3303_v18, %v7272_v2  ;;  %v4177_v3 = vmul.f32 -1.442695, %v3392_v43  ;;  %v7274_v53 = vld [vmem:[#allocation130_spill] sm:$0xff] }
 0x825   :  { %v3264_v45 = vpop.f32.mrf.mxu0  ;;  %v3305_v56 = vpop.f32.mrf.mxu1 }
 0x826   :  { %v4176_v5 = vmul.f32 -1.442695, %v3391_v9  ;;  %4442 = vpow2.f32 %v4175_v26  ;;  %v4178_v6 = vmul.f32 -1.442695, %v3393_v35  ;;  %v7275_v9 = vld [vmem:[#allocation131_spill] sm:$0xff] }
 0x827   :  { %v3265_v20 = vpop.f32.mrf.mxu0  ;;  %v3306_v49 = vpop.f32.mrf.mxu1  ;;  %4444 = vpow2.f32 %v4177_v3  ;;  %v7276_v3 = vld [vmem:[#allocation132_spill] sm:$0xff] }
 0x828   :  { %4446 = vpow2.f32 %v4176_v5 }
 0x829   :  { %4448 = vpow2.f32 %v4178_v6 }
 0x833   :  { %v4443_v45 = vpop.eup %4442 }
 0x834   :  { %v4445_v56 = vpop.eup %4444  ;;  %v3404_v49 = vadd.f32 1.0, %v4443_v45 }
 0x835   :  { %v4447_v20 = vpop.eup %4446  ;;  %v3416_v52 = vadd.f32 1.0, %v4445_v56 }
 0x836   :  { %v4449_v29 = vpop.eup %4448  ;;  %v3405_v57 = vadd.f32 1.0, %v4447_v20  ;;  %4450 = vrcp.f32 %v3404_v49 }
 0x837   :  { %v3417_v15 = vadd.f32 1.0, %v4449_v29  ;;  %4452 = vrcp.f32 %v3416_v52 }
 0x838   :  { %4454 = vrcp.f32 %v3405_v57 }
 0x843   :  { %v4451_v52 = vpop.eup %4450 }
 0x861   :  { %v3342_v39 = vpop.f32.mrf.mxu0  ;;  %v3383_v54 = vpop.f32.mrf.mxu1 }
 0x862   :  { %v3394_v18 = vadd.f32 %v3342_v39, %v7273_v1  ;;  %v3396_v26 = vadd.f32 %v3383_v54, %v7274_v53  ;;  %v4453_v39 = vpop.eup %4452 }
 0x863   :  { %v3344_v35 = vpop.f32.mrf.mxu0  ;;  %v3385_v5 = vpop.f32.mrf.mxu1 }
 0x864   :  { %4456 = vtanh.f32 %v3394_v18  ;;  %v4179_v43 = vmul.f32 -1.442695, %v3396_v26  ;;  %v3395_v2 = vadd.f32 %v3344_v35, %v7275_v9  ;;  %v3397_v6 = vadd.f32 %v3385_v5, %v7276_v3  ;;  %v4455_v57 = vpop.eup %4454 }
 0x865   :  { %4458 = vrcp.f32 %v3417_v15  ;;  %v3346_v45 = vpop.f32.mrf.mxu0  ;;  %v3387_v56 = vpop.f32.mrf.mxu1  ;;  %v3436_v18 = vmul.f32 %v4453_v39, %v5982_v55 }
 0x866   :  { %4460 = vpow2.f32 %v4179_v43  ;;  %v4180_v29 = vmul.f32 -1.442695, %v3397_v6 }
 0x867   :  { %4462 = vtanh.f32 %v3395_v2  ;;  %v3347_v20 = vpop.f32.mrf.mxu0  ;;  %v3388_v49 = vpop.f32.mrf.mxu1 }
 0x868   :  { %4464 = vpow2.f32 %v4180_v29 }
 0x871   :  { %v4457_v54 = vpop.eup %4456 }
 0x872   :  { %v4459_v1 = vpop.eup %4458  ;;  %v3438_v53 = vmul.f32 %v4457_v54, %v4451_v52 }
 0x873   :  { %v4461_v26 = vpop.eup %4460  ;;  %v3437_v43 = vmul.f32 %v4459_v1, %v5986_v24 }
 0x874   :  { %v4463_v35 = vpop.eup %4462  ;;  %v6138_v5 = vadd.f32 %v3438_v53, %v3436_v18  ;;  %v3430_v15 = vadd.f32 1.0, %v4461_v26 }
 0x875   :  { %v4465_v9 = vpop.eup %4464  ;;  %v3439_v2 = vmul.f32 %v4463_v35, %v4455_v57 }
 0x876   :  { %4466 = vtanh.f32 %v6138_v5  ;;  %v3431_v3 = vadd.f32 1.0, %v4465_v9 }
 0x877   :  { %4468 = vrcp.f32 %v3430_v15  ;;  %v6142_v6 = vadd.f32 %v3439_v2, %v3437_v43  ;;  %v7300_v15 = vld [vmem:[#allocation101_spill] sm:$0xff]  ;;  %v7301_v43 = vld [vmem:[#allocation102_spill] sm:$0xff] }
 0x878   :  { %4470 = vrcp.f32 %v3431_v3  ;;  %v7302_v3 = vld [vmem:[#allocation103_spill] sm:$0xff] }
 0x879   :  { %4472 = vtanh.f32 %v6142_v6 }
 0x883   :  { %v4467_v55 = vpop.eup %4466 }
 0x884   :  { %v4469_v45 = vpop.eup %4468 }
 0x885   :  { %v4471_v56 = vpop.eup %4470  ;;  %v3444_v29 = vmul.f32 %v4469_v45, %v4467_v55 }
 0x886   :  { %v4473_v20 = vpop.eup %4472 }
 0x887   :  { %v3445_v49 = vmul.f32 %v4473_v20, %v4471_v56  ;;  %v6146_v52 = vadd.f32 %v3444_v29, %v5990_v17  ;;  %v6151_v57 = vpack.c.bf16 %v3444_v29, %v3444_v29  ;;  %v7303_v56 = vld [vmem:[#allocation104_spill] sm:$0xff] }
 0x889   :  { %v3457_v24 = vpack.c.bf16 %v3445_v49, %v3445_v49  ;;  %v6149_v39 = vadd.f32 %v3445_v49, %v5993_v0 }
 0x88b   :  { %3490 = vmatprep.mubr.bf16.mxu0 %v3457_v24  ;;  %3531 = vmatprep.mubr.bf16.mxu1 %v3457_v24 }
 0x88c   :  { %3491 = vmatmul.mubr.bf16.vlgmr.msra.gmra.mxu0 %v6151_v57  ;;  %3532 = vmatmul.mubr.bf16.vlgmr.msra.gmra.mxu1 %v6151_v57 }
 0x88d   :  { %3541 = vmatpush1.bf16.msra.mxu0 %v6792_v12  ;;  %3582 = vmatpush1.bf16.msra.mxu1 %v6793_v14  ;;  %v7277_v12 = vld [vmem:[#allocation174_spill] sm:$0xff]  ;;  %v7278_v14 = vld [vmem:[#allocation175_spill] sm:$0xff] }
 0x88e   :  { %3572 = vmatprep.mubr.bf16.mxu0 %v3457_v24  ;;  %3613 = vmatprep.mubr.bf16.mxu1 %v3457_v24 }
 0x88f   :  { %3542 = vmatprep.subr.bf16.mxu0 %v6794_v36  ;;  %3583 = vmatprep.subr.bf16.mxu1 %v6795_v23  ;;  %v7279_v36 = vld [vmem:[#allocation176_spill] sm:$0xff]  ;;  %v7280_v23 = vld [vmem:[#allocation177_spill] sm:$0xff] }
 0x891   :  { %3543 = vmatpush1.bf16.msra.mxu0 %v6796_v25  ;;  %3584 = vmatpush1.bf16.msra.mxu1 %v6797_v21  ;;  %v7281_v25 = vld [vmem:[#allocation178_spill] sm:$0xff]  ;;  %v7282_v21 = vld [vmem:[#allocation179_spill] sm:$0xff] }
 0x892   :  { %3544 = vmatprep.subr.bf16.mxu0 %v6798_v11  ;;  %3585 = vmatprep.subr.bf16.mxu1 %v6889_v46  ;;  %v7283_v11 = vld [vmem:[#allocation180_spill] sm:$0xff]  ;;  %v7284_v46 = vld [vmem:[#allocation181_spill] sm:$0xff] }
 0x895   :  { %3545 = vmatpush1.bf16.msra.mxu0 %v6890_v44  ;;  %3586 = vmatpush1.bf16.msra.mxu1 %v6891_v41  ;;  %v7285_v44 = vld [vmem:[#allocation182_spill] sm:$0xff]  ;;  %v7288_v41 = vld [vmem:[#allocation185_spill] sm:$0xff] }
 0x896   :  { %3546 = vmatprep.subr.bf16.mxu0 %v6892_v40  ;;  %3587 = vmatprep.subr.bf16.mxu1 %v6893_v47  ;;  %v7289_v40 = vld [vmem:[#allocation186_spill] sm:$0xff]  ;;  %v7290_v47 = vld [vmem:[#allocation187_spill] sm:$0xff] }
 0x899   :  { %3547 = vmatpush1.bf16.msra.mxu0 %v6894_v61  ;;  %3588 = vmatpush1.bf16.msra.mxu1 %v6895_v60  ;;  %v7291_v61 = vld [vmem:[#allocation188_spill] sm:$0xff]  ;;  %v7292_v60 = vld [vmem:[#allocation189_spill] sm:$0xff] }
 0x89a   :  { %3548 = vmatprep.subr.bf16.mxu0 %v6896_v8  ;;  %3589 = vmatprep.subr.bf16.mxu1 %v6897_v13  ;;  %v7293_v8 = vld [vmem:[#allocation190_spill] sm:$0xff]  ;;  %v7294_v13 = vld [vmem:[#allocation191_spill] sm:$0xff] }
 0x89d   :  { %3549 = vmatpush1.bf16.msra.mxu0 %v6986_v58  ;;  %3590 = vmatpush1.bf16.msra.mxu1 %v6987_v59  ;;  %v4246_v58 = vld [vmem:[%s6291_s4 + $0x68] sm:$0xff]  }
 0x89e   :  { %3550 = vmatprep.subr.bf16.mxu0 %v6988_v27  ;;  %3591 = vmatprep.subr.bf16.mxu1 %v6989_v22  ;;  %v4247_v59 = vld [vmem:[%s6291_s4 + $0x28] sm:$0xff]   ;;  %v4248_v27 = vld [vmem:[%s6291_s4 + $0x60] sm:$0xff]  }
 0x89f   :  { %v4249_v22 = vld [vmem:[%s6291_s4 + $0x20] sm:$0xff]  }
 0x8a1   :  { %3551 = vmatpush1.bf16.msra.mxu0 %v6990_v32  ;;  %3592 = vmatpush1.bf16.msra.mxu1 %v6991_v33  ;;  %v4250_v32 = vld [vmem:[%s6291_s4 + $0x58] sm:$0xff]  }
 0x8a2   :  { %3552 = vmatprep.subr.bf16.mxu0 %v6992_v4  ;;  %3593 = vmatprep.subr.bf16.mxu1 %v6993_v19  ;;  %v4251_v33 = vld [vmem:[%s6291_s4 + $0x18] sm:$0xff]   ;;  %v4252_v4 = vld [vmem:[%s6291_s4 + $0x50] sm:$0xff]  }
 0x8a3   :  { %v4253_v19 = vld [vmem:[%s6291_s4 + $0x10] sm:$0xff]  }
 0x8a5   :  { %3553 = vmatpush1.bf16.msra.mxu0 %v6994_v31  ;;  %3594 = vmatpush1.bf16.msra.mxu1 %v6995_v34  ;;  %v4254_v31 = vld [vmem:[%s6291_s4 + $0x48] sm:$0xff]  }
 0x8a6   :  { %3554 = vmatprep.subr.bf16.mxu0 %v6908_v63  ;;  %3595 = vmatprep.subr.bf16.mxu1 %v6909_v16  ;;  %v7295_v16 = vld [vmem:[#allocation192_spill] sm:$0xff]  ;;  %v4245_v63 = vld [vmem:[%s6291_s4 + $0x30] sm:$0xff]   ;;  %v4255_v34 = vld [vmem:[%s6291_s4 + $0x8] sm:$0xff]  }
 0x8a9   :  { %3555 = vmatpush1.bf16.msra.mxu0 %v6910_v51  ;;  %3596 = vmatpush1.bf16.msra.mxu1 %v6996_v37  ;;  %v7296_v51 = vld [vmem:[#allocation193_spill] sm:$0xff] }
 0x8aa   :  { %3556 = vmatprep.subr.bf16.mxu0 %v6997_v28  ;;  %3597 = vmatprep.subr.bf16.mxu1 %v6913_v50  ;;  %v7297_v50 = vld [vmem:[#allocation194_spill] sm:$0xff]  ;;  %v4256_v37 = vld [vmem:[%s6291_s4 + $0x40] sm:$0xff]  }
 0x8ab   :  { %v4257_v28 = vld [vmem:[%s6291_s4] sm:$0xff]  }
 0x8ad   :  { %3557 = vmatpush2.bf16.msra.mxu0 %v6914_v7  ;;  %3598 = vmatpush2.bf16.msra.mxu1 %v6915_v48  ;;  %v7298_v7 = vld [vmem:[#allocation195_spill] sm:$0xff]  ;;  %v7299_v48 = vld [vmem:[#allocation196_spill] sm:$0xff] }
 0x8ae   :  { %3558 = vmatprep.subr.bf16.mxu0 %v6916_v42  ;;  %3599 = vmatprep.subr.bf16.mxu1 %v6917_v10  ;;  %v4242_v42 = vld [vmem:[%s6291_s4 + $0x78] sm:$0xff]  }
 0x8af   :  { %v4243_v10 = vld [vmem:[%s6291_s4 + $0x38] sm:$0xff]  }
 0x8b1   :  { %3559 = vmatpush2.bf16.msra.mxu0 %v6918_v62  ;;  %3600 = vmatpush2.bf16.msra.mxu1 %v6829_v30  ;;  %v7286_v30 = vld [vmem:[#allocation183_spill] sm:$0xff] }
 0x8b2   :  { %3560 = vmatprep.subr.bf16.mxu0 %v6830_v38  ;;  %3601 = vmatprep.subr.bf16.mxu1 %v7277_v12  ;;  %v7287_v38 = vld [vmem:[#allocation184_spill] sm:$0xff]  ;;  %v4244_v62 = vld [vmem:[%s6291_s4 + $0x70] sm:$0xff]  }
 0x8b5   :  { %3561 = vmatpush2.bf16.msra.mxu0 %v7278_v14  ;;  %3602 = vmatpush2.bf16.msra.mxu1 %v7279_v36 }
 0x8b6   :  { %3562 = vmatprep.subr.bf16.mxu0 %v7280_v23  ;;  %3603 = vmatprep.subr.bf16.mxu1 %v7281_v25 }
 0x8b9   :  { %3563 = vmatpush2.bf16.msra.mxu0 %v7282_v21  ;;  %3604 = vmatpush2.bf16.msra.mxu1 %v7283_v11  ;;  %v7304_v11 = vld [vmem:[#allocation105_spill] sm:$0xff] }
 0x8ba   :  { %3564 = vmatprep.subr.bf16.mxu0 %v7284_v46  ;;  %3605 = vmatprep.subr.bf16.mxu1 %v7285_v44  ;;  %v7305_v46 = vld [vmem:[#allocation197_spill] sm:$0xff] }
 0x8bb   :  { %v1125_v44 = vadd.f32 %v7305_v46, %v7304_v11 }
 0x8bd   :  { %3565 = vmatpush2.bf16.msra.mxu0 %v7286_v30  ;;  %3606 = vmatpush2.bf16.msra.mxu1 %v7287_v38 }
 0x8be   :  { %3566 = vmatprep.subr.bf16.mxu0 %v7288_v41  ;;  %3607 = vmatprep.subr.bf16.mxu1 %v7289_v40  ;;  %v7306_v40 = vld [vmem:[#allocation106_spill] sm:$0xff] }
 0x8c1   :  { %3567 = vmatpush2.bf16.msra.mxu0 %v7290_v47  ;;  %3608 = vmatpush2.bf16.msra.mxu1 %v7291_v61  ;;  %v7307_v47 = vld [vmem:[#allocation198_spill] sm:$0xff] }
 0x8c2   :  { %3568 = vmatprep.subr.bf16.mxu0 %v7292_v60  ;;  %3609 = vmatprep.subr.bf16.mxu1 %v7293_v8  ;;  %v1198_v61 = vadd.f32 %v7307_v47, %v7306_v40  ;;  %v7308_v60 = vld [vmem:[#allocation133_spill] sm:$0xff] }
 0x8c5   :  { %3569 = vmatpush2.bf16.msra.mxu0 %v7294_v13  ;;  %3610 = vmatpush2.bf16.msra.mxu1 %v7295_v16  ;;  %v7309_v13 = vld [vmem:[#allocation134_spill] sm:$0xff] }
 0x8c6   :  { %3570 = vmatprep.subr.bf16.mxu0 %v7296_v51  ;;  %3611 = vmatprep.subr.bf16.mxu1 %v7297_v50 }
 0x8c9   :  { %3571 = vmatpush2.bf16.msra.mxu0 %v7298_v7  ;;  %3612 = vmatpush2.bf16.msra.mxu1 %v7299_v48 }
 0x8ca   :  { %4204 = vmatprep.subr.bf16.mxu0 %v4242_v42 }
 0x8cc   :  { %3573 = vmatmul.mubr.bf16.vlgmr.msra.gmra.mxu0 %v6151_v57  ;;  %3614 = vmatmul.mubr.bf16.vlgmr.msra.gmra.mxu1 %v6151_v57 }
 0x8cd   :  { %4205 = vmatpush3.bf16.msra.mxu0 %v4243_v10 }
 0x8ce   :  { %4206 = vmatprep.subr.bf16.mxu0 %v4244_v62 }
 0x8d1   :  { %4207 = vmatpush3.bf16.msra.mxu0 %v4245_v63 }
 0x8d2   :  { %4208 = vmatprep.subr.bf16.mxu0 %v4246_v58 }
 0x8d5   :  { %4209 = vmatpush3.bf16.msra.mxu0 %v4247_v59 }
 0x8d6   :  { %4210 = vmatprep.subr.bf16.mxu0 %v4248_v27 }
 0x8d9   :  { %4211 = vmatpush3.bf16.msra.mxu0 %v4249_v22 }
 0x8da   :  { %4212 = vmatprep.subr.bf16.mxu0 %v4250_v32 }
 0x8dd   :  { %4213 = vmatpush3.bf16.msra.mxu0 %v4251_v33 }
 0x8de   :  { %4214 = vmatprep.subr.bf16.mxu0 %v4252_v4 }
 0x8e1   :  { %4215 = vmatpush3.bf16.msra.mxu0 %v4253_v19 }
 0x8e2   :  { %4216 = vmatprep.subr.bf16.mxu0 %v4254_v31 }
 0x8e5   :  { %4217 = vmatpush3.bf16.msra.mxu0 %v4255_v34 }
 0x8e6   :  { %4218 = vmatprep.subr.bf16.mxu0 %v4256_v37 }
 0x8e9   :  { %4219 = vmatpush3.bf16.msra.mxu0 %v4257_v28 }
 0x94c   :  { %v3492_v17 = vpop.f32.mrf.mxu0  ;;  %v3533_v0 = vpop.f32.mrf.mxu1 }
 0x94d   :  { %v3622_v9 = vadd.f32 %v3492_v17, %v7300_v15  ;;  %v3624_v2 = vadd.f32 %v3533_v0, %v7301_v43 }
 0x94e   :  { %v3494_v54 = vpop.f32.mrf.mxu0  ;;  %v3535_v1 = vpop.f32.mrf.mxu1 }
 0x94f   :  { %v3623_v55 = vadd.f32 %v3494_v54, %v7302_v3  ;;  %v4181_v45 = vmul.f32 -1.442695, %v3622_v9  ;;  %v3625_v29 = vadd.f32 %v3535_v1, %v7303_v56  ;;  %v4183_v20 = vmul.f32 -1.442695, %v3624_v2 }
 0x950   :  { %v3496_v18 = vpop.f32.mrf.mxu0  ;;  %v3537_v53 = vpop.f32.mrf.mxu1 }
 0x951   :  { %v4182_v49 = vmul.f32 -1.442695, %v3623_v55  ;;  %4474 = vpow2.f32 %v4181_v45  ;;  %v4184_v24 = vmul.f32 -1.442695, %v3625_v29 }
 0x952   :  { %v3497_v26 = vpop.f32.mrf.mxu0  ;;  %v3538_v35 = vpop.f32.mrf.mxu1  ;;  %4476 = vpow2.f32 %v4183_v20  ;;  %v4187_v20 = vld [vmem:[%s6292_s5] ss:$0 sm:$0xff] }
 0x953   :  { %4478 = vpow2.f32 %v4182_v49 }
 0x954   :  { %4480 = vpow2.f32 %v4184_v24 }
 0x95e   :  { %v4475_v57 = vpop.eup %4474 }
 0x95f   :  { %v4477_v12 = vpop.eup %4476  ;;  %v3636_v36 = vadd.f32 1.0, %v4475_v57 }
 0x960   :  { %v4479_v14 = vpop.eup %4478  ;;  %v3648_v25 = vadd.f32 1.0, %v4477_v12 }
 0x961   :  { %v4481_v23 = vpop.eup %4480  ;;  %v3637_v21 = vadd.f32 1.0, %v4479_v14  ;;  %4482 = vrcp.f32 %v3636_v36 }
 0x962   :  { %v3649_v30 = vadd.f32 1.0, %v4481_v23  ;;  %4484 = vrcp.f32 %v3648_v25 }
 0x963   :  { %4486 = vrcp.f32 %v3637_v21 }
 0x96e   :  { %v4483_v27 = vpop.eup %4482 }
 0x96f   :  { %v4485_v22 = vpop.eup %4484 }
 0x970   :  { %v4487_v32 = vpop.eup %4486  ;;  %v3668_v19 = vmul.f32 %v4485_v22, %v6138_v5 }
 0x98c   :  { %v3574_v38 = vpop.f32.mrf.mxu0  ;;  %v3615_v41 = vpop.f32.mrf.mxu1 }
 0x98d   :  { %v3626_v8 = vadd.f32 %v3574_v38, %v7308_v60  ;;  %v3628_v16 = vadd.f32 %v3615_v41, %v7309_v13 }
 0x98e   :  { %v3576_v51 = vpop.f32.mrf.mxu0  ;;  %v3617_v50 = vpop.f32.mrf.mxu1 }
 0x98f   :  { %4488 = vtanh.f32 %v3626_v8  ;;  %v4185_v7 = vmul.f32 -1.442695, %v3628_v16  ;;  %v3627_v48 = vadd.f32 %v3576_v51, %v1125_v44  ;;  %v3629_v42 = vadd.f32 %v3617_v50, %v1198_v61 }
 0x990   :  { %4490 = vrcp.f32 %v3649_v30  ;;  %v3578_v10 = vpop.f32.mrf.mxu0  ;;  %v3619_v62 = vpop.f32.mrf.mxu1 }
 0x991   :  { %4492 = vpow2.f32 %v4185_v7  ;;  %v4186_v63 = vmul.f32 -1.442695, %v3629_v42 }
 0x992   :  { %4494 = vtanh.f32 %v3627_v48  ;;  %v3579_v58 = vpop.f32.mrf.mxu0  ;;  %v3620_v59 = vpop.f32.mrf.mxu1 }
 0x993   :  { %4496 = vpow2.f32 %v4186_v63 }
 0x99c   :  { %v4489_v33 = vpop.eup %4488 }
 0x99d   :  { %v4491_v4 = vpop.eup %4490  ;;  %v3670_v31 = vmul.f32 %v4489_v33, %v4483_v27 }
 0x99e   :  { %v4493_v34 = vpop.eup %4492  ;;  %v3669_v54 = vmul.f32 %v4491_v4, %v6142_v6 }
 0x99f   :  { %v4495_v37 = vpop.eup %4494  ;;  %v3672_v28 = vadd.f32 %v3670_v31, %v3668_v19  ;;  %v3662_v17 = vadd.f32 1.0, %v4493_v34 }
 0x9a0   :  { %v4497_v0 = vpop.eup %4496  ;;  %v3671_v1 = vmul.f32 %v4495_v37, %v4487_v32 }
 0x9a1   :  { %4498 = vtanh.f32 %v3672_v28  ;;  %v3663_v18 = vadd.f32 1.0, %v4497_v0 }
 0x9a2   :  { %4500 = vrcp.f32 %v3662_v17  ;;  %v3673_v53 = vadd.f32 %v3671_v1, %v3669_v54 }
 0x9a3   :  { %4502 = vrcp.f32 %v3663_v18 }
 0x9a4   :  { %4504 = vtanh.f32 %v3673_v53 }
 0x9ae   :  { %v4499_v26 = vpop.eup %4498 }
 0x9af   :  { %v4501_v35 = vpop.eup %4500 }
 0x9b0   :  { %v4503_v15 = vpop.eup %4502  ;;  %v3676_v9 = vmul.f32 %v4501_v35, %v4499_v26 }
 0x9b1   :  { %v4505_v5 = vpop.eup %4504 }
 0x9b2   :  { %v3677_v43 = vmul.f32 %v4505_v5, %v4503_v15  ;;  %v3678_v2 = vadd.f32 %v3676_v9, %v6146_v52 }
 0x9b4   :  { %v3679_v3 = vadd.f32 %v3677_v43, %v6149_v39  ;;  %v3680_v55 = vmul.f32 0.125, %v3678_v2 }
 0x9b6   :  { %v3681_v45 = vmul.f32 0.125, %v3679_v3  ;;  %v3682_v56 = vpack.c.bf16 %v3680_v55, %v3680_v55 }
 0x9b8   :  { %v3683_v6 = vpack.c.bf16 %v3681_v45, %v3681_v45 }
 0x9ba   :  { %3851 = vmatprep.mubr.bf16.mxu0 %v3683_v6 }
 0x9bb   :  { %3852 = vmatmul.mubr.bf16.vlgmr.msra.gmra.mxu0 %v3682_v56 }
 0xa7b   :  { %v4220_v29 = vpop.f32.mrf.mxu0 }
 0xa7d   :  { %v4221_v49 = vpop.f32.mrf.mxu0 }
 0xa7e   :  { %v4222_v24 = vadd.f32 %v4221_v49, %v4220_v29 }
 0xa7f   :  { %v4223_v57 = vpop.f32.mrf.mxu0 }
 0xa80   :  { %v3854_v12 = vadd.f32 %v4222_v24, %v4187_v20 }
 0xa81   :  { %v4224_v14 = vpop.f32.mrf.mxu0 }
 0xa82   :  { %3859 = vmax.xlane.f32.xlu0 %v3854_v12 }
 0xb0b   :  { %v3860_v52 = vpop.xlane.xlu0 %3859 }
 0xb0c   :  { %v3861_v36 = vsub.f32 %v3854_v12, %v3860_v52 }
 0xb0e   :  { %v3862_v39 = vmul.f32 1.442695, %v3861_v36 }
 0xb10   :  { %4506 = vpow2.f32 %v3862_v39 }
 0xb1d   :  { %v4507_v23 = vpop.eup %4506 }
 0xb1e   :  { %3864 = vadd.xlane.f32.xlu0 %v4507_v23 }
 0xba7   :  { %v3865_v25 = vpop.xlane.xlu0 %3864 }
 0xba8   :  { %4508 = vlog2.f32 %v3865_v25 }
 0xbb5   :  { %v4509_v21 = vpop.eup %4508 }
 0xbb6   :  { %v3867_v11 = vmul.f32 0.6931472, %v4509_v21 }
 0xbb8   :  { %v3868_v46 = vadd.f32 %v3867_v11, %v3860_v52 }
 0xbba   :  { %v3869_v44 = vsub.f32 %v3854_v12, %v3868_v46 }
 0xbbc   :  { %3870 = vst [vmem:[%s6293_s6] sm:$0xff] %v3869_v44 }
 0xbbd   :  { %3875 = vsyncpa [#allocation4], 1 }
 0xbbe   :  { %3876 = vsyncpa [#allocation6], 1 }

</bundles_post_ra>
